<compile_context>
chip_gen: v7x
topology: tpu7x:2x2x1
jax: 0.10.0
libtpu: 0.0.40
codegen_flags: <defaults>
</compile_context>

<pallas_src>
import functools
import math

import jax
import jax.numpy as jnp
from jax.experimental import pallas as pl
from jax.experimental.pallas import tpu as pltpu


_VMEM_LIMIT = 32 * 1024 * 1024  # safe on v5e/v6e (128 MiB) and v7x (64 MiB) VMEM


# ---------------------------------------------------------------------------
# Pallas kernels
# ---------------------------------------------------------------------------
def _qkv_proj_kernel(x_ref, wq_ref, wk_ref, wv_ref, bq_ref, bk_ref, bv_ref,
                     q_ref, k_ref, v_ref):
    """Fused Q/K/V 1x1x1-conv projections, channel-first (C, tile_m) layout.

    The x tile is loaded into VMEM once and shared by the three matmuls.
    Weights are in torch conv layout (Cout, Cin); biases are (Cout, 1).
    """
    x = x_ref[...]
    q_ref[...] = (jnp.dot(wq_ref[...], x, preferred_element_type=jnp.float32)
                  + bq_ref[...]).astype(q_ref.dtype)
    k_ref[...] = (jnp.dot(wk_ref[...], x, preferred_element_type=jnp.float32)
                  + bk_ref[...]).astype(k_ref.dtype)
    v_ref[...] = (jnp.dot(wv_ref[...], x, preferred_element_type=jnp.float32)
                  + bv_ref[...]).astype(v_ref.dtype)


def _attention_kernel(q_ref, k_ref, v_ref, o_ref, *, scale):
    """Batched axial attention: G heads per grid step, blocks (G, A, c)."""
    # Fold the softmax scale into Q (scales G*A*c elements instead of G*A*A).
    q = q_ref[...] * scale
    k = k_ref[...]
    v = v_ref[...]
    # scores[g, a, b] = sum_c q[g, a, c] * k[g, b, c]
    s = jax.lax.dot_general(q, k, (((2,), (2,)), ((0,), (0,))),
                            preferred_element_type=jnp.float32)
    s = s - jnp.max(s, axis=-1, keepdims=True)
    p = jnp.exp(s)
    denom = jnp.sum(p, axis=-1, keepdims=True)
    # out[g, a, c] = sum_b p[g, a, b] * v[g, b, c]
    o = jax.lax.dot_general(p, v, (((2,), (1,)), ((0,), (0,))),
                            preferred_element_type=jnp.float32)
    # Reciprocal on the EUP slot (free) instead of a VALU divide over (G, A, c).
    o_ref[...] = (o * pl.reciprocal(denom, approx=True)).astype(o_ref.dtype)


def _out_proj_act_kernel(a3_ref, a4_ref, x_ref, w_ref, b_ref, o_ref):
    """Fused module epilogue in channel-first (C, tile_m) layout:

        act( Wo@attn3 + bo + x  +  Wo@attn4 + bo + x )
      = act( Wo @ (attn3 + attn4) + 2*(bo + x) )
    """
    s = a3_ref[...] + a4_ref[...]
    y = jnp.dot(w_ref[...], s, preferred_element_type=jnp.float32)
    y = y + 2.0 * (x_ref[...] + b_ref[...])
    # TODO(synk): `activation` is an abstract injected torch.nn.Module; instantiated as ReLU.
    o_ref[...] = jnp.maximum(y, 0.0).astype(o_ref.dtype)


# ---------------------------------------------------------------------------
# Pallas wrappers
# ---------------------------------------------------------------------------
def pallas_qkv_proj(x_cm, wq, wk, wv, bq, bk, bv, tile_m=512):
    """x_cm: (C, M) channel-first flattened input; returns (q, k, v) each (C, M)."""
    C, M = x_cm.shape
    tile_m = min(tile_m, M)
    grid = (pl.cdiv(M, tile_m),)          # tail blocks are masked by Pallas
    x_spec = pl.BlockSpec((C, tile_m), lambda i: (0, i))
    w_spec = pl.BlockSpec((C, C), lambda i: (0, 0))
    b_spec = pl.BlockSpec((C, 1), lambda i: (0, 0))
    o_spec = pl.BlockSpec((C, tile_m), lambda i: (0, i))
    out_sds = jax.ShapeDtypeStruct((C, M), x_cm.dtype)
    return pl.pallas_call(
        _qkv_proj_kernel,
        out_shape=(out_sds, out_sds, out_sds),
        grid=grid,
        in_specs=[x_spec, w_spec, w_spec, w_spec, b_spec, b_spec, b_spec],
        out_specs=(o_spec, o_spec, o_spec),
        compiler_params=pltpu.CompilerParams(
            dimension_semantics=("parallel",),
            vmem_limit_bytes=_VMEM_LIMIT),
    )(x_cm, wq, wk, wv, bq, bk, bv)


def pallas_out_proj_act(a3_cm, a4_cm, x_cm, wo, bo, tile_m=512):
    """Fused dual output projection + residual(2x) + activation in (C, M) layout."""
    C, M = x_cm.shape
    tile_m = min(tile_m, M)
    grid = (pl.cdiv(M, tile_m),)
    t_spec = pl.BlockSpec((C, tile_m), lambda i: (0, i))
    w_spec = pl.BlockSpec((C, C), lambda i: (0, 0))
    b_spec = pl.BlockSpec((C, 1), lambda i: (0, 0))
    return pl.pallas_call(
        _out_proj_act_kernel,
        out_shape=jax.ShapeDtypeStruct((C, M), x_cm.dtype),
        grid=grid,
        in_specs=[t_spec, t_spec, t_spec, w_spec, b_spec],
        out_specs=t_spec,
        compiler_params=pltpu.CompilerParams(
            dimension_semantics=("parallel",),
            vmem_limit_bytes=_VMEM_LIMIT),
    )(a3_cm, a4_cm, x_cm, wo, bo)


def _pick_head_group(nh, target=32):
    """Largest divisor of nh <= target that still leaves >= 2 grid steps
    (so both TensorCores of a v7x chip receive work)."""
    cap = nh // 2 if nh >= 2 else 1
    g = max(1, min(target, cap))
    while nh % g:
        g -= 1
    return g


def pallas_axial_attention(q, k, v, scale):
    """q, k, v: (NH, A, c); softmax attention over A per head, G heads per step."""
    NH, A, c = q.shape
    G = _pick_head_group(NH)
    kern = functools.partial(_attention_kernel, scale=scale)
    spec = pl.BlockSpec((G, A, c), lambda i: (i, 0, 0))
    # NOTE: at demo shapes c=8 the output stores are lane-masked; repacking to a
    # lane-dense (A, G*c) slab would cost an extra full-tensor HBM transpose in
    # the wrapper, which is more expensive than the masked stores at this size.
    # At realistic feature dims (>=128) the layout is lane-dense as-is.
    # TODO(synk): for large axial lengths, tile the KV axis with a flash-style
    # online softmax instead of materializing the full (G, A, A) score block.
    return pl.pallas_call(
        kern,
        out_shape=jax.ShapeDtypeStruct((NH, A, c), q.dtype),
        grid=(NH // G,),
        in_specs=[spec, spec, spec],
        out_specs=spec,
        compiler_params=pltpu.CompilerParams(
            dimension_semantics=("parallel",),
            vmem_limit_bytes=_VMEM_LIMIT),
    )(q, k, v)


# ---------------------------------------------------------------------------
# Forward pass (mirrors AxialAttentionModule.forward with sum_axial_out=True)
# ---------------------------------------------------------------------------
def axial_attention_module_forward(x, params):
    """x: (B, C, D, H, W) NCDHW (torch layout). Weights (Cout, Cin), biases (Cout,)."""
    B, C, D, H, W = x.shape
    M = B * D * H * W

    # Channel-first flattened layout (C, M): the lane axis is the large spatial
    # dim, so projection kernels are lane-dense on both reads and writes.
    x_cm = jnp.transpose(x, (1, 0, 2, 3, 4)).reshape(C, M)

    q_cm, k_cm, v_cm = pallas_qkv_proj(
        x_cm,
        params["wq"], params["wk"], params["wv"],
        params["bq"].reshape(C, 1), params["bk"].reshape(C, 1),
        params["bv"].reshape(C, 1))

    # Torch component: perm puts `axis` at position 1, giving (b, a1, e=C, c=D, a2);
    # attention is per head (b, a1, e) over a2 with feature dim c=D.
    scale = 1.0 / math.sqrt(D)

    def to_heads(t_cm, axis):
        t5 = t_cm.reshape(C, B, D, H, W)
        if axis == 3:       # heads (C, B, H), attend over W, features D
            t5 = jnp.transpose(t5, (0, 1, 3, 4, 2))      # (C, B, H, W, D)
        else:               # axis == 4: heads (C, B, W), attend over H, features D
            t5 = jnp.transpose(t5, (0, 1, 4, 3, 2))      # (C, B, W, H, D)
        return t5.reshape(-1, t5.shape[-2], t5.shape[-1])

    def from_heads(o, axis):
        if axis == 3:
            o5 = o.reshape(C, B, H, W, D)
            o5 = jnp.transpose(o5, (0, 1, 4, 2, 3))      # (C, B, D, H, W)
        else:
            o5 = o.reshape(C, B, W, H, D)
            o5 = jnp.transpose(o5, (0, 1, 4, 3, 2))      # (C, B, D, H, W)
        return o5.reshape(C, M)

    attn_cm = []
    for axis in (3, 4):
        oh = pallas_axial_attention(to_heads(q_cm, axis), to_heads(k_cm, axis),
                                    to_heads(v_cm, axis), scale)
        attn_cm.append(from_heads(oh, axis))

    # Fused: Wo@(attn3 + attn4) + 2*(bo + x), then activation.
    y_cm = pallas_out_proj_act(attn_cm[0], attn_cm[1], x_cm,
                               params["wo"], params["bo"].reshape(C, 1))
    return jnp.transpose(y_cm.reshape(C, B, D, H, W), (1, 0, 2, 3, 4))


# ---------------------------------------------------------------------------
# Pure-JAX reference (follows the torch module literally) for verification
# ---------------------------------------------------------------------------
def reference_forward(x, params):
    B, C, D, H, W = x.shape

    def conv1(t, w, b):   # 1x1x1 conv, weight (Cout, Cin), bias (Cout,)
        return jnp.einsum("oc,bcdhw->bodhw", w, t) + b[None, :, None, None, None]

    def component(x, axis):
        perm = [0, axis] + [n for n in range(1, 5) if n != axis]
        inv_perm = [0] + list(range(2, 6))
        inv_perm[axis] = 1
        inv_perm = [min(n, 4) for n in inv_perm]

        value = conv1(x, params["wv"], params["bv"])
        key = conv1(x, params["wk"], params["bk"])
        query = conv1(x, params["wq"], params["bq"])

        kp = jnp.transpose(key, perm)
        qp = jnp.transpose(query, perm)
        vp = jnp.transpose(value, perm)
        b_, a1, e, c, a2 = kp.shape
        kf = kp.reshape(-1, e, c, a2)
        qf = qp.reshape(-1, e, c, a2)
        vf = vp.reshape(-1, e, c, a2)

        scale = 1.0 / math.sqrt(c)
        s = jnp.einsum("neca,necb->neab", qf, kf) * scale
        s = s - jnp.max(s, axis=-1, keepdims=True)
        p = jnp.exp(s)
        p = p / jnp.sum(p, axis=-1, keepdims=True)
        r = jnp.einsum("neab,necb->neca", p, vf)
        r = r.reshape(b_, a1, e, c, a2)
        r = jnp.transpose(r, inv_perm)                   # back to (B, C, D, H, W)
        return conv1(r, params["wo"], params["bo"]) + x

    out = component(x, 3) + component(x, 4)
    return jnp.maximum(out, 0.0)                         # activation = ReLU


# ---------------------------------------------------------------------------
# Main
# ---------------------------------------------------------------------------
if __name__ == "__main__":
    B, C, D, H, W = 2, 4, 8, 16, 16     # (batch, channels, d1, d2, d3)
    dtype = jnp.float32

    key = jax.random.PRNGKey(0)
    keys = jax.random.split(key, 9)
    x = jax.random.normal(keys[0], (B, C, D, H, W), dtype)

    def make_proj(kw, kb):
        w = jax.random.normal(kw, (C, C), dtype) * 0.3   # torch conv weight (Cout, Cin)
        b = jax.random.normal(kb, (C,), dtype) * 0.1
        return w, b

    wv, bv = make_proj(keys[1], keys[2])
    wk, bk = make_proj(keys[3], keys[4])
    wq, bq = make_proj(keys[5], keys[6])
    wo, bo = make_proj(keys[7], keys[8])
    params = dict(wv=wv, bv=bv, wk=wk, bk=bk, wq=wq, bq=bq, wo=wo, bo=bo)

    fwd = jax.jit(axial_attention_module_forward)
    out = jax.block_until_ready(fwd(x, params))

    ref = jax.block_until_ready(reference_forward(x, params))
    assert out.shape == x.shape and out.dtype == x.dtype
    # pl.reciprocal(approx=True) in the softmax normalization -> slightly looser tol.
    assert jnp.allclose(out, ref, atol=5e-3, rtol=5e-3), "mismatch vs reference"

    print("KERNEL_OK")
</pallas_src>

<mosaic_0001>
module attributes {stable_mosaic.version = 11 : i64} {
  func.func @_qkv_proj_kernel(%arg0: i32, %arg1: memref<4x512xf32, #tpu.memory_space<vmem>>, %arg2: memref<4x4xf32, #tpu.memory_space<vmem>>, %arg3: memref<4x4xf32, #tpu.memory_space<vmem>>, %arg4: memref<4x4xf32, #tpu.memory_space<vmem>>, %arg5: memref<4x1xf32, #tpu.memory_space<vmem>>, %arg6: memref<4x1xf32, #tpu.memory_space<vmem>>, %arg7: memref<4x1xf32, #tpu.memory_space<vmem>>, %arg8: memref<4x512xf32, #tpu.memory_space<vmem>>, %arg9: memref<4x512xf32, #tpu.memory_space<vmem>>, %arg10: memref<4x512xf32, #tpu.memory_space<vmem>>) attributes {dimension_semantics = [#tpu.dimension_semantics<parallel>], iteration_bounds = array<i64: 8>, scalar_prefetch = 0 : i64, scratch_operands = 0 : i64, tpu.core_type = #tpu.core_type<tc>, window_params = [{transform_indices = @transform_0, window_bounds = array<i64: 4, 512>}, {pipeline_mode = #tpu.pipeline_mode<synchronous>, transform_indices = @transform_1, window_bounds = array<i64: 4, 4>}, {pipeline_mode = #tpu.pipeline_mode<synchronous>, transform_indices = @transform_2, window_bounds = array<i64: 4, 4>}, {pipeline_mode = #tpu.pipeline_mode<synchronous>, transform_indices = @transform_3, window_bounds = array<i64: 4, 4>}, {pipeline_mode = #tpu.pipeline_mode<synchronous>, transform_indices = @transform_4, window_bounds = array<i64: 4, 1>}, {pipeline_mode = #tpu.pipeline_mode<synchronous>, transform_indices = @transform_5, window_bounds = array<i64: 4, 1>}, {pipeline_mode = #tpu.pipeline_mode<synchronous>, transform_indices = @transform_6, window_bounds = array<i64: 4, 1>}, {transform_indices = @transform_7, window_bounds = array<i64: 4, 512>}, {transform_indices = @transform_8, window_bounds = array<i64: 4, 512>}, {transform_indices = @transform_9, window_bounds = array<i64: 4, 512>}]} {
    %c0 = arith.constant 0 : index
    %c0_0 = arith.constant 0 : index
    %0 = vector.load %arg1[%c0, %c0_0] : memref<4x512xf32, #tpu.memory_space<vmem>>, vector<4x512xf32>
    %c0_1 = arith.constant 0 : index
    %c0_2 = arith.constant 0 : index
    %1 = vector.load %arg2[%c0_1, %c0_2] : memref<4x4xf32, #tpu.memory_space<vmem>>, vector<4x4xf32>
    %cst = arith.constant dense<0.000000e+00> : vector<4x512xf32>
    %2 = tpu.matmul %1, %0, %cst {dimension_numbers = #tpu.dot_dimension_numbers<[1], [0], [0], [1], [0, 0, 1, 1], [], []>} : vector<4x4xf32>, vector<4x512xf32>, vector<4x512xf32> -> vector<4x512xf32>
    %c0_3 = arith.constant 0 : index
    %c0_4 = arith.constant 0 : index
    %3 = vector.load %arg5[%c0_3, %c0_4] : memref<4x1xf32, #tpu.memory_space<vmem>>, vector<4x1xf32>
    %4 = vector.broadcast %3 : vector<4x1xf32> to vector<4x512xf32>
    %5 = arith.addf %2, %4 : vector<4x512xf32>
    %c0_5 = arith.constant 0 : index
    %c0_6 = arith.constant 0 : index
    %6 = vector.load %arg8[%c0_5, %c0_6] : memref<4x512xf32, #tpu.memory_space<vmem>>, vector<4x512xf32>
    tpu.vector_store %arg8[%c0_5, %c0_6], %5 {strides = array<i32>} : memref<4x512xf32, #tpu.memory_space<vmem>>, vector<4x512xf32>,
    %c0_7 = arith.constant 0 : index
    %c0_8 = arith.constant 0 : index
    %7 = vector.load %arg3[%c0_7, %c0_8] : memref<4x4xf32, #tpu.memory_space<vmem>>, vector<4x4xf32>
    %cst_9 = arith.constant dense<0.000000e+00> : vector<4x512xf32>
    %8 = tpu.matmul %7, %0, %cst_9 {dimension_numbers = #tpu.dot_dimension_numbers<[1], [0], [0], [1], [0, 0, 1, 1], [], []>} : vector<4x4xf32>, vector<4x512xf32>, vector<4x512xf32> -> vector<4x512xf32>
    %c0_10 = arith.constant 0 : index
    %c0_11 = arith.constant 0 : index
    %9 = vector.load %arg6[%c0_10, %c0_11] : memref<4x1xf32, #tpu.memory_space<vmem>>, vector<4x1xf32>
    %10 = vector.broadcast %9 : vector<4x1xf32> to vector<4x512xf32>
    %11 = arith.addf %8, %10 : vector<4x512xf32>
    %c0_12 = arith.constant 0 : index
    %c0_13 = arith.constant 0 : index
    %12 = vector.load %arg9[%c0_12, %c0_13] : memref<4x512xf32, #tpu.memory_space<vmem>>, vector<4x512xf32>
    tpu.vector_store %arg9[%c0_12, %c0_13], %11 {strides = array<i32>} : memref<4x512xf32, #tpu.memory_space<vmem>>, vector<4x512xf32>,
    %c0_14 = arith.constant 0 : index
    %c0_15 = arith.constant 0 : index
    %13 = vector.load %arg4[%c0_14, %c0_15] : memref<4x4xf32, #tpu.memory_space<vmem>>, vector<4x4xf32>
    %cst_16 = arith.constant dense<0.000000e+00> : vector<4x512xf32>
    %14 = tpu.matmul %13, %0, %cst_16 {dimension_numbers = #tpu.dot_dimension_numbers<[1], [0], [0], [1], [0, 0, 1, 1], [], []>} : vector<4x4xf32>, vector<4x512xf32>, vector<4x512xf32> -> vector<4x512xf32>
    %c0_17 = arith.constant 0 : index
    %c0_18 = arith.constant 0 : index
    %15 = vector.load %arg7[%c0_17, %c0_18] : memref<4x1xf32, #tpu.memory_space<vmem>>, vector<4x1xf32>
    %16 = vector.broadcast %15 : vector<4x1xf32> to vector<4x512xf32>
    %17 = arith.addf %14, %16 : vector<4x512xf32>
    %c0_19 = arith.constant 0 : index
    %c0_20 = arith.constant 0 : index
    %18 = vector.load %arg10[%c0_19, %c0_20] : memref<4x512xf32, #tpu.memory_space<vmem>>, vector<4x512xf32>
    tpu.vector_store %arg10[%c0_19, %c0_20], %17 {strides = array<i32>} : memref<4x512xf32, #tpu.memory_space<vmem>>, vector<4x512xf32>,
    return
  }
  func.func @transform_0(%arg0: i32) -> (i32, i32) {
    %c0_i32 = arith.constant 0 : i32
    %c0_i32_0 = arith.constant 0 : i32
    return %c0_i32, %arg0 : i32, i32
  }
  func.func @transform_1(%arg0: i32) -> (i32, i32) {
    %c0_i32 = arith.constant 0 : i32
    %c0_i32_0 = arith.constant 0 : i32
    %c0_i32_1 = arith.constant 0 : i32
    return %c0_i32, %c0_i32_0 : i32, i32
  }
  func.func @transform_2(%arg0: i32) -> (i32, i32) {
    %c0_i32 = arith.constant 0 : i32
    %c0_i32_0 = arith.constant 0 : i32
    %c0_i32_1 = arith.constant 0 : i32
    return %c0_i32, %c0_i32_0 : i32, i32
  }
  func.func @transform_3(%arg0: i32) -> (i32, i32) {
    %c0_i32 = arith.constant 0 : i32
    %c0_i32_0 = arith.constant 0 : i32
    %c0_i32_1 = arith.constant 0 : i32
    return %c0_i32, %c0_i32_0 : i32, i32
  }
  func.func @transform_4(%arg0: i32) -> (i32, i32) {
    %c0_i32 = arith.constant 0 : i32
    %c0_i32_0 = arith.constant 0 : i32
    %c0_i32_1 = arith.constant 0 : i32
    return %c0_i32, %c0_i32_0 : i32, i32
  }
  func.func @transform_5(%arg0: i32) -> (i32, i32) {
    %c0_i32 = arith.constant 0 : i32
    %c0_i32_0 = arith.constant 0 : i32
    %c0_i32_1 = arith.constant 0 : i32
    return %c0_i32, %c0_i32_0 : i32, i32
  }
  func.func @transform_6(%arg0: i32) -> (i32, i32) {
    %c0_i32 = arith.constant 0 : i32
    %c0_i32_0 = arith.constant 0 : i32
    %c0_i32_1 = arith.constant 0 : i32
    return %c0_i32, %c0_i32_0 : i32, i32
  }
  func.func @transform_7(%arg0: i32) -> (i32, i32) {
    %c0_i32 = arith.constant 0 : i32
    %c0_i32_0 = arith.constant 0 : i32
    return %c0_i32, %arg0 : i32, i32
  }
  func.func @transform_8(%arg0: i32) -> (i32, i32) {
    %c0_i32 = arith.constant 0 : i32
    %c0_i32_0 = arith.constant 0 : i32
    return %c0_i32, %arg0 : i32, i32
  }
  func.func @transform_9(%arg0: i32) -> (i32, i32) {
    %c0_i32 = arith.constant 0 : i32
    %c0_i32_0 = arith.constant 0 : i32
    return %c0_i32, %arg0 : i32, i32
  }
}

module attributes {stable_mosaic.version = 11 : i64} {
  func.func @_attention_kernel(%arg0: i32, %arg1: memref<32x16x8xf32, #tpu.memory_space<vmem>>, %arg2: memref<32x16x8xf32, #tpu.memory_space<vmem>>, %arg3: memref<32x16x8xf32, #tpu.memory_space<vmem>>, %arg4: memref<32x16x8xf32, #tpu.memory_space<vmem>>) attributes {dimension_semantics = [#tpu.dimension_semantics<parallel>], iteration_bounds = array<i64: 4>, scalar_prefetch = 0 : i64, scratch_operands = 0 : i64, tpu.core_type = #tpu.core_type<tc>, window_params = [{transform_indices = @transform_0, window_bounds = array<i64: 32, 16, 8>}, {transform_indices = @transform_1, window_bounds = array<i64: 32, 16, 8>}, {transform_indices = @transform_2, window_bounds = array<i64: 32, 16, 8>}, {transform_indices = @transform_3, window_bounds = array<i64: 32, 16, 8>}]} {
    %c0 = arith.constant 0 : index
    %c0_0 = arith.constant 0 : index
    %c0_1 = arith.constant 0 : index
    %0 = vector.load %arg1[%c0, %c0_0, %c0_1] : memref<32x16x8xf32, #tpu.memory_space<vmem>>, vector<32x16x8xf32>
    %cst = arith.constant 0.353553385 : f32
    %1 = vector.broadcast %cst : f32 to vector<32x16x8xf32>
    %2 = arith.mulf %0, %1 : vector<32x16x8xf32>
    %c0_2 = arith.constant 0 : index
    %c0_3 = arith.constant 0 : index
    %c0_4 = arith.constant 0 : index
    %3 = vector.load %arg2[%c0_2, %c0_3, %c0_4] : memref<32x16x8xf32, #tpu.memory_space<vmem>>, vector<32x16x8xf32>
    %c0_5 = arith.constant 0 : index
    %c0_6 = arith.constant 0 : index
    %c0_7 = arith.constant 0 : index
    %4 = vector.load %arg3[%c0_5, %c0_6, %c0_7] : memref<32x16x8xf32, #tpu.memory_space<vmem>>, vector<32x16x8xf32>
    %cst_8 = arith.constant dense<0.000000e+00> : vector<32x16x16xf32>
    %5 = tpu.matmul %2, %3, %cst_8 {dimension_numbers = #tpu.dot_dimension_numbers<[2], [2], [1], [1], [0, 0, 0, 1, 1, 1], [0], [0]>} : vector<32x16x8xf32>, vector<32x16x8xf32>, vector<32x16x16xf32> -> vector<32x16x16xf32>
    %cst_9 = arith.constant dense<0xFF800000> : vector<32x16xf32>
    %6 = vector.multi_reduction <maximumf>, %5, %cst_9 [2] : vector<32x16x16xf32> to vector<32x16xf32>
    %7 = vector.shape_cast %6 : vector<32x16xf32> to vector<32x16x1xf32>
    %8 = vector.broadcast %7 : vector<32x16x1xf32> to vector<32x16x16xf32>
    %9 = arith.subf %5, %8 : vector<32x16x16xf32>
    %10 = math.exp %9 : vector<32x16x16xf32>
    %cst_10 = arith.constant dense<0.000000e+00> : vector<32x16xf32>
    %11 = vector.multi_reduction <add>, %10, %cst_10 [2] : vector<32x16x16xf32> to vector<32x16xf32>
    %12 = vector.shape_cast %11 : vector<32x16xf32> to vector<32x16x1xf32>
    %cst_11 = arith.constant dense<0.000000e+00> : vector<32x16x8xf32>
    %13 = tpu.matmul %10, %4, %cst_11 {dimension_numbers = #tpu.dot_dimension_numbers<[2], [1], [1], [2], [0, 0, 0, 1, 1, 2], [0], [0]>} : vector<32x16x16xf32>, vector<32x16x8xf32>, vector<32x16x8xf32> -> vector<32x16x8xf32>
    %14 = tpu.reciprocal %12 {approx = true} : vector<32x16x1xf32> -> vector<32x16x1xf32>
    %15 = vector.broadcast %14 : vector<32x16x1xf32> to vector<32x16x8xf32>
    %16 = arith.mulf %13, %15 : vector<32x16x8xf32>
    %c0_12 = arith.constant 0 : index
    %c0_13 = arith.constant 0 : index
    %c0_14 = arith.constant 0 : index
    %17 = vector.load %arg4[%c0_12, %c0_13, %c0_14] : memref<32x16x8xf32, #tpu.memory_space<vmem>>, vector<32x16x8xf32>
    tpu.vector_store %arg4[%c0_12, %c0_13, %c0_14], %16 {strides = array<i32>} : memref<32x16x8xf32, #tpu.memory_space<vmem>>, vector<32x16x8xf32>,
    return
  }
  func.func @transform_0(%arg0: i32) -> (i32, i32, i32) {
    %c0_i32 = arith.constant 0 : i32
    %c0_i32_0 = arith.constant 0 : i32
    %c0_i32_1 = arith.constant 0 : i32
    return %arg0, %c0_i32, %c0_i32_0 : i32, i32, i32
  }
  func.func @transform_1(%arg0: i32) -> (i32, i32, i32) {
    %c0_i32 = arith.constant 0 : i32
    %c0_i32_0 = arith.constant 0 : i32
    %c0_i32_1 = arith.constant 0 : i32
    return %arg0, %c0_i32, %c0_i32_0 : i32, i32, i32
  }
  func.func @transform_2(%arg0: i32) -> (i32, i32, i32) {
    %c0_i32 = arith.constant 0 : i32
    %c0_i32_0 = arith.constant 0 : i32
    %c0_i32_1 = arith.constant 0 : i32
    return %arg0, %c0_i32, %c0_i32_0 : i32, i32, i32
  }
  func.func @transform_3(%arg0: i32) -> (i32, i32, i32) {
    %c0_i32 = arith.constant 0 : i32
    %c0_i32_0 = arith.constant 0 : i32
    %c0_i32_1 = arith.constant 0 : i32
    return %arg0, %c0_i32, %c0_i32_0 : i32, i32, i32
  }
}

module attributes {stable_mosaic.version = 11 : i64} {
  func.func @_out_proj_act_kernel(%arg0: i32, %arg1: memref<4x512xf32, #tpu.memory_space<vmem>>, %arg2: memref<4x512xf32, #tpu.memory_space<vmem>>, %arg3: memref<4x512xf32, #tpu.memory_space<vmem>>, %arg4: memref<4x4xf32, #tpu.memory_space<vmem>>, %arg5: memref<4x1xf32, #tpu.memory_space<vmem>>, %arg6: memref<4x512xf32, #tpu.memory_space<vmem>>) attributes {dimension_semantics = [#tpu.dimension_semantics<parallel>], iteration_bounds = array<i64: 8>, scalar_prefetch = 0 : i64, scratch_operands = 0 : i64, tpu.core_type = #tpu.core_type<tc>, window_params = [{transform_indices = @transform_0, window_bounds = array<i64: 4, 512>}, {transform_indices = @transform_1, window_bounds = array<i64: 4, 512>}, {transform_indices = @transform_2, window_bounds = array<i64: 4, 512>}, {pipeline_mode = #tpu.pipeline_mode<synchronous>, transform_indices = @transform_3, window_bounds = array<i64: 4, 4>}, {pipeline_mode = #tpu.pipeline_mode<synchronous>, transform_indices = @transform_4, window_bounds = array<i64: 4, 1>}, {transform_indices = @transform_5, window_bounds = array<i64: 4, 512>}]} {
    %c0 = arith.constant 0 : index
    %c0_0 = arith.constant 0 : index
    %0 = vector.load %arg1[%c0, %c0_0] : memref<4x512xf32, #tpu.memory_space<vmem>>, vector<4x512xf32>
    %c0_1 = arith.constant 0 : index
    %c0_2 = arith.constant 0 : index
    %1 = vector.load %arg2[%c0_1, %c0_2] : memref<4x512xf32, #tpu.memory_space<vmem>>, vector<4x512xf32>
    %2 = arith.addf %0, %1 : vector<4x512xf32>
    %c0_3 = arith.constant 0 : index
    %c0_4 = arith.constant 0 : index
    %3 = vector.load %arg4[%c0_3, %c0_4] : memref<4x4xf32, #tpu.memory_space<vmem>>, vector<4x4xf32>
    %cst = arith.constant dense<0.000000e+00> : vector<4x512xf32>
    %4 = tpu.matmul %3, %2, %cst {dimension_numbers = #tpu.dot_dimension_numbers<[1], [0], [0], [1], [0, 0, 1, 1], [], []>} : vector<4x4xf32>, vector<4x512xf32>, vector<4x512xf32> -> vector<4x512xf32>
    %c0_5 = arith.constant 0 : index
    %c0_6 = arith.constant 0 : index
    %5 = vector.load %arg3[%c0_5, %c0_6] : memref<4x512xf32, #tpu.memory_space<vmem>>, vector<4x512xf32>
    %c0_7 = arith.constant 0 : index
    %c0_8 = arith.constant 0 : index
    %6 = vector.load %arg5[%c0_7, %c0_8] : memref<4x1xf32, #tpu.memory_space<vmem>>, vector<4x1xf32>
    %7 = vector.broadcast %6 : vector<4x1xf32> to vector<4x512xf32>
    %8 = arith.addf %5, %7 : vector<4x512xf32>
    %cst_9 = arith.constant 2.000000e+00 : f32
    %9 = vector.broadcast %cst_9 : f32 to vector<4x512xf32>
    %10 = arith.mulf %9, %8 : vector<4x512xf32>
    %11 = arith.addf %4, %10 : vector<4x512xf32>
    %cst_10 = arith.constant 0.000000e+00 : f32
    %12 = vector.broadcast %cst_10 : f32 to vector<4x512xf32>
    %13 = arith.maximumf %11, %12 : vector<4x512xf32>
    %c0_11 = arith.constant 0 : index
    %c0_12 = arith.constant 0 : index
    %14 = vector.load %arg6[%c0_11, %c0_12] : memref<4x512xf32, #tpu.memory_space<vmem>>, vector<4x512xf32>
    tpu.vector_store %arg6[%c0_11, %c0_12], %13 {strides = array<i32>} : memref<4x512xf32, #tpu.memory_space<vmem>>, vector<4x512xf32>,
    return
  }
  func.func @transform_0(%arg0: i32) -> (i32, i32) {
    %c0_i32 = arith.constant 0 : i32
    %c0_i32_0 = arith.constant 0 : i32
    return %c0_i32, %arg0 : i32, i32
  }
  func.func @transform_1(%arg0: i32) -> (i32, i32) {
    %c0_i32 = arith.constant 0 : i32
    %c0_i32_0 = arith.constant 0 : i32
    return %c0_i32, %arg0 : i32, i32
  }
  func.func @transform_2(%arg0: i32) -> (i32, i32) {
    %c0_i32 = arith.constant 0 : i32
    %c0_i32_0 = arith.constant 0 : i32
    return %c0_i32, %arg0 : i32, i32
  }
  func.func @transform_3(%arg0: i32) -> (i32, i32) {
    %c0_i32 = arith.constant 0 : i32
    %c0_i32_0 = arith.constant 0 : i32
    %c0_i32_1 = arith.constant 0 : i32
    return %c0_i32, %c0_i32_0 : i32, i32
  }
  func.func @transform_4(%arg0: i32) -> (i32, i32) {
    %c0_i32 = arith.constant 0 : i32
    %c0_i32_0 = arith.constant 0 : i32
    %c0_i32_1 = arith.constant 0 : i32
    return %c0_i32, %c0_i32_0 : i32, i32
  }
  func.func @transform_5(%arg0: i32) -> (i32, i32) {
    %c0_i32 = arith.constant 0 : i32
    %c0_i32_0 = arith.constant 0 : i32
    return %c0_i32, %arg0 : i32, i32
  }
}

</mosaic_0001>

<bundles_post_ra>
// kernel: axial_attention_module_forward.4
= control target key start
LH: loop header
LB: loop body
LE: loop exit
PB: predicated region body
PF: predicated region fallthrough
CT: control target
= control target key end

     0   :  { %s1096_s30 = smov 0   ;;  %s1161_s0 = inlined_call_operand.vmem [shape: f32[4,4096], index: 0, kind: input, shape index: {}]   ;;  %s1162_s1 = inlined_call_operand.vmem [shape: f32[4,4], index: 1, kind: input, shape index: {}]   ;;  %s1163_s2 = inlined_call_operand.vmem [shape: f32[4,4], index: 2, kind: input, shape index: {}]   ;;  %s1164_s3 = inlined_call_operand.vmem [shape: f32[4,4], index: 3, kind: input, shape index: {}]   ;;  %s1165_s4 = inlined_call_operand.vmem [shape: f32[4,1], index: 4, kind: input, shape index: {}]   ;;  %s1166_s5 = inlined_call_operand.vmem [shape: f32[4,1], index: 5, kind: input, shape index: {}]   ;;  %s1167_s6 = inlined_call_operand.vmem [shape: f32[4,1], index: 6, kind: input, shape index: {}]   ;;  %s1168_s7 = inlined_call_operand.vmem [shape: f32[4,4096], index: 7, kind: output, shape index: {0}]   ;;  %s1169_s8 = inlined_call_operand.vmem [shape: f32[4,4096], index: 8, kind: output, shape index: {1}]   ;;  %s1170_s9 = inlined_call_operand.vmem [shape: f32[4,4096], index: 9, kind: output, shape index: {2}]  }
   0x1 LB: > { %s989_s10 = sadd.s32 4294967295, %s1042_s30   ;;  %p993_p0 = scmp.ge.s32.totalorder %s1042_s30, 1  ;;  %s1042_s30 = sphi %s1096_s30, %s20_s30  }
   0x2   : > { %p293_p1 = scmp.lt.s32.totalorder %s1042_s30, 9 }
   0x4   : > { %p294_p2 = pnand %p993_p0, %p293_p1 }
   0x5   : > { %s994_s11 = sshll.u32 (!%p294_p2), %s989_s10, 2  ;;  %v1044_v0 = vmov (!%p294_p2), 0.0   ;;  %v1045_v1 = vmov (!%p294_p2), 0   ;;  %v366_v2 = vld [vmem:[%s1165_s4] sm:$0xf] (!%p294_p2)  ;;  %vm380_vm0 = vcmask (!%p294_p2), 1043456  }
   0x6   : > { %297 = sbr.rel (%p294_p2) target bundleno = 247 (0xf7), region = 48  ;;  %p340_p3 = scmp.lt.s32.totalorder (!%p294_p2), %s994_s11, 31  ;;  %453 = vmatprep.mubr.f32.mxu0 (!%p294_p2), %v1044_v0  ;;  %524 = vmatprep.mubr.f32.mxu1 (!%p294_p2), %v1044_v0  ;;  %v704_v3 = vld [vmem:[%s1167_s6] sm:$0xf] (!%p294_p2)  ;;  %vm376_vm1 = vcmask (!%p294_p2), 31744  }
   0x7   : > { %1032 = vset.pattern.permute.xlu0 (!%p294_p2), %v1045_v1  ;;  %1033 = vset.pattern.permute.xlu1 (!%p294_p2), %v1045_v1  ;;  %v542_v4 = vld [vmem:[%s1166_s5] sm:$0xf] (!%p294_p2) }
   0x8   : > { %369 = vperm.xlu0 (!%p294_p2), %1032, %v366_v2   ;;  %707 = vperm.xlu1 (!%p294_p2), %1033, %v704_v3   ;;  %v365_v9 = vld [vmem:[%s1162_s1] sm:$0xf] (!%p294_p2) }
   0x9   : > { %v541_v10 = vld [vmem:[%s1163_s2] sm:$0xf] (!%p294_p2) }
   0xa   : > { %v703_v11 = vld [vmem:[%s1164_s3] sm:$0xf] (!%p294_p2) }
   0xc   : > { %545 = vperm.xlu0 (!%p294_p2), %1032, %v542_v4  }
   0xd   : > { %s1172_s11 = smov (!%p340_p3, %s994_s11), 31 }
   0xe   : > { %s1113_s18 = sshll.u32 %s1172_s11, 2 }
   0xf   : > { %s343_s21 = scalar_lea.vmem %s1161_s0, %s1113_s18  ;;  %s349_s10 = scalar_lea.vmem %s1168_s7, %s1113_s18 }
  0x10   : > { %v363_v5 = vld [vmem:[%s343_s21] sm:$0xff]  ;;  %v364_v6 = vld [vmem:[%s343_s21 + $0x8] sm:$0xff]  ;;  %s355_s13 = scalar_lea.vmem %s1169_s8, %s1113_s18  ;;  %s361_s16 = scalar_lea.vmem %s1170_s9, %s1113_s18 }
  0x11   : > { %v374_v7 = vcombine.high %v363_v5, %v363_v5  ;;  %v375_v8 = vcombine.high %v364_v6, %v364_v6 }
  0x13   : > { %1002 = vmatprep.subr.msk.mxu0 %vm380_vm0, %v374_v7  ;;  %1005 = vmatprep.subr.msk.mxu1 %vm380_vm0, %v375_v8 }
  0x14   : > { %1003 = vmatpush1.msk.msra.mxu0 %vm380_vm0, %v363_v5  ;;  %1006 = vmatpush1.msk.msra.mxu1 %vm380_vm0, %v364_v6 }
  0x15   : > { %1004 = vmatmul.mubr.msk.f32.vlgmr.msra.gmra.mrb[0].mxu0 %vm376_vm1, %v365_v9  ;;  %1007 = vmatmul.mubr.msk.f32.vlgmr.msra.gmra.mrb[0].mxu1 %vm376_vm1, %v365_v9 }
  0x16   : > { %1008 = vmatprep.subr.msk.mxu0 %vm380_vm0, %v374_v7  ;;  %1011 = vmatprep.subr.msk.mxu1 %vm380_vm0, %v375_v8 }
  0x17   : > { %1009 = vmatpush1.msk.msra.mxu0 %vm380_vm0, %v363_v5  ;;  %1012 = vmatpush1.msk.msra.mxu1 %vm380_vm0, %v364_v6 }
  0x18   : > { %615 = vmatprep.mubr.f32.mxu0 %v1044_v0  ;;  %686 = vmatprep.mubr.f32.mxu1 %v1044_v0 }
  0x19   : > { %1010 = vmatmul.mubr.msk.f32.vlgmr.msra.gmra.mrb[2].mxu0 %vm376_vm1, %v541_v10  ;;  %1013 = vmatmul.mubr.msk.f32.vlgmr.msra.gmra.mrb[2].mxu1 %vm376_vm1, %v541_v10 }
  0x1a   : > { %1014 = vmatprep.subr.msk.mxu0 %vm380_vm0, %v374_v7  ;;  %1017 = vmatprep.subr.msk.mxu1 %vm380_vm0, %v375_v8 }
  0x1b   : > { %1015 = vmatpush1.msk.msra.mxu0 %vm380_vm0, %v363_v5  ;;  %1018 = vmatpush1.msk.msra.mxu1 %vm380_vm0, %v364_v6 }
  0x1c   : > { %777 = vmatprep.mubr.f32.mxu0 %v1044_v0  ;;  %848 = vmatprep.mubr.f32.mxu1 %v1044_v0 }
  0x1d   : > { %1016 = vmatmul.mubr.msk.f32.vlgmr.msra.gmra.mrb[4].mxu0 %vm376_vm1, %v703_v11  ;;  %1019 = vmatmul.mubr.msk.f32.vlgmr.msra.gmra.mrb[4].mxu1 %vm376_vm1, %v703_v11 }
  0x87   : > { %v370_v12 = vpop.permute.xlu0 %369  ;;  %v708_v32 = vpop.permute.xlu1 %707 }
  0x8b   : > { %v546_v21 = vpop.permute.xlu0 %545 }
  0xe8   : > { %v455_v13 = vpop.f32.mrb[0].mxu0  ;;  %v526_v14 = vpop.f32.mrb[0].mxu1 }
  0xe9   : > { %v456_v15 = vadd.f32 %v455_v13, %v370_v12  ;;  %v457_v16 = vpop.f32.mrb[1].mxu0  ;;  %v527_v17 = vadd.f32 %v526_v14, %v370_v12  ;;  %v528_v18 = vpop.f32.mrb[1].mxu1 }
  0xea   : > { %v458_v19 = vadd.f32 %v457_v16, %v370_v12  ;;  %v529_v20 = vadd.f32 %v528_v18, %v370_v12 }
  0xec   : > { %v535_v22 = vcombine.low %v456_v15, %v458_v19  ;;  %v536_v23 = vcombine.low %v527_v17, %v529_v20  ;;  %v617_v24 = vpop.f32.mrb[2].mxu0  ;;  %v688_v25 = vpop.f32.mrb[2].mxu1 }
  0xed   : > { %v618_v26 = vadd.f32 %v617_v24, %v546_v21  ;;  %v689_v27 = vadd.f32 %v688_v25, %v546_v21  ;;  %v619_v28 = vpop.f32.mrb[3].mxu0  ;;  %v690_v29 = vpop.f32.mrb[3].mxu1 }
  0xee   : > { %539 = vst [vmem:[%s349_s10] sm:$0xff] %v535_v22  ;;  %540 = vst [vmem:[%s349_s10 + $0x8] sm:$0xff] %v536_v23  ;;  %v620_v30 = vadd.f32 %v619_v28, %v546_v21  ;;  %v691_v31 = vadd.f32 %v690_v29, %v546_v21 }
  0xf0   : > { %v697_v33 = vcombine.low %v618_v26, %v620_v30  ;;  %v698_v34 = vcombine.low %v689_v27, %v691_v31  ;;  %v779_v35 = vpop.f32.mrb[4].mxu0  ;;  %v850_v36 = vpop.f32.mrb[4].mxu1 }
  0xf1   : > { %v780_v37 = vadd.f32 %v779_v35, %v708_v32  ;;  %v851_v38 = vadd.f32 %v850_v36, %v708_v32  ;;  %v781_v39 = vpop.f32.mrb[5].mxu0  ;;  %v852_v40 = vpop.f32.mrb[5].mxu1 }
  0xf2   : > { %701 = vst [vmem:[%s355_s13] sm:$0xff] %v697_v33  ;;  %702 = vst [vmem:[%s355_s13 + $0x8] sm:$0xff] %v698_v34  ;;  %v782_v41 = vadd.f32 %v781_v39, %v708_v32  ;;  %v853_v42 = vadd.f32 %v852_v40, %v708_v32 }
  0xf4   : > { %v859_v43 = vcombine.low %v780_v37, %v782_v41  ;;  %v860_v44 = vcombine.low %v851_v38, %v853_v42 }
  0xf6   : > { %863 = vst [vmem:[%s361_s16] sm:$0xff] %v859_v43  ;;  %864 = vst [vmem:[%s361_s16 + $0x8] sm:$0xff] %v860_v44 }
  0xf7 PF: > { %s20_s30 = sadd.s32 1, %s1042_s30  }
  0xf8   : > { %p17_p4 = scmp.ge.s32.totalorder %s20_s30, 10  }
  0xfa   :  { %19 = sbr.rel (!%p17_p4) target bundleno = 1 (0x1), region = 102 }

// kernel: axial_attention_module_forward.6
= control target key start
LH: loop header
LB: loop body
LE: loop exit
PB: predicated region body
PF: predicated region fallthrough
CT: control target
= control target key end

     0   :  { %s8244_s12 = smov 0   ;;  %s9361_s0 = inlined_call_operand.vmem [shape: f32[128,16,8], index: 0, kind: input, shape index: {}]   ;;  %s9362_s1 = inlined_call_operand.vmem [shape: f32[128,16,8], index: 1, kind: input, shape index: {}]   ;;  %s9363_s2 = inlined_call_operand.vmem [shape: f32[128,16,8], index: 2, kind: input, shape index: {}]   ;;  %s9364_s3 = inlined_call_operand.vmem [shape: f32[128,16,8], index: 3, kind: output, shape index: {}]  }
   0x1 LB: > { %s6713_s13 = sadd.s32 4294967295, %s8222_s12   ;;  %p6717_p0 = scmp.ge.s32.totalorder %s8222_s12, 1  ;;  %s8222_s12 = sphi %s8244_s12, %s13_s12  }
   0x2   : > { %p163_p1 = scmp.lt.s32.totalorder %s8222_s12, 5 }
   0x4   : > { %p164_p2 = pnand %p6717_p0, %p163_p1 }
   0x6   : > { %167 = sbr.rel (%p164_p2) target bundleno = 743 (0x2e7), region = 32 }
   0xd   : > { %s6718_s14 = sshll.u32 %s6713_s13, 5  ;;  %vm485_vm0 = vcmask 64512   ;;  %vm3270_vm2 = vcmask 130048  }
   0xe   : > { %p202_p3 = scmp.lt.s32.totalorder %s6718_s14, 127  ;;  %vm8262_vm1 = vmpackc.low %vm485_vm0, %vm485_vm0 }
  0x10   : > { %s9413_s14 = smov (!%p202_p3, %s6718_s14), 127 }
  0x11   : > { %s8252_s15 = sshll.u32 %s9413_s14, 4 }
  0x12   : > { %s8258_s18 = scalar_lea.vmem %s9362_s1, %s8252_s15  ;;  %s8270_s21 = scalar_lea.vmem %s9361_s0, %s8252_s15 }
  0x13   : > { %v357_v1 = vld [vmem:[%s8258_s18] sm:$0xff]  ;;  %v358_v2 = vld [vmem:[%s8258_s18 + $0x8] sm:$0xff]  ;;  %v359_v3 = vld [vmem:[%s8258_s18 + $0x10] sm:$0xff]  ;;  %s8656_s24 = scalar_lea.vmem %s9363_s2, %s8252_s15  ;;  %s9154_s27 = scalar_lea.vmem %s9364_s3, %s8252_s15 }
  0x14   : > { %v7632_v4 = vpack.c.bf16 %v358_v2, %v357_v1  ;;  %v360_v5 = vld [vmem:[%s8258_s18 + $0x18] sm:$0xff]  ;;  %v229_v6 = vld [vmem:[%s8270_s21] sm:$0xff]  ;;  %v231_v7 = vld [vmem:[%s8270_s21 + $0x10] sm:$0xff] }
  0x15   : > { %v7638_v8 = vpack.c.bf16 %v360_v5, %v359_v3  ;;  %v293_v9 = vmul.f32 0.35355338, %v229_v6  ;;  %v295_v10 = vmul.f32 0.35355338, %v231_v7  ;;  %v361_v11 = vld [vmem:[%s8258_s18 + $0x20] sm:$0xff]  ;;  %v362_v12 = vld [vmem:[%s8258_s18 + $0x28] sm:$0xff] }
  0x16   : > { %7634 = vmatprep.subr.msk.bf16.mxu0 %vm8262_vm1, %v7632_v4  ;;  %v230_v13 = vld [vmem:[%s8270_s21 + $0x8] sm:$0xff]  ;;  %v7644_v14 = vpack.c.bf16 %v362_v12, %v361_v11  ;;  %v363_v15 = vld [vmem:[%s8258_s18 + $0x30] sm:$0xff]  ;;  %v364_v16 = vld [vmem:[%s8258_s18 + $0x38] sm:$0xff] }
  0x17   : > { %7640 = vmatprep.subr.msk.bf16.mxu1 %vm8262_vm1, %v7638_v8  ;;  %7637 = vmatpush3.bf16.xpose.msk.msra.mxu0 %vm8262_vm1, %v7632_v4  ;;  %v232_v17 = vld [vmem:[%s8270_s21 + $0x18] sm:$0xff]  ;;  %v7650_v18 = vpack.c.bf16 %v364_v16, %v363_v15  ;;  %v233_v19 = vld [vmem:[%s8270_s21 + $0x20] sm:$0xff]  ;;  %v294_v20 = vmul.f32 0.35355338, %v230_v13  ;;  %v235_v21 = vld [vmem:[%s8270_s21 + $0x30] sm:$0xff] }
  0x18   : > { %7643 = vmatpush3.bf16.xpose.msk.msra.mxu1 %vm8262_vm1, %v7638_v8  ;;  %7188 = vmatprep.mubr.msk.f32.mxu0 %vm485_vm0, %v293_v9  ;;  %v365_v22 = vld [vmem:[%s8258_s18 + $0x40] sm:$0xff]  ;;  %v366_v23 = vld [vmem:[%s8258_s18 + $0x48] sm:$0xff]  ;;  %v296_v24 = vmul.f32 0.35355338, %v232_v17  ;;  %v367_v25 = vld [vmem:[%s8258_s18 + $0x50] sm:$0xff] }
  0x19   : > { %7195 = vmatprep.mubr.msk.f32.mxu1 %vm485_vm0, %v295_v10  ;;  %7646 = vmatprep.subr.msk.bf16.mxu0 %vm8262_vm1, %v7644_v14  ;;  %v368_v26 = vld [vmem:[%s8258_s18 + $0x58] sm:$0xff]  ;;  %v297_v27 = vmul.f32 0.35355338, %v233_v19  ;;  %v299_v28 = vmul.f32 0.35355338, %v235_v21  ;;  %v7656_v29 = vpack.c.bf16 %v366_v23, %v365_v22  ;;  %v234_v31 = vld [vmem:[%s8270_s21 + $0x28] sm:$0xff] }
  0x1a   : > { %7652 = vmatprep.subr.msk.bf16.mxu1 %vm8262_vm1, %v7650_v18  ;;  %v7662_v30 = vpack.c.bf16 %v368_v26, %v367_v25  ;;  %v236_v32 = vld [vmem:[%s8270_s21 + $0x38] sm:$0xff]  ;;  %v237_v33 = vld [vmem:[%s8270_s21 + $0x40] sm:$0xff]  ;;  %v298_v34 = vmul.f32 0.35355338, %v234_v31  ;;  %v239_v35 = vld [vmem:[%s8270_s21 + $0x50] sm:$0xff] }
  0x1b   : > { %v369_v36 = vld [vmem:[%s8258_s18 + $0x60] sm:$0xff]  ;;  %v370_v37 = vld [vmem:[%s8258_s18 + $0x68] sm:$0xff]  ;;  %v300_v38 = vmul.f32 0.35355338, %v236_v32  ;;  %v371_v39 = vld [vmem:[%s8258_s18 + $0x70] sm:$0xff] }
  0x1c   : > { %v372_v40 = vld [vmem:[%s8258_s18 + $0x78] sm:$0xff]  ;;  %v301_v41 = vmul.f32 0.35355338, %v237_v33  ;;  %v303_v42 = vmul.f32 0.35355338, %v239_v35  ;;  %v7668_v43 = vpack.c.bf16 %v370_v37, %v369_v36  ;;  %v238_v45 = vld [vmem:[%s8270_s21 + $0x48] sm:$0xff] }
  0x1d   : > { %v7674_v44 = vpack.c.bf16 %v372_v40, %v371_v39  ;;  %v240_v46 = vld [vmem:[%s8270_s21 + $0x58] sm:$0xff]  ;;  %v241_v47 = vld [vmem:[%s8270_s21 + $0x60] sm:$0xff]  ;;  %v302_v48 = vmul.f32 0.35355338, %v238_v45  ;;  %v243_v49 = vld [vmem:[%s8270_s21 + $0x70] sm:$0xff] }
  0x1e   : > { %7189 = vmatmul.mubr.msk.f32.vlgmr.msra.gmra.mrb[0].mxu0 %vm485_vm0, %v294_v20  ;;  %v373_v50 = vld [vmem:[%s8258_s18 + $0x80] sm:$0xff]  ;;  %v374_v51 = vld [vmem:[%s8258_s18 + $0x88] sm:$0xff]  ;;  %v304_v52 = vmul.f32 0.35355338, %v240_v46  ;;  %v375_v53 = vld [vmem:[%s8258_s18 + $0x90] sm:$0xff] }
  0x1f   : > { %7196 = vmatmul.mubr.msk.f32.vlgmr.msra.gmra.mrb[0].mxu1 %vm485_vm0, %v296_v24  ;;  %7649 = vmatpush3.bf16.xpose.msk.msra.mxu0 %vm8262_vm1, %v7644_v14  ;;  %v376_v54 = vld [vmem:[%s8258_s18 + $0x98] sm:$0xff]  ;;  %v305_v55 = vmul.f32 0.35355338, %v241_v47  ;;  %v307_v56 = vmul.f32 0.35355338, %v243_v49  ;;  %v7680_v57 = vpack.c.bf16 %v374_v51, %v373_v50  ;;  %v242_v59 = vld [vmem:[%s8270_s21 + $0x68] sm:$0xff] }
  0x20   : > { %7655 = vmatpush3.bf16.xpose.msk.msra.mxu1 %vm8262_vm1, %v7650_v18  ;;  %7202 = vmatprep.mubr.msk.f32.mxu0 %vm485_vm0, %v297_v27  ;;  %v7686_v58 = vpack.c.bf16 %v376_v54, %v375_v53  ;;  %v244_v60 = vld [vmem:[%s8270_s21 + $0x78] sm:$0xff]  ;;  %v245_v61 = vld [vmem:[%s8270_s21 + $0x80] sm:$0xff]  ;;  %v306_v62 = vmul.f32 0.35355338, %v242_v59  ;;  %v247_v63 = vld [vmem:[%s8270_s21 + $0x90] sm:$0xff] }
  0x21   : > { %7209 = vmatprep.mubr.msk.f32.mxu1 %vm485_vm0, %v299_v28  ;;  %7658 = vmatprep.subr.msk.bf16.mxu0 %vm8262_vm1, %v7656_v29  ;;  %v377_v1 = vld [vmem:[%s8258_s18 + $0xa0] sm:$0xff]  ;;  %v378_v2 = vld [vmem:[%s8258_s18 + $0xa8] sm:$0xff]  ;;  %v308_v3 = vmul.f32 0.35355338, %v244_v60  ;;  %v379_v4 = vld [vmem:[%s8258_s18 + $0xb0] sm:$0xff] }
  0x22   : > { %7664 = vmatprep.subr.msk.bf16.mxu1 %vm8262_vm1, %v7662_v30  ;;  %v380_v5 = vld [vmem:[%s8258_s18 + $0xb8] sm:$0xff]  ;;  %v309_v6 = vmul.f32 0.35355338, %v245_v61  ;;  %v311_v7 = vmul.f32 0.35355338, %v247_v63  ;;  %v7692_v8 = vpack.c.bf16 %v378_v2, %v377_v1  ;;  %v246_v10 = vld [vmem:[%s8270_s21 + $0x88] sm:$0xff] }
  0x23   : > { %v7698_v9 = vpack.c.bf16 %v380_v5, %v379_v4  ;;  %v248_v11 = vld [vmem:[%s8270_s21 + $0x98] sm:$0xff]  ;;  %v249_v12 = vld [vmem:[%s8270_s21 + $0xa0] sm:$0xff]  ;;  %v310_v13 = vmul.f32 0.35355338, %v246_v10  ;;  %v251_v14 = vld [vmem:[%s8270_s21 + $0xb0] sm:$0xff] }
  0x24   : > { %v381_v15 = vld [vmem:[%s8258_s18 + $0xc0] sm:$0xff]  ;;  %v382_v16 = vld [vmem:[%s8258_s18 + $0xc8] sm:$0xff]  ;;  %v312_v17 = vmul.f32 0.35355338, %v248_v11  ;;  %v383_v18 = vld [vmem:[%s8258_s18 + $0xd0] sm:$0xff] }
  0x25   : > { %v384_v19 = vld [vmem:[%s8258_s18 + $0xd8] sm:$0xff]  ;;  %v313_v20 = vmul.f32 0.35355338, %v249_v12  ;;  %v315_v21 = vmul.f32 0.35355338, %v251_v14  ;;  %v7704_v22 = vpack.c.bf16 %v382_v16, %v381_v15  ;;  %v250_v24 = vld [vmem:[%s8270_s21 + $0xa8] sm:$0xff] }
  0x26   : > { %7203 = vmatmul.mubr.msk.f32.vlgmr.msra.gmra.mrb[2].mxu0 %vm485_vm0, %v298_v34  ;;  %v7710_v23 = vpack.c.bf16 %v384_v19, %v383_v18  ;;  %v252_v25 = vld [vmem:[%s8270_s21 + $0xb8] sm:$0xff]  ;;  %v253_v26 = vld [vmem:[%s8270_s21 + $0xc0] sm:$0xff]  ;;  %v314_v27 = vmul.f32 0.35355338, %v250_v24  ;;  %v255_v28 = vld [vmem:[%s8270_s21 + $0xd0] sm:$0xff] }
  0x27   : > { %7210 = vmatmul.mubr.msk.f32.vlgmr.msra.gmra.mrb[2].mxu1 %vm485_vm0, %v300_v38  ;;  %7661 = vmatpush3.bf16.xpose.msk.msra.mxu0 %vm8262_vm1, %v7656_v29  ;;  %v385_v29 = vld [vmem:[%s8258_s18 + $0xe0] sm:$0xff]  ;;  %v316_v31 = vmul.f32 0.35355338, %v252_v25  ;;  %v387_v32 = vld [vmem:[%s8258_s18 + $0xf0] sm:$0xff]  ;;  %v388_v33 = vld [vmem:[%s8258_s18 + $0xf8] sm:$0xff] }
  0x28   : > { %7667 = vmatpush3.bf16.xpose.msk.msra.mxu1 %vm8262_vm1, %v7662_v30  ;;  %7216 = vmatprep.mubr.msk.f32.mxu0 %vm485_vm0, %v301_v41  ;;  %v386_v30 = vld [vmem:[%s8258_s18 + $0xe8] sm:$0xff]  ;;  %v317_v34 = vmul.f32 0.35355338, %v253_v26  ;;  %v319_v35 = vmul.f32 0.35355338, %v255_v28  ;;  %v7722_v37 = vpack.c.bf16 %v388_v33, %v387_v32  ;;  %v256_v39 = vld [vmem:[%s8270_s21 + $0xd8] sm:$0xff] }
  0x29   : > { %7223 = vmatprep.mubr.msk.f32.mxu1 %vm485_vm0, %v303_v42  ;;  %7670 = vmatprep.subr.msk.bf16.mxu0 %vm8262_vm1, %v7668_v43  ;;  %v7716_v36 = vpack.c.bf16 %v386_v30, %v385_v29  ;;  %v254_v38 = vld [vmem:[%s8270_s21 + $0xc8] sm:$0xff]  ;;  %v257_v40 = vld [vmem:[%s8270_s21 + $0xe0] sm:$0xff]  ;;  %v259_v42 = vld [vmem:[%s8270_s21 + $0xf0] sm:$0xff]  ;;  %v320_v45 = vmul.f32 0.35355338, %v256_v39 }
  0x2a   : > { %7676 = vmatprep.subr.msk.bf16.mxu1 %vm8262_vm1, %v7674_v44  ;;  %v318_v41 = vmul.f32 0.35355338, %v254_v38  ;;  %v391_v46 = vld [vmem:[%s8258_s18 + $0x110] sm:$0xff]  ;;  %v392_v47 = vld [vmem:[%s8258_s18 + $0x118] sm:$0xff]  ;;  %v323_v49 = vmul.f32 0.35355338, %v259_v42 }
  0x2b   : > { %v7734_v51 = vpack.c.bf16 %v392_v47, %v391_v46  ;;  %v260_v53 = vld [vmem:[%s8270_s21 + $0xf8] sm:$0xff]  ;;  %v261_v54 = vld [vmem:[%s8270_s21 + $0x100] sm:$0xff]  ;;  %v395_v60 = vld [vmem:[%s8258_s18 + $0x130] sm:$0xff] }
  0x2c   : > { %v324_v59 = vmul.f32 0.35355338, %v260_v53  ;;  %v396_v61 = vld [vmem:[%s8258_s18 + $0x138] sm:$0xff]  ;;  %v265_v5 = vld [vmem:[%s8270_s21 + $0x120] sm:$0xff]  ;;  %v399_v11 = vld [vmem:[%s8258_s18 + $0x150] sm:$0xff] }
  0x2d   : > { %v7746_v2 = vpack.c.bf16 %v396_v61, %v395_v60  ;;  %v264_v4 = vld [vmem:[%s8270_s21 + $0x118] sm:$0xff]  ;;  %v269_v19 = vld [vmem:[%s8270_s21 + $0x140] sm:$0xff]  ;;  %v403_v25 = vld [vmem:[%s8258_s18 + $0x170] sm:$0xff] }
  0x2e   : > { %7217 = vmatmul.mubr.msk.f32.vlgmr.msra.gmra.mrb[4].mxu0 %vm485_vm0, %v302_v48  ;;  %v321_v48 = vmul.f32 0.35355338, %v257_v40  ;;  %v328_v10 = vmul.f32 0.35355338, %v264_v4  ;;  %v400_v12 = vld [vmem:[%s8258_s18 + $0x158] sm:$0xff]  ;;  %v273_v33 = vld [vmem:[%s8270_s21 + $0x160] sm:$0xff] }
  0x2f   : > { %7224 = vmatmul.mubr.msk.f32.vlgmr.msra.gmra.mrb[4].mxu1 %vm485_vm0, %v304_v52  ;;  %7673 = vmatpush3.bf16.xpose.msk.msra.mxu0 %vm8262_vm1, %v7668_v43  ;;  %v389_v43 = vld [vmem:[%s8258_s18 + $0x100] sm:$0xff]  ;;  %v258_v52 = vld [vmem:[%s8270_s21 + $0xe8] sm:$0xff]  ;;  %v7758_v16 = vpack.c.bf16 %v400_v12, %v399_v11  ;;  %v268_v18 = vld [vmem:[%s8270_s21 + $0x138] sm:$0xff] }
  0x30   : > { %7679 = vmatpush3.bf16.xpose.msk.msra.mxu1 %vm8262_vm1, %v7674_v44  ;;  %7230 = vmatprep.mubr.msk.f32.mxu0 %vm485_vm0, %v305_v55  ;;  %v390_v44 = vld [vmem:[%s8258_s18 + $0x108] sm:$0xff]  ;;  %v322_v55 = vmul.f32 0.35355338, %v258_v52  ;;  %v332_v24 = vmul.f32 0.35355338, %v268_v18  ;;  %v404_v26 = vld [vmem:[%s8258_s18 + $0x178] sm:$0xff] }
  0x31   : > { %7237 = vmatprep.mubr.msk.f32.mxu1 %vm485_vm0, %v307_v56  ;;  %7682 = vmatprep.subr.msk.bf16.mxu0 %vm8262_vm1, %v7680_v57  ;;  %v7728_v50 = vpack.c.bf16 %v390_v44, %v389_v43  ;;  %v263_v56 = vld [vmem:[%s8270_s21 + $0x110] sm:$0xff]  ;;  %v7770_v30 = vpack.c.bf16 %v404_v26, %v403_v25  ;;  %v272_v32 = vld [vmem:[%s8270_s21 + $0x158] sm:$0xff]  ;;  %v277_v47 = vld [vmem:[%s8270_s21 + $0x180] sm:$0xff] }
  0x32   : > { %7688 = vmatprep.subr.msk.bf16.mxu1 %vm8262_vm1, %v7686_v58  ;;  %v327_v63 = vmul.f32 0.35355338, %v263_v56  ;;  %v336_v38 = vmul.f32 0.35355338, %v272_v32  ;;  %v407_v39 = vld [vmem:[%s8258_s18 + $0x190] sm:$0xff]  ;;  %v408_v40 = vld [vmem:[%s8258_s18 + $0x198] sm:$0xff] }
  0x33   : > { %v7782_v44 = vpack.c.bf16 %v408_v40, %v407_v39  ;;  %v276_v46 = vld [vmem:[%s8270_s21 + $0x178] sm:$0xff]  ;;  %v411_v53 = vld [vmem:[%s8258_s18 + $0x1b0] sm:$0xff]  ;;  %v281_v61 = vld [vmem:[%s8270_s21 + $0x1a0] sm:$0xff] }
  0x34   : > { %v340_v52 = vmul.f32 0.35355338, %v276_v46  ;;  %v280_v60 = vld [vmem:[%s8270_s21 + $0x198] sm:$0xff]  ;;  %v415_v4 = vld [vmem:[%s8258_s18 + $0x1d0] sm:$0xff]  ;;  %v285_v12 = vld [vmem:[%s8270_s21 + $0x1c0] sm:$0xff] }
  0x35   : > { %v284_v11 = vld [vmem:[%s8270_s21 + $0x1b8] sm:$0xff]  ;;  %v419_v18 = vld [vmem:[%s8258_s18 + $0x1f0] sm:$0xff]  ;;  %v289_v26 = vld [vmem:[%s8270_s21 + $0x1e0] sm:$0xff] }
  0x36   : > { %7231 = vmatmul.mubr.msk.f32.vlgmr.msra.gmra.mrb[6].mxu0 %vm485_vm0, %v306_v62  ;;  %v325_v62 = vmul.f32 0.35355338, %v261_v54  ;;  %v412_v54 = vld [vmem:[%s8258_s18 + $0x1b8] sm:$0xff]  ;;  %v290_v32 = vld [vmem:[%s8270_s21 + $0x1e8] sm:$0xff] }
  0x37   : > { %7238 = vmatmul.mubr.msk.f32.vlgmr.msra.gmra.mrb[6].mxu1 %vm485_vm0, %v308_v3  ;;  %7685 = vmatpush3.bf16.xpose.msk.msra.mxu0 %vm8262_vm1, %v7680_v57  ;;  %v393_v57 = vld [vmem:[%s8258_s18 + $0x120] sm:$0xff]  ;;  %v262_v3 = vld [vmem:[%s8270_s21 + $0x108] sm:$0xff]  ;;  %v288_v25 = vld [vmem:[%s8270_s21 + $0x1d8] sm:$0xff] }
  0x38   : > { %7691 = vmatpush3.bf16.xpose.msk.msra.mxu1 %vm8262_vm1, %v7686_v58  ;;  %7244 = vmatprep.mubr.msk.f32.mxu0 %vm485_vm0, %v309_v6  ;;  %v394_v58 = vld [vmem:[%s8258_s18 + $0x128] sm:$0xff]  ;;  %v326_v6 = vmul.f32 0.35355338, %v262_v3  ;;  %v344_v3 = vmul.f32 0.35355338, %v280_v60 }
  0x39   : > { %7251 = vmatprep.mubr.msk.f32.mxu1 %vm485_vm0, %v311_v7  ;;  %7694 = vmatprep.subr.msk.bf16.mxu0 %vm8262_vm1, %v7692_v8  ;;  %v7740_v1 = vpack.c.bf16 %v394_v58, %v393_v57  ;;  %v267_v7 = vld [vmem:[%s8270_s21 + $0x130] sm:$0xff]  ;;  %v7794_v58 = vpack.c.bf16 %v412_v54, %v411_v53 }
  0x3a   : > { %7700 = vmatprep.subr.msk.bf16.mxu1 %vm8262_vm1, %v7698_v9  ;;  %v331_v14 = vmul.f32 0.35355338, %v267_v7 }
  0x3e   : > { %7245 = vmatmul.mubr.msk.f32.vlgmr.msra.gmra.mrb[8].mxu0 %vm485_vm0, %v310_v13  ;;  %v329_v13 = vmul.f32 0.35355338, %v265_v5  ;;  %v416_v5 = vld [vmem:[%s8258_s18 + $0x1d8] sm:$0xff] }
  0x3f   : > { %7252 = vmatmul.mubr.msk.f32.vlgmr.msra.gmra.mrb[8].mxu1 %vm485_vm0, %v312_v17  ;;  %7697 = vmatpush3.bf16.xpose.msk.msra.mxu0 %vm8262_vm1, %v7692_v8  ;;  %v397_v8 = vld [vmem:[%s8258_s18 + $0x140] sm:$0xff]  ;;  %v266_v17 = vld [vmem:[%s8270_s21 + $0x128] sm:$0xff] }
  0x40   : > { %7703 = vmatpush3.bf16.xpose.msk.msra.mxu1 %vm8262_vm1, %v7698_v9  ;;  %7258 = vmatprep.mubr.msk.f32.mxu0 %vm485_vm0, %v313_v20  ;;  %v398_v9 = vld [vmem:[%s8258_s18 + $0x148] sm:$0xff]  ;;  %v330_v20 = vmul.f32 0.35355338, %v266_v17  ;;  %v348_v17 = vmul.f32 0.35355338, %v284_v11 }
  0x41   : > { %7265 = vmatprep.mubr.msk.f32.mxu1 %vm485_vm0, %v315_v21  ;;  %7706 = vmatprep.subr.msk.bf16.mxu0 %vm8262_vm1, %v7704_v22  ;;  %v7752_v15 = vpack.c.bf16 %v398_v9, %v397_v8  ;;  %v271_v21 = vld [vmem:[%s8270_s21 + $0x150] sm:$0xff]  ;;  %v7806_v9 = vpack.c.bf16 %v416_v5, %v415_v4 }
  0x42   : > { %7712 = vmatprep.subr.msk.bf16.mxu1 %vm8262_vm1, %v7710_v23  ;;  %v335_v28 = vmul.f32 0.35355338, %v271_v21 }
  0x46   : > { %7259 = vmatmul.mubr.msk.f32.vlgmr.msra.gmra.mrb[10].mxu0 %vm485_vm0, %v314_v27  ;;  %v333_v27 = vmul.f32 0.35355338, %v269_v19  ;;  %v420_v19 = vld [vmem:[%s8258_s18 + $0x1f8] sm:$0xff] }
  0x47   : > { %7266 = vmatmul.mubr.msk.f32.vlgmr.msra.gmra.mrb[10].mxu1 %vm485_vm0, %v316_v31  ;;  %7709 = vmatpush3.bf16.xpose.msk.msra.mxu0 %vm8262_vm1, %v7704_v22  ;;  %v401_v22 = vld [vmem:[%s8258_s18 + $0x160] sm:$0xff]  ;;  %v270_v31 = vld [vmem:[%s8270_s21 + $0x148] sm:$0xff] }
  0x48   : > { %7715 = vmatpush3.bf16.xpose.msk.msra.mxu1 %vm8262_vm1, %v7710_v23  ;;  %7272 = vmatprep.mubr.msk.f32.mxu0 %vm485_vm0, %v317_v34  ;;  %v402_v23 = vld [vmem:[%s8258_s18 + $0x168] sm:$0xff]  ;;  %v334_v34 = vmul.f32 0.35355338, %v270_v31 }
  0x49   : > { %7279 = vmatprep.mubr.msk.f32.mxu1 %vm485_vm0, %v319_v35  ;;  %7718 = vmatprep.subr.msk.bf16.mxu0 %vm8262_vm1, %v7716_v36  ;;  %v7764_v29 = vpack.c.bf16 %v402_v23, %v401_v22  ;;  %v275_v35 = vld [vmem:[%s8270_s21 + $0x170] sm:$0xff]  ;;  %v7818_v23 = vpack.c.bf16 %v420_v19, %v419_v18  ;;  %v428_v19 = vld [vmem:[%s8656_s24 + $0x38] sm:$0xff] }
  0x4a   : > { %7724 = vmatprep.subr.msk.bf16.mxu1 %vm8262_vm1, %v7722_v37  ;;  %v339_v42 = vmul.f32 0.35355338, %v275_v35  ;;  %v427_v18 = vld [vmem:[%s8656_s24 + $0x30] sm:$0xff] }
  0x4e   : > { %7273 = vmatmul.mubr.msk.f32.vlgmr.msra.gmra.mrb[12].mxu0 %vm485_vm0, %v318_v41  ;;  %v337_v41 = vmul.f32 0.35355338, %v273_v33  ;;  %v292_v33 = vld [vmem:[%s8270_s21 + $0x1f8] sm:$0xff] }
  0x4f   : > { %7280 = vmatmul.mubr.msk.f32.vlgmr.msra.gmra.mrb[12].mxu1 %vm485_vm0, %v320_v45  ;;  %7721 = vmatpush3.bf16.xpose.msk.msra.mxu0 %vm8262_vm1, %v7716_v36  ;;  %v405_v36 = vld [vmem:[%s8258_s18 + $0x180] sm:$0xff]  ;;  %v274_v45 = vld [vmem:[%s8270_s21 + $0x168] sm:$0xff]  ;;  %v356_v35 = vmul.f32 0.35355338, %v292_v33 }
  0x50   : > { %7727 = vmatpush3.bf16.xpose.msk.msra.mxu1 %vm8262_vm1, %v7722_v37  ;;  %7286 = vmatprep.mubr.msk.f32.mxu0 %vm485_vm0, %v321_v48  ;;  %v406_v37 = vld [vmem:[%s8258_s18 + $0x188] sm:$0xff]  ;;  %v338_v48 = vmul.f32 0.35355338, %v274_v45 }
  0x51   : > { %7293 = vmatprep.mubr.msk.f32.mxu1 %vm485_vm0, %v323_v49  ;;  %7730 = vmatprep.subr.msk.bf16.mxu0 %vm8262_vm1, %v7728_v50  ;;  %v7776_v43 = vpack.c.bf16 %v406_v37, %v405_v36  ;;  %v279_v49 = vld [vmem:[%s8270_s21 + $0x190] sm:$0xff] }
  0x52   : > { %7736 = vmatprep.subr.msk.bf16.mxu1 %vm8262_vm1, %v7734_v51  ;;  %v343_v56 = vmul.f32 0.35355338, %v279_v49 }
  0x56   : > { %7287 = vmatmul.mubr.msk.f32.vlgmr.msra.gmra.mrb[14].mxu0 %vm485_vm0, %v322_v55  ;;  %v341_v55 = vmul.f32 0.35355338, %v277_v47 }
  0x57   : > { %7294 = vmatmul.mubr.msk.f32.vlgmr.msra.gmra.mrb[14].mxu1 %vm485_vm0, %v324_v59  ;;  %7733 = vmatpush3.bf16.xpose.msk.msra.mxu0 %vm8262_vm1, %v7728_v50  ;;  %v409_v50 = vld [vmem:[%s8258_s18 + $0x1a0] sm:$0xff]  ;;  %v278_v59 = vld [vmem:[%s8270_s21 + $0x188] sm:$0xff] }
  0x58   : > { %7739 = vmatpush3.bf16.xpose.msk.msra.mxu1 %vm8262_vm1, %v7734_v51  ;;  %7300 = vmatprep.mubr.msk.f32.mxu0 %vm485_vm0, %v325_v62  ;;  %v410_v51 = vld [vmem:[%s8258_s18 + $0x1a8] sm:$0xff]  ;;  %v342_v62 = vmul.f32 0.35355338, %v278_v59 }
  0x59   : > { %7307 = vmatprep.mubr.msk.f32.mxu1 %vm485_vm0, %v327_v63  ;;  %7742 = vmatprep.subr.msk.bf16.mxu0 %vm8262_vm1, %v7740_v1  ;;  %v7788_v57 = vpack.c.bf16 %v410_v51, %v409_v50  ;;  %v283_v63 = vld [vmem:[%s8270_s21 + $0x1b0] sm:$0xff] }
  0x5a   : > { %7748 = vmatprep.subr.msk.bf16.mxu1 %vm8262_vm1, %v7746_v2  ;;  %v347_v7 = vmul.f32 0.35355338, %v283_v63 }
  0x5e   : > { %7301 = vmatmul.mubr.msk.f32.vlgmr.msra.gmra.mrb[16].mxu0 %vm485_vm0, %v326_v6  ;;  %v345_v6 = vmul.f32 0.35355338, %v281_v61 }
  0x5f   : > { %7308 = vmatmul.mubr.msk.f32.vlgmr.msra.gmra.mrb[16].mxu1 %vm485_vm0, %v328_v10  ;;  %7745 = vmatpush3.bf16.xpose.msk.msra.mxu0 %vm8262_vm1, %v7740_v1  ;;  %v413_v1 = vld [vmem:[%s8258_s18 + $0x1c0] sm:$0xff]  ;;  %v282_v10 = vld [vmem:[%s8270_s21 + $0x1a8] sm:$0xff] }
  0x60   : > { %7751 = vmatpush3.bf16.xpose.msk.msra.mxu1 %vm8262_vm1, %v7746_v2  ;;  %7314 = vmatprep.mubr.msk.f32.mxu0 %vm485_vm0, %v329_v13  ;;  %v414_v2 = vld [vmem:[%s8258_s18 + $0x1c8] sm:$0xff]  ;;  %v346_v13 = vmul.f32 0.35355338, %v282_v10 }
  0x61   : > { %7321 = vmatprep.mubr.msk.f32.mxu1 %vm485_vm0, %v331_v14  ;;  %7754 = vmatprep.subr.msk.bf16.mxu0 %vm8262_vm1, %v7752_v15  ;;  %v7800_v8 = vpack.c.bf16 %v414_v2, %v413_v1  ;;  %v287_v14 = vld [vmem:[%s8270_s21 + $0x1d0] sm:$0xff]  ;;  %v421_v2 = vld [vmem:[%s8656_s24] sm:$0xff] }
  0x62   : > { %7760 = vmatprep.subr.msk.bf16.mxu1 %vm8262_vm1, %v7758_v16  ;;  %v351_v21 = vmul.f32 0.35355338, %v287_v14 }
  0x66   : > { %7315 = vmatmul.mubr.msk.f32.vlgmr.msra.gmra.mrb[18].mxu0 %vm485_vm0, %v330_v20  ;;  %v349_v20 = vmul.f32 0.35355338, %v285_v12 }
  0x67   : > { %7322 = vmatmul.mubr.msk.f32.vlgmr.msra.gmra.mrb[18].mxu1 %vm485_vm0, %v332_v24  ;;  %7757 = vmatpush3.bf16.xpose.msk.msra.mxu0 %vm8262_vm1, %v7752_v15  ;;  %v417_v15 = vld [vmem:[%s8258_s18 + $0x1e0] sm:$0xff]  ;;  %v286_v24 = vld [vmem:[%s8270_s21 + $0x1c8] sm:$0xff] }
  0x68   : > { %7763 = vmatpush3.bf16.xpose.msk.msra.mxu1 %vm8262_vm1, %v7758_v16  ;;  %7328 = vmatprep.mubr.msk.f32.mxu0 %vm485_vm0, %v333_v27  ;;  %v418_v16 = vld [vmem:[%s8258_s18 + $0x1e8] sm:$0xff]  ;;  %v350_v27 = vmul.f32 0.35355338, %v286_v24 }
  0x69   : > { %7335 = vmatprep.mubr.msk.f32.mxu1 %vm485_vm0, %v335_v28  ;;  %7766 = vmatprep.subr.msk.bf16.mxu0 %vm8262_vm1, %v7764_v29  ;;  %v7812_v22 = vpack.c.bf16 %v418_v16, %v417_v15  ;;  %v291_v28 = vld [vmem:[%s8270_s21 + $0x1f0] sm:$0xff] }
  0x6a   : > { %7772 = vmatprep.subr.msk.bf16.mxu1 %vm8262_vm1, %v7770_v30  ;;  %v355_v31 = vmul.f32 0.35355338, %v291_v28 }
  0x6e   : > { %7329 = vmatmul.mubr.msk.f32.vlgmr.msra.gmra.mrb[20].mxu0 %vm485_vm0, %v334_v34  ;;  %v354_v34 = vmul.f32 0.35355338, %v290_v32 }
  0x6f   : > { %7336 = vmatmul.mubr.msk.f32.vlgmr.msra.gmra.mrb[20].mxu1 %vm485_vm0, %v336_v38  ;;  %7769 = vmatpush3.bf16.xpose.msk.msra.mxu0 %vm8262_vm1, %v7764_v29  ;;  %v352_v29 = vmul.f32 0.35355338, %v288_v25 }
  0x70   : > { %7775 = vmatpush3.bf16.xpose.msk.msra.mxu1 %vm8262_vm1, %v7770_v30  ;;  %7342 = vmatprep.mubr.msk.f32.mxu0 %vm485_vm0, %v337_v41  ;;  %v353_v30 = vmul.f32 0.35355338, %v289_v26 }
  0x71   : > { %7349 = vmatprep.mubr.msk.f32.mxu1 %vm485_vm0, %v339_v42  ;;  %7778 = vmatprep.subr.msk.bf16.mxu0 %vm8262_vm1, %v7776_v43 }
  0x72   : > { %7784 = vmatprep.subr.msk.bf16.mxu1 %vm8262_vm1, %v7782_v44 }
  0x76   : > { %7343 = vmatmul.mubr.msk.f32.vlgmr.msra.gmra.mrb[22].mxu0 %vm485_vm0, %v338_v48 }
  0x77   : > { %7350 = vmatmul.mubr.msk.f32.vlgmr.msra.gmra.mrb[22].mxu1 %vm485_vm0, %v340_v52  ;;  %7781 = vmatpush3.bf16.xpose.msk.msra.mxu0 %vm8262_vm1, %v7776_v43 }
  0x78   : > { %7787 = vmatpush3.bf16.xpose.msk.msra.mxu1 %vm8262_vm1, %v7782_v44  ;;  %7356 = vmatprep.mubr.msk.f32.mxu0 %vm485_vm0, %v341_v55 }
  0x79   : > { %7363 = vmatprep.mubr.msk.f32.mxu1 %vm485_vm0, %v343_v56  ;;  %7790 = vmatprep.subr.msk.bf16.mxu0 %vm8262_vm1, %v7788_v57 }
  0x7a   : > { %7796 = vmatprep.subr.msk.bf16.mxu1 %vm8262_vm1, %v7794_v58 }
  0x7e   : > { %7357 = vmatmul.mubr.msk.f32.vlgmr.msra.gmra.mrb[24].mxu0 %vm485_vm0, %v342_v62 }
  0x7f   : > { %7364 = vmatmul.mubr.msk.f32.vlgmr.msra.gmra.mrb[24].mxu1 %vm485_vm0, %v344_v3  ;;  %7793 = vmatpush3.bf16.xpose.msk.msra.mxu0 %vm8262_vm1, %v7788_v57  ;;  %v422_v3 = vld [vmem:[%s8656_s24 + $0x8] sm:$0xff] }
  0x80   : > { %7799 = vmatpush3.bf16.xpose.msk.msra.mxu1 %vm8262_vm1, %v7794_v58  ;;  %7370 = vmatprep.mubr.msk.f32.mxu0 %vm485_vm0, %v345_v6  ;;  %v7824_v4 = vpack.c.bf16 %v422_v3, %v421_v2 }
  0x81   : > { %7377 = vmatprep.mubr.msk.f32.mxu1 %vm485_vm0, %v347_v7  ;;  %7802 = vmatprep.subr.msk.bf16.mxu0 %vm8262_vm1, %v7800_v8  ;;  %v423_v7 = vld [vmem:[%s8656_s24 + $0x10] sm:$0xff] }
  0x82   : > { %7808 = vmatprep.subr.msk.bf16.mxu1 %vm8262_vm1, %v7806_v9 }
  0x86   : > { %7371 = vmatmul.mubr.msk.f32.vlgmr.msra.gmra.mrb[26].mxu0 %vm485_vm0, %v346_v13 }
  0x87   : > { %7378 = vmatmul.mubr.msk.f32.vlgmr.msra.gmra.mrb[26].mxu1 %vm485_vm0, %v348_v17  ;;  %7805 = vmatpush3.bf16.xpose.msk.msra.mxu0 %vm8262_vm1, %v7800_v8  ;;  %v424_v8 = vld [vmem:[%s8656_s24 + $0x18] sm:$0xff] }
  0x88   : > { %7811 = vmatpush3.bf16.xpose.msk.msra.mxu1 %vm8262_vm1, %v7806_v9  ;;  %7384 = vmatprep.mubr.msk.f32.mxu0 %vm485_vm0, %v349_v20  ;;  %v7828_v10 = vpack.c.bf16 %v424_v8, %v423_v7  ;;  %v8684_v20 = vpack.c.bf16 %v428_v19, %v427_v18 }
  0x89   : > { %7391 = vmatprep.mubr.msk.f32.mxu1 %vm485_vm0, %v351_v21  ;;  %7814 = vmatprep.subr.msk.bf16.mxu0 %vm8262_vm1, %v7812_v22  ;;  %v425_v21 = vld [vmem:[%s8656_s24 + $0x20] sm:$0xff] }
  0x8a   : > { %7820 = vmatprep.subr.msk.bf16.mxu1 %vm8262_vm1, %v7818_v23 }
  0x8e   : > { %7385 = vmatmul.mubr.msk.f32.vlgmr.msra.gmra.mrb[28].mxu0 %vm485_vm0, %v350_v27 }
  0x8f   : > { %7392 = vmatmul.mubr.msk.f32.vlgmr.msra.gmra.mrb[28].mxu1 %vm485_vm0, %v352_v29  ;;  %7817 = vmatpush3.bf16.xpose.msk.msra.mxu0 %vm8262_vm1, %v7812_v22  ;;  %v426_v22 = vld [vmem:[%s8656_s24 + $0x28] sm:$0xff] }
  0x90   : > { %7823 = vmatpush3.bf16.xpose.msk.msra.mxu1 %vm8262_vm1, %v7818_v23  ;;  %7398 = vmatprep.mubr.msk.f32.mxu0 %vm485_vm0, %v353_v30  ;;  %v8690_v24 = vpack.c.bf16 %v426_v22, %v425_v21 }
  0x91   : > { %7405 = vmatprep.mubr.msk.f32.mxu1 %vm485_vm0, %v355_v31  ;;  %7825 = vmatprep.subr.bf16.mxu0 %v7824_v4 }
  0x92   : > { %7829 = vmatprep.subr.bf16.mxu1 %v7828_v10 }
  0x96   : > { %7399 = vmatmul.mubr.msk.f32.vlgmr.msra.gmra.mrb[30].mxu0 %vm485_vm0, %v354_v34 }
  0x97   : > { %7406 = vmatmul.mubr.msk.f32.vlgmr.msra.gmra.mrb[30].mxu1 %vm485_vm0, %v356_v35  ;;  %7827 = vmatpush3.bf16.msra.mxu0 %v7824_v4 }
  0x98   : > { %7831 = vmatpush3.bf16.msra.mxu1 %v7828_v10  ;;  %7833 = vmatprep.subr.bf16.mxu0 %v8690_v24 }
  0x99   : > { %7837 = vmatprep.subr.bf16.mxu1 %v8684_v20 }
  0xf1   : > { %v8592_v36 = vpop.f32.mrb[0].mxu0 }
  0xf2   : > { %v8594_v37 = vpop.f32.mrb[0].mxu1  ;;  %v8596_v38 = vpop.f32.mrb[1].mxu0  ;;  %v3274_v0 = vsel %vm3270_vm2, %v8592_v36, -inf }
  0xf3   : > { %v8600_v39 = vpop.f32.mrb[1].mxu1  ;;  %3275 = vmax.xlane.f32.xlu1 %v3274_v0  ;;  %v3271_v40 = vsel %vm3270_vm2, %v8596_v38, -inf  ;;  %v3280_v41 = vsel %vm3270_vm2, %v8594_v37, -inf }
  0xf4   : > { %3272 = vmax.xlane.f32.xlu0 %v3271_v40  ;;  %v3277_v42 = vsel %vm3270_vm2, %v8600_v39, -inf }
  0xf7   : > { %3281 = vmax.xlane.f32.xlu1 %v3280_v41 }
  0xf8   : > { %3278 = vmax.xlane.f32.xlu0 %v3277_v42 }
  0xf9   : > { %v8608_v43 = vpop.f32.mrb[2].mxu0 }
  0xfa   : > { %v8610_v44 = vpop.f32.mrb[2].mxu1  ;;  %v8612_v45 = vpop.f32.mrb[3].mxu0  ;;  %v3286_v46 = vsel %vm3270_vm2, %v8608_v43, -inf }
  0xfb   : > { %v8616_v47 = vpop.f32.mrb[3].mxu1  ;;  %v3292_v48 = vsel %vm3270_vm2, %v8610_v44, -inf  ;;  %v3283_v50 = vsel %vm3270_vm2, %v8612_v45, -inf }
  0xfc   : > { %3293 = vmax.xlane.f32.xlu1 %v3292_v48  ;;  %3287 = vmax.xlane.f32.xlu0 %v3286_v46  ;;  %v3289_v49 = vsel %vm3270_vm2, %v8616_v47, -inf }
 0x100   : > { %3290 = vmax.xlane.f32.xlu1 %v3289_v49  ;;  %3284 = vmax.xlane.f32.xlu0 %v3283_v50 }
 0x101   : > { %v8624_v51 = vpop.f32.mrb[4].mxu0 }
 0x102   : > { %v8626_v52 = vpop.f32.mrb[4].mxu1  ;;  %v8628_v53 = vpop.f32.mrb[5].mxu0  ;;  %v3298_v54 = vsel %vm3270_vm2, %v8624_v51, -inf }
 0x103   : > { %v8632_v55 = vpop.f32.mrb[5].mxu1  ;;  %v3304_v56 = vsel %vm3270_vm2, %v8626_v52, -inf  ;;  %v3295_v58 = vsel %vm3270_vm2, %v8628_v53, -inf }
 0x104   : > { %3305 = vmax.xlane.f32.xlu1 %v3304_v56  ;;  %3299 = vmax.xlane.f32.xlu0 %v3298_v54  ;;  %v3301_v57 = vsel %vm3270_vm2, %v8632_v55, -inf }
 0x108   : > { %3302 = vmax.xlane.f32.xlu1 %v3301_v57  ;;  %3296 = vmax.xlane.f32.xlu0 %v3295_v58 }
 0x109   : > { %v8640_v59 = vpop.f32.mrb[6].mxu0 }
 0x10a   : > { %v8642_v60 = vpop.f32.mrb[6].mxu1  ;;  %v8644_v61 = vpop.f32.mrb[7].mxu0  ;;  %v3310_v62 = vsel %vm3270_vm2, %v8640_v59, -inf }
 0x10b   : > { %v8648_v63 = vpop.f32.mrb[7].mxu1  ;;  %v3316_v1 = vsel %vm3270_vm2, %v8642_v60, -inf  ;;  %v3307_v6 = vsel %vm3270_vm2, %v8644_v61, -inf }
 0x10c   : > { %3317 = vmax.xlane.f32.xlu1 %v3316_v1  ;;  %3311 = vmax.xlane.f32.xlu0 %v3310_v62  ;;  %v3313_v5 = vsel %vm3270_vm2, %v8648_v63, -inf }
 0x110   : > { %3314 = vmax.xlane.f32.xlu1 %v3313_v5  ;;  %3308 = vmax.xlane.f32.xlu0 %v3307_v6 }
 0x111   : > { %v8666_v9 = vpop.f32.mrb[8].mxu0 }
 0x112   : > { %v8668_v11 = vpop.f32.mrb[8].mxu1  ;;  %v8670_v12 = vpop.f32.mrb[9].mxu0  ;;  %v3322_v13 = vsel %vm3270_vm2, %v8666_v9, -inf }
 0x113   : > { %v8674_v14 = vpop.f32.mrb[9].mxu1  ;;  %v3328_v15 = vsel %vm3270_vm2, %v8668_v11, -inf  ;;  %v3319_v17 = vsel %vm3270_vm2, %v8670_v12, -inf }
 0x114   : > { %3329 = vmax.xlane.f32.xlu1 %v3328_v15  ;;  %3323 = vmax.xlane.f32.xlu0 %v3322_v13  ;;  %v3325_v16 = vsel %vm3270_vm2, %v8674_v14, -inf }
 0x118   : > { %3326 = vmax.xlane.f32.xlu1 %v3325_v16  ;;  %3320 = vmax.xlane.f32.xlu0 %v3319_v17 }
 0x119   : > { %v8688_v23 = vpop.f32.mrb[10].mxu0 }
 0x11a   : > { %v8692_v25 = vpop.f32.mrb[10].mxu1  ;;  %v8694_v26 = vpop.f32.mrb[11].mxu0  ;;  %v3334_v27 = vsel %vm3270_vm2, %v8688_v23, -inf }
 0x11b   : > { %v8699_v28 = vpop.f32.mrb[11].mxu1  ;;  %v3340_v29 = vsel %vm3270_vm2, %v8692_v25, -inf  ;;  %v3331_v31 = vsel %vm3270_vm2, %v8694_v26, -inf }
 0x11c   : > { %3341 = vmax.xlane.f32.xlu1 %v3340_v29  ;;  %3335 = vmax.xlane.f32.xlu0 %v3334_v27  ;;  %v3337_v30 = vsel %vm3270_vm2, %v8699_v28, -inf }
 0x120   : > { %3338 = vmax.xlane.f32.xlu1 %v3337_v30  ;;  %3332 = vmax.xlane.f32.xlu0 %v3331_v31 }
 0x121   : > { %v8708_v32 = vpop.f32.mrb[12].mxu0 }
 0x122   : > { %v8710_v33 = vpop.f32.mrb[12].mxu1  ;;  %v8712_v34 = vpop.f32.mrb[13].mxu0  ;;  %v3346_v35 = vsel %vm3270_vm2, %v8708_v32, -inf }
 0x123   : > { %v8716_v0 = vpop.f32.mrb[13].mxu1  ;;  %v3352_v40 = vsel %vm3270_vm2, %v8710_v33, -inf  ;;  %v3343_v42 = vsel %vm3270_vm2, %v8712_v34, -inf }
 0x124   : > { %3353 = vmax.xlane.f32.xlu1 %v3352_v40  ;;  %3347 = vmax.xlane.f32.xlu0 %v3346_v35  ;;  %v3349_v41 = vsel %vm3270_vm2, %v8716_v0, -inf }
 0x128   : > { %3350 = vmax.xlane.f32.xlu1 %v3349_v41  ;;  %3344 = vmax.xlane.f32.xlu0 %v3343_v42 }
 0x129   : > { %v8724_v46 = vpop.f32.mrb[14].mxu0 }
 0x12a   : > { %v8726_v48 = vpop.f32.mrb[14].mxu1  ;;  %v8728_v49 = vpop.f32.mrb[15].mxu0  ;;  %v3358_v50 = vsel %vm3270_vm2, %v8724_v46, -inf }
 0x12b   : > { %v8732_v54 = vpop.f32.mrb[15].mxu1  ;;  %v3364_v56 = vsel %vm3270_vm2, %v8726_v48, -inf  ;;  %v3355_v58 = vsel %vm3270_vm2, %v8728_v49, -inf }
 0x12c   : > { %3365 = vmax.xlane.f32.xlu1 %v3364_v56  ;;  %3359 = vmax.xlane.f32.xlu0 %v3358_v50  ;;  %v3361_v57 = vsel %vm3270_vm2, %v8732_v54, -inf }
 0x130   : > { %3362 = vmax.xlane.f32.xlu1 %v3361_v57  ;;  %3356 = vmax.xlane.f32.xlu0 %v3355_v58 }
 0x131   : > { %v8740_v62 = vpop.f32.mrb[16].mxu0 }
 0x132   : > { %v8742_v1 = vpop.f32.mrb[16].mxu1  ;;  %v8744_v2 = vpop.f32.mrb[17].mxu0  ;;  %v3370_v3 = vsel %vm3270_vm2, %v8740_v62, -inf }
 0x133   : > { %v8748_v4 = vpop.f32.mrb[17].mxu1  ;;  %v3376_v5 = vsel %vm3270_vm2, %v8742_v1, -inf  ;;  %v3367_v7 = vsel %vm3270_vm2, %v8744_v2, -inf }
 0x134   : > { %3377 = vmax.xlane.f32.xlu1 %v3376_v5  ;;  %3371 = vmax.xlane.f32.xlu0 %v3370_v3  ;;  %v3373_v6 = vsel %vm3270_vm2, %v8748_v4, -inf }
 0x138   : > { %3374 = vmax.xlane.f32.xlu1 %v3373_v6  ;;  %3368 = vmax.xlane.f32.xlu0 %v3367_v7 }
 0x139   : > { %v8756_v8 = vpop.f32.mrb[18].mxu0 }
 0x13a   : > { %v8758_v10 = vpop.f32.mrb[18].mxu1  ;;  %v8760_v13 = vpop.f32.mrb[19].mxu0  ;;  %v3382_v15 = vsel %vm3270_vm2, %v8756_v8, -inf }
 0x13b   : > { %v8764_v16 = vpop.f32.mrb[19].mxu1  ;;  %v3388_v17 = vsel %vm3270_vm2, %v8758_v10, -inf  ;;  %v3379_v19 = vsel %vm3270_vm2, %v8760_v13, -inf }
 0x13c   : > { %3389 = vmax.xlane.f32.xlu1 %v3388_v17  ;;  %3383 = vmax.xlane.f32.xlu0 %v3382_v15  ;;  %v3385_v18 = vsel %vm3270_vm2, %v8764_v16, -inf }
 0x140   : > { %3386 = vmax.xlane.f32.xlu1 %v3385_v18  ;;  %3380 = vmax.xlane.f32.xlu0 %v3379_v19 }
 0x141   : > { %v8772_v21 = vpop.f32.mrb[20].mxu0 }
 0x142   : > { %v8774_v22 = vpop.f32.mrb[20].mxu1  ;;  %v8776_v27 = vpop.f32.mrb[21].mxu0  ;;  %v3394_v29 = vsel %vm3270_vm2, %v8772_v21, -inf }
 0x143   : > { %v8780_v30 = vpop.f32.mrb[21].mxu1  ;;  %v3400_v31 = vsel %vm3270_vm2, %v8774_v22, -inf  ;;  %v3391_v40 = vsel %vm3270_vm2, %v8776_v27, -inf }
 0x144   : > { %3401 = vmax.xlane.f32.xlu1 %v3400_v31  ;;  %3395 = vmax.xlane.f32.xlu0 %v3394_v29  ;;  %v3397_v35 = vsel %vm3270_vm2, %v8780_v30, -inf }
 0x148   : > { %3398 = vmax.xlane.f32.xlu1 %v3397_v35  ;;  %3392 = vmax.xlane.f32.xlu0 %v3391_v40 }
 0x149   : > { %v8788_v41 = vpop.f32.mrb[22].mxu0 }
 0x14a   : > { %v8790_v42 = vpop.f32.mrb[22].mxu1  ;;  %v8792_v50 = vpop.f32.mrb[23].mxu0  ;;  %v3406_v56 = vsel %vm3270_vm2, %v8788_v41, -inf }
 0x14b   : > { %v8796_v57 = vpop.f32.mrb[23].mxu1  ;;  %v3412_v58 = vsel %vm3270_vm2, %v8790_v42, -inf  ;;  %v3403_v5 = vsel %vm3270_vm2, %v8792_v50, -inf }
 0x14c   : > { %3413 = vmax.xlane.f32.xlu1 %v3412_v58  ;;  %3407 = vmax.xlane.f32.xlu0 %v3406_v56  ;;  %v3409_v3 = vsel %vm3270_vm2, %v8796_v57, -inf }
 0x150   : > { %3410 = vmax.xlane.f32.xlu1 %v3409_v3  ;;  %3404 = vmax.xlane.f32.xlu0 %v3403_v5 }
 0x151   : > { %v8804_v6 = vpop.f32.mrb[24].mxu0 }
 0x152   : > { %9382 = vst [vmem:[#allocation2_spill] sm:$0xff] %v8804_v6  ;;  %v8806_v7 = vpop.f32.mrb[24].mxu1  ;;  %v8808_v15 = vpop.f32.mrb[25].mxu0  ;;  %v3418_v17 = vsel %vm3270_vm2, %v8804_v6, -inf }
 0x153   : > { %9383 = vst [vmem:[#allocation3_spill] sm:$0xff] %v8806_v7  ;;  %9384 = vst [vmem:[#allocation4_spill] sm:$0xff] %v8808_v15  ;;  %v8812_v18 = vpop.f32.mrb[25].mxu1  ;;  %v3424_v19 = vsel %vm3270_vm2, %v8806_v7, -inf  ;;  %v3415_v31 = vsel %vm3270_vm2, %v8808_v15, -inf }
 0x154   : > { %9385 = vst [vmem:[#allocation5_spill] sm:$0xff] %v8812_v18  ;;  %3425 = vmax.xlane.f32.xlu1 %v3424_v19  ;;  %3419 = vmax.xlane.f32.xlu0 %v3418_v17  ;;  %v3421_v29 = vsel %vm3270_vm2, %v8812_v18, -inf }
 0x158   : > { %3422 = vmax.xlane.f32.xlu1 %v3421_v29  ;;  %3416 = vmax.xlane.f32.xlu0 %v3415_v31 }
 0x159   : > { %v8820_v35 = vpop.f32.mrb[26].mxu0 }
 0x15a   : > { %9386 = vst [vmem:[#allocation6_spill] sm:$0xff] %v8820_v35  ;;  %v8822_v40 = vpop.f32.mrb[26].mxu1  ;;  %v8824_v56 = vpop.f32.mrb[27].mxu0  ;;  %v3430_v58 = vsel %vm3270_vm2, %v8820_v35, -inf }
 0x15b   : > { %9387 = vst [vmem:[#allocation7_spill] sm:$0xff] %v8822_v40  ;;  %9388 = vst [vmem:[#allocation8_spill] sm:$0xff] %v8824_v56  ;;  %v8828_v3 = vpop.f32.mrb[27].mxu1  ;;  %v3436_v5 = vsel %vm3270_vm2, %v8822_v40, -inf  ;;  %v3427_v19 = vsel %vm3270_vm2, %v8824_v56, -inf }
 0x15c   : > { %9389 = vst [vmem:[#allocation9_spill] sm:$0xff] %v8828_v3  ;;  %3437 = vmax.xlane.f32.xlu1 %v3436_v5  ;;  %3431 = vmax.xlane.f32.xlu0 %v3430_v58  ;;  %v3433_v17 = vsel %vm3270_vm2, %v8828_v3, -inf }
 0x160   : > { %3434 = vmax.xlane.f32.xlu1 %v3433_v17  ;;  %3428 = vmax.xlane.f32.xlu0 %v3427_v19 }
 0x161   : > { %v8836_v29 = vpop.f32.mrb[28].mxu0 }
 0x162   : > { %9390 = vst [vmem:[#allocation10_spill] sm:$0xff] %v8836_v29  ;;  %v8838_v31 = vpop.f32.mrb[28].mxu1  ;;  %v8840_v35 = vpop.f32.mrb[29].mxu0  ;;  %v3442_v15 = vsel %vm3270_vm2, %v8836_v29, -inf }
 0x163   : > { %9391 = vst [vmem:[#allocation11_spill] sm:$0xff] %v8838_v31  ;;  %9392 = vst [vmem:[#allocation12_spill] sm:$0xff] %v8840_v35  ;;  %v8844_v40 = vpop.f32.mrb[29].mxu1  ;;  %v3448_v58 = vsel %vm3270_vm2, %v8838_v31, -inf  ;;  %v3439_v17 = vsel %vm3270_vm2, %v8840_v35, -inf }
 0x164   : > { %9393 = vst [vmem:[#allocation13_spill] sm:$0xff] %v8844_v40  ;;  %3449 = vmax.xlane.f32.xlu1 %v3448_v58  ;;  %3443 = vmax.xlane.f32.xlu0 %v3442_v15  ;;  %v3445_v5 = vsel %vm3270_vm2, %v8844_v40, -inf }
 0x168   : > { %3446 = vmax.xlane.f32.xlu1 %v3445_v5  ;;  %3440 = vmax.xlane.f32.xlu0 %v3439_v17 }
 0x169   : > { %v8852_v19 = vpop.f32.mrb[30].mxu0 }
 0x16a   : > { %9394 = vst [vmem:[#allocation14_spill] sm:$0xff] %v8852_v19  ;;  %v8854_v56 = vpop.f32.mrb[30].mxu1  ;;  %v8856_v29 = vpop.f32.mrb[31].mxu0  ;;  %v3454_v5 = vsel %vm3270_vm2, %v8852_v19, -inf }
 0x16b   : > { %9395 = vst [vmem:[#allocation15_spill] sm:$0xff] %v8854_v56  ;;  %9396 = vst [vmem:[#allocation16_spill] sm:$0xff] %v8856_v29  ;;  %v8858_v3 = vpop.f32.mrb[31].mxu1  ;;  %v3451_v58 = vsel %vm3270_vm2, %v8856_v29, -inf  ;;  %v3460_v17 = vsel %vm3270_vm2, %v8854_v56, -inf }
 0x16c   : > { %v3457_v15 = vsel %vm3270_vm2, %v8858_v3, -inf  ;;  %3452 = vmax.xlane.f32.xlu0 %v3451_v58 }
 0x16d   : > { %3458 = vmax.xlane.f32.xlu1 %v3457_v15 }
 0x170   : > { %3455 = vmax.xlane.f32.xlu0 %v3454_v5 }
 0x171   : > { %3461 = vmax.xlane.f32.xlu1 %v3460_v17 }
 0x180   : > { %v3276_v35 = vpop.xlane.xlu1 %3275 }
 0x181   : > { %v3464_v40 = vsub.f32 %v8592_v36, %v3276_v35  ;;  %v3273_v31 = vpop.xlane.xlu0 %3272 }
 0x182   : > { %v3463_v18 = vsub.f32 %v8596_v38, %v3273_v31  ;;  %v430_v31 = vld [vmem:[%s8656_s24 + $0x48] sm:$0xff] }
 0x183   : > { %v3529_v29 = vmul.f32 1.442695, %v3464_v40 }
 0x184   : > { %v3527_v6 = vmul.f32 1.442695, %v3463_v18  ;;  %v3282_v7 = vpop.xlane.xlu1 %3281 }
 0x185   : > { %7960 = vpow2.f32 %v3529_v29  ;;  %v3466_v58 = vsub.f32 %v8594_v37, %v3282_v7  ;;  %v3279_v15 = vpop.xlane.xlu0 %3278  ;;  %v429_v7 = vld [vmem:[%s8656_s24 + $0x40] sm:$0xff] }
 0x186   : > { %7962 = vpow2.f32 %v3527_v6  ;;  %v3465_v56 = vsub.f32 %v8600_v39, %v3279_v15 }
 0x187   : > { %v3533_v5 = vmul.f32 1.442695, %v3466_v58 }
 0x188   : > { %v3531_v17 = vmul.f32 1.442695, %v3465_v56 }
 0x189   : > { %7964 = vpow2.f32 %v3533_v5  ;;  %v3294_v19 = vpop.xlane.xlu1 %3293  ;;  %v3288_v36 = vpop.xlane.xlu0 %3287 }
 0x18a   : > { %7966 = vpow2.f32 %v3531_v17  ;;  %v3470_v38 = vsub.f32 %v8610_v44, %v3294_v19  ;;  %v3468_v18 = vsub.f32 %v8608_v43, %v3288_v36  ;;  %v8879_v43 = vpack.c.bf16 %v430_v31, %v429_v7  ;;  %v431_v36 = vld [vmem:[%s8656_s24 + $0x50] sm:$0xff] }
 0x18c   : > { %v3537_v35 = vmul.f32 1.442695, %v3468_v18  ;;  %v3541_v40 = vmul.f32 1.442695, %v3470_v38  ;;  %v432_v38 = vld [vmem:[%s8656_s24 + $0x58] sm:$0xff] }
 0x18d   : > { %v3291_v29 = vpop.xlane.xlu1 %3290  ;;  %v3285_v37 = vpop.xlane.xlu0 %3284  ;;  %v7844_v7 = vpack.c.bf16 %v432_v38, %v431_v36  ;;  %v433_v36 = vld [vmem:[%s8656_s24 + $0x60] sm:$0xff]  ;;  %v434_v38 = vld [vmem:[%s8656_s24 + $0x68] sm:$0xff] }
 0x18e   : > { %v3469_v6 = vsub.f32 %v8616_v47, %v3291_v29  ;;  %v3467_v39 = vsub.f32 %v8612_v45, %v3285_v37  ;;  %7968 = vpow2.f32 %v3537_v35 }
 0x18f   : > { %v7961_v56 = vpop.eup %7960  ;;  %7970 = vpow2.f32 %v3541_v40 }
 0x190   : > { %v7963_v58 = vpop.eup %7962  ;;  %v3539_v15 = vmul.f32 1.442695, %v3469_v6  ;;  %v3535_v5 = vmul.f32 1.442695, %v3467_v39  ;;  %v3658_v44 = vsel %vm3270_vm2, %v7961_v56, 0.0 }
 0x191   : > { %v3306_v19 = vpop.xlane.xlu1 %3305  ;;  %3659 = vadd.xlane.f32.xlu1 %v3658_v44  ;;  %7412 = vmatprep.mubr.msk.f32.mxu0 %vm3270_vm2, %v7963_v58  ;;  %v3300_v17 = vpop.xlane.xlu0 %3299  ;;  %v3655_v47 = vsel %vm3270_vm2, %v7963_v58, 0.0 }
 0x192   : > { %7972 = vpow2.f32 %v3539_v15  ;;  %v3474_v45 = vsub.f32 %v8626_v52, %v3306_v19  ;;  %v3472_v18 = vsub.f32 %v8624_v51, %v3300_v17  ;;  %7413 = vmatmul.mubr.msk.f32.vlgmr.msra.gmra.mrb[32].mxu0 %vm3270_vm2, %v7961_v56  ;;  %3656 = vadd.xlane.f32.xlu0 %v3655_v47  ;;  %v435_v19 = vld [vmem:[%s8656_s24 + $0x70] sm:$0xff]  ;;  %v436_v47 = vld [vmem:[%s8656_s24 + $0x78] sm:$0xff] }
 0x193   : > { %v7965_v35 = vpop.eup %7964  ;;  %7974 = vpow2.f32 %v3535_v5  ;;  %7835 = vmatpush3.bf16.msra.mxu0 %v8690_v24 }
 0x194   : > { %v7967_v40 = vpop.eup %7966  ;;  %v3545_v29 = vmul.f32 1.442695, %v3472_v18  ;;  %v3664_v37 = vsel %vm3270_vm2, %v7965_v35, 0.0  ;;  %7841 = vmatprep.subr.bf16.mxu0 %v8879_v43  ;;  %v3549_v31 = vmul.f32 1.442695, %v3474_v45 }
 0x195   : > { %v3303_v6 = vpop.xlane.xlu1 %3302  ;;  %3665 = vadd.xlane.f32.xlu1 %v3664_v37  ;;  %7419 = vmatprep.mubr.msk.f32.mxu1 %vm3270_vm2, %v7967_v40  ;;  %v3297_v51 = vpop.xlane.xlu0 %3296  ;;  %v3661_v52 = vsel %vm3270_vm2, %v7967_v40, 0.0 }
 0x196   : > { %v3473_v39 = vsub.f32 %v8632_v55, %v3303_v6  ;;  %v3471_v24 = vsub.f32 %v8628_v53, %v3297_v51  ;;  %7420 = vmatmul.mubr.msk.f32.vlgmr.msra.gmra.mrb[32].mxu1 %vm3270_vm2, %v7965_v35  ;;  %3662 = vadd.xlane.f32.xlu0 %v3661_v52  ;;  %7976 = vpow2.f32 %v3545_v29 }
 0x197   : > { %7839 = vmatpush3.bf16.msra.mxu1 %v8684_v20  ;;  %7978 = vpow2.f32 %v3549_v31  ;;  %v7852_v31 = vpack.c.bf16 %v436_v47, %v435_v19  ;;  %v440_v19 = vld [vmem:[%s8656_s24 + $0x98] sm:$0xff] }
 0x198   : > { %v3547_v56 = vmul.f32 1.442695, %v3473_v39  ;;  %v3543_v58 = vmul.f32 1.442695, %v3471_v24  ;;  %7845 = vmatprep.subr.bf16.mxu1 %v7844_v7  ;;  %v7969_v15 = vpop.eup %7968 }
 0x199   : > { %v3318_v5 = vpop.xlane.xlu1 %3317  ;;  %v3312_v44 = vpop.xlane.xlu0 %3311  ;;  %v3670_v17 = vsel %vm3270_vm2, %v7969_v15, 0.0 }
 0x19a   : > { %7980 = vpow2.f32 %v3547_v56  ;;  %v3478_v53 = vsub.f32 %v8642_v60, %v3318_v5  ;;  %v3476_v55 = vsub.f32 %v8640_v59, %v3312_v44  ;;  %v7971_v45 = vpop.eup %7970  ;;  %3671 = vadd.xlane.f32.xlu1 %v3670_v17  ;;  %v7848_v60 = vpack.c.bf16 %v434_v38, %v433_v36 }
 0x19b   : > { %7982 = vpow2.f32 %v3543_v58  ;;  %v3676_v51 = vsel %vm3270_vm2, %v7971_v45, 0.0  ;;  %v439_v58 = vld [vmem:[%s8656_s24 + $0x90] sm:$0xff] }
 0x19c   : > { %v7973_v20 = vpop.eup %7972  ;;  %v3553_v18 = vmul.f32 1.442695, %v3476_v55  ;;  %v3557_v40 = vmul.f32 1.442695, %v3478_v53  ;;  %v437_v53 = vld [vmem:[%s8656_s24 + $0x80] sm:$0xff]  ;;  %v438_v55 = vld [vmem:[%s8656_s24 + $0x88] sm:$0xff] }
 0x19d   : > { %v7975_v35 = vpop.eup %7974  ;;  %v3315_v29 = vpop.xlane.xlu1 %3314  ;;  %7433 = vmatprep.mubr.msk.f32.mxu1 %vm3270_vm2, %v7973_v20  ;;  %v3673_v17 = vsel %vm3270_vm2, %v7973_v20, 0.0 }
 0x19e   : > { %v3309_v37 = vpop.xlane.xlu0 %3308  ;;  %v3477_v59 = vsub.f32 %v8648_v63, %v3315_v29  ;;  %7426 = vmatprep.mubr.msk.f32.mxu0 %vm3270_vm2, %v7975_v35  ;;  %7434 = vmatmul.mubr.msk.f32.vlgmr.msra.gmra.mrb[34].mxu1 %vm3270_vm2, %v7971_v45  ;;  %v3667_v52 = vsel %vm3270_vm2, %v7975_v35, 0.0  ;;  %7984 = vpow2.f32 %v3553_v18  ;;  %v7856_v18 = vpack.c.bf16 %v438_v55, %v437_v53 }
 0x19f   : > { %v3475_v6 = vsub.f32 %v8644_v61, %v3309_v37  ;;  %3677 = vadd.xlane.f32.xlu1 %v3676_v51  ;;  %7427 = vmatmul.mubr.msk.f32.vlgmr.msra.gmra.mrb[34].mxu0 %vm3270_vm2, %v7969_v15  ;;  %7986 = vpow2.f32 %v3557_v40  ;;  %v443_v51 = vld [vmem:[%s8656_s24 + $0xb0] sm:$0xff] }
 0x1a0   : > { %v3555_v39 = vmul.f32 1.442695, %v3477_v59  ;;  %3668 = vadd.xlane.f32.xlu0 %v3667_v52  ;;  %7847 = vmatpush3.bf16.msra.mxu1 %v7844_v7  ;;  %v7977_v63 = vpop.eup %7976 }
 0x1a1   : > { %v3551_v24 = vmul.f32 1.442695, %v3475_v6  ;;  %v3330_v56 = vpop.xlane.xlu1 %3329  ;;  %7843 = vmatpush3.bf16.msra.mxu0 %v8879_v43  ;;  %7853 = vmatprep.subr.bf16.mxu1 %v7852_v31  ;;  %v3682_v44 = vsel %vm3270_vm2, %v7977_v63, 0.0  ;;  %v7979_v7 = vpop.eup %7978 }
 0x1a2   : > { %v3324_v61 = vpop.xlane.xlu0 %3323  ;;  %7988 = vpow2.f32 %v3555_v39  ;;  %v3482_v5 = vsub.f32 %v8668_v11, %v3330_v56  ;;  %7849 = vmatprep.subr.bf16.mxu0 %v7848_v60  ;;  %v7860_v11 = vpack.c.bf16 %v440_v19, %v439_v58  ;;  %v3688_v20 = vsel %vm3270_vm2, %v7979_v7, 0.0  ;;  %v441_v56 = vld [vmem:[%s8656_s24 + $0xa0] sm:$0xff] }
 0x1a3   : > { %v3480_v15 = vsub.f32 %v8666_v9, %v3324_v61  ;;  %7990 = vpow2.f32 %v3551_v24  ;;  %3683 = vadd.xlane.f32.xlu1 %v3682_v44  ;;  %v442_v61 = vld [vmem:[%s8656_s24 + $0xa8] sm:$0xff] }
 0x1a4   : > { %v7981_v47 = vpop.eup %7980  ;;  %3674 = vadd.xlane.f32.xlu0 %v3673_v17  ;;  %v3565_v38 = vmul.f32 1.442695, %v3482_v5  ;;  %v7864_v53 = vpack.c.bf16 %v442_v61, %v441_v56 }
 0x1a5   : > { %v3561_v43 = vmul.f32 1.442695, %v3480_v15  ;;  %v7983_v36 = vpop.eup %7982  ;;  %v3327_v45 = vpop.xlane.xlu1 %3326  ;;  %7447 = vmatprep.mubr.msk.f32.mxu1 %vm3270_vm2, %v7981_v47 }
 0x1a6   : > { %v3321_v9 = vpop.xlane.xlu0 %3320  ;;  %v3481_v35 = vsub.f32 %v8674_v14, %v3327_v45  ;;  %7440 = vmatprep.mubr.msk.f32.mxu0 %vm3270_vm2, %v7983_v36  ;;  %7448 = vmatmul.mubr.msk.f32.vlgmr.msra.gmra.mrb[36].mxu1 %vm3270_vm2, %v7979_v7  ;;  %v3679_v29 = vsel %vm3270_vm2, %v7983_v36, 0.0  ;;  %v447_v45 = vld [vmem:[%s8656_s24 + $0xd0] sm:$0xff] }
 0x1a7   : > { %v3479_v40 = vsub.f32 %v8670_v12, %v3321_v9  ;;  %7992 = vpow2.f32 %v3561_v43  ;;  %3689 = vadd.xlane.f32.xlu1 %v3688_v20  ;;  %7441 = vmatmul.mubr.msk.f32.vlgmr.msra.gmra.mrb[36].mxu0 %vm3270_vm2, %v7977_v63  ;;  %v444_v63 = vld [vmem:[%s8656_s24 + $0xb8] sm:$0xff] }
 0x1a8   : > { %v3563_v37 = vmul.f32 1.442695, %v3481_v35  ;;  %3680 = vadd.xlane.f32.xlu0 %v3679_v29  ;;  %7855 = vmatpush3.bf16.msra.mxu1 %v7852_v31  ;;  %v7985_v14 = vpop.eup %7984  ;;  %7994 = vpow2.f32 %v3565_v38  ;;  %v3685_v31 = vsel %vm3270_vm2, %v7981_v47, 0.0  ;;  %v448_v20 = vld [vmem:[%s8656_s24 + $0xd8] sm:$0xff]  ;;  %v445_v29 = vld [vmem:[%s8656_s24 + $0xc0] sm:$0xff] }
 0x1a9   : > { %v3559_v59 = vmul.f32 1.442695, %v3479_v40  ;;  %v3342_v6 = vpop.xlane.xlu1 %3341  ;;  %7851 = vmatpush3.bf16.msra.mxu0 %v7848_v60  ;;  %7861 = vmatprep.subr.bf16.mxu1 %v7860_v11  ;;  %v3694_v24 = vsel %vm3270_vm2, %v7985_v14, 0.0  ;;  %v7987_v58 = vpop.eup %7986 }
 0x1aa   : > { %v3336_v12 = vpop.xlane.xlu0 %3335  ;;  %7996 = vpow2.f32 %v3563_v37  ;;  %v3486_v52 = vsub.f32 %v8692_v25, %v3342_v6  ;;  %7857 = vmatprep.subr.bf16.mxu0 %v7856_v18  ;;  %v7868_v25 = vpack.c.bf16 %v444_v63, %v443_v51  ;;  %v3700_v17 = vsel %vm3270_vm2, %v7987_v58, 0.0  ;;  %v446_v37 = vld [vmem:[%s8656_s24 + $0xc8] sm:$0xff] }
 0x1ab   : > { %v3484_v39 = vsub.f32 %v8688_v23, %v3336_v12  ;;  %7998 = vpow2.f32 %v3559_v59  ;;  %3695 = vadd.xlane.f32.xlu1 %v3694_v24 }
 0x1ac   : > { %v7989_v5 = vpop.eup %7988  ;;  %3686 = vadd.xlane.f32.xlu0 %v3685_v31  ;;  %v3573_v44 = vmul.f32 1.442695, %v3486_v52  ;;  %v7872_v52 = vpack.c.bf16 %v446_v37, %v445_v29  ;;  %v455_v29 = vld [vmem:[%s8656_s24 + $0x110] sm:$0xff] }
 0x1ad   : > { %v3569_v60 = vmul.f32 1.442695, %v3484_v39  ;;  %v7991_v15 = vpop.eup %7990  ;;  %v3339_v19 = vpop.xlane.xlu1 %3338  ;;  %7461 = vmatprep.mubr.msk.f32.mxu1 %vm3270_vm2, %v7989_v5 }
 0x1ae   : > { %v3333_v23 = vpop.xlane.xlu0 %3332  ;;  %v3485_v55 = vsub.f32 %v8699_v28, %v3339_v19  ;;  %7454 = vmatprep.mubr.msk.f32.mxu0 %vm3270_vm2, %v7991_v15  ;;  %7462 = vmatmul.mubr.msk.f32.vlgmr.msra.gmra.mrb[38].mxu1 %vm3270_vm2, %v7987_v58  ;;  %v3691_v47 = vsel %vm3270_vm2, %v7991_v15, 0.0  ;;  %v452_v19 = vld [vmem:[%s8656_s24 + $0xf8] sm:$0xff] }
 0x1af   : > { %v3483_v7 = vsub.f32 %v8694_v26, %v3333_v23  ;;  %8000 = vpow2.f32 %v3569_v60  ;;  %3701 = vadd.xlane.f32.xlu1 %v3700_v17  ;;  %7455 = vmatmul.mubr.msk.f32.vlgmr.msra.gmra.mrb[38].mxu0 %vm3270_vm2, %v7985_v14  ;;  %v449_v23 = vld [vmem:[%s8656_s24 + $0xe0] sm:$0xff] }
 0x1b0   : > { %v3571_v43 = vmul.f32 1.442695, %v3485_v55  ;;  %3692 = vadd.xlane.f32.xlu0 %v3691_v47  ;;  %7863 = vmatpush3.bf16.msra.mxu1 %v7860_v11  ;;  %8002 = vpow2.f32 %v3573_v44  ;;  %v3697_v11 = vsel %vm3270_vm2, %v7989_v5, 0.0  ;;  %v451_v5 = vld [vmem:[%s8656_s24 + $0xf0] sm:$0xff]  ;;  %v450_v55 = vld [vmem:[%s8656_s24 + $0xe8] sm:$0xff] }
 0x1b1   : > { %v3567_v36 = vmul.f32 1.442695, %v3483_v7  ;;  %v7993_v28 = vpop.eup %7992  ;;  %v3354_v38 = vpop.xlane.xlu1 %3353  ;;  %7859 = vmatpush3.bf16.msra.mxu0 %v7856_v18  ;;  %7869 = vmatprep.subr.bf16.mxu1 %v7868_v25 }
 0x1b2   : > { %v3348_v26 = vpop.xlane.xlu0 %3347  ;;  %8004 = vpow2.f32 %v3571_v43  ;;  %v3490_v9 = vsub.f32 %v8710_v33, %v3354_v38  ;;  %v3706_v40 = vsel %vm3270_vm2, %v7993_v28, 0.0  ;;  %7865 = vmatprep.subr.bf16.mxu0 %v7864_v53  ;;  %v7995_v59 = vpop.eup %7994  ;;  %v7876_v33 = vpack.c.bf16 %v448_v20, %v447_v45 }
 0x1b3   : > { %v3488_v35 = vsub.f32 %v8708_v32, %v3348_v26  ;;  %8006 = vpow2.f32 %v3567_v36  ;;  %3707 = vadd.xlane.f32.xlu1 %v3706_v40  ;;  %v3712_v63 = vsel %vm3270_vm2, %v7995_v59, 0.0 }
 0x1b4   : > { %v7997_v14 = vpop.eup %7996  ;;  %3698 = vadd.xlane.f32.xlu0 %v3697_v11  ;;  %v3581_v12 = vmul.f32 1.442695, %v3490_v9 }
 0x1b5   : > { %v3577_v18 = vmul.f32 1.442695, %v3488_v35  ;;  %v7999_v6 = vpop.eup %7998  ;;  %v3351_v51 = vpop.xlane.xlu1 %3350  ;;  %7475 = vmatprep.mubr.msk.f32.mxu1 %vm3270_vm2, %v7997_v14 }
 0x1b6   : > { %v3345_v32 = vpop.xlane.xlu0 %3344  ;;  %v3489_v39 = vsub.f32 %v8716_v0, %v3351_v51  ;;  %7468 = vmatprep.mubr.msk.f32.mxu0 %vm3270_vm2, %v7999_v6  ;;  %7476 = vmatmul.mubr.msk.f32.vlgmr.msra.gmra.mrb[40].mxu1 %vm3270_vm2, %v7995_v59  ;;  %v3703_v56 = vsel %vm3270_vm2, %v7999_v6, 0.0  ;;  %v454_v6 = vld [vmem:[%s8656_s24 + $0x108] sm:$0xff] }
 0x1b7   : > { %v3487_v24 = vsub.f32 %v8712_v34, %v3345_v32  ;;  %8008 = vpow2.f32 %v3577_v18  ;;  %3713 = vadd.xlane.f32.xlu1 %v3712_v63  ;;  %7469 = vmatmul.mubr.msk.f32.vlgmr.msra.gmra.mrb[40].mxu0 %vm3270_vm2, %v7993_v28  ;;  %v7880_v28 = vpack.c.bf16 %v450_v55, %v449_v23  ;;  %v453_v18 = vld [vmem:[%s8656_s24 + $0x100] sm:$0xff]  ;;  %v460_v23 = vld [vmem:[%s8656_s24 + $0x138] sm:$0xff] }
 0x1b8   : > { %v3579_v61 = vmul.f32 1.442695, %v3489_v39  ;;  %3704 = vadd.xlane.f32.xlu0 %v3703_v56  ;;  %7871 = vmatpush3.bf16.msra.mxu1 %v7868_v25  ;;  %8010 = vpow2.f32 %v3581_v12  ;;  %v3709_v25 = vsel %vm3270_vm2, %v7997_v14, 0.0  ;;  %v456_v14 = vld [vmem:[%s8656_s24 + $0x118] sm:$0xff]  ;;  %v7888_v63 = vpack.c.bf16 %v454_v6, %v453_v18  ;;  %v457_v55 = vld [vmem:[%s8656_s24 + $0x120] sm:$0xff] }
 0x1b9   : > { %v3575_v58 = vmul.f32 1.442695, %v3487_v24  ;;  %v8001_v0 = vpop.eup %8000  ;;  %v3366_v31 = vpop.xlane.xlu1 %3365  ;;  %7867 = vmatpush3.bf16.msra.mxu0 %v7864_v53  ;;  %7877 = vmatprep.subr.bf16.mxu1 %v7876_v33 }
 0x1ba   : > { %v3360_v34 = vpop.xlane.xlu0 %3359  ;;  %8012 = vpow2.f32 %v3579_v61  ;;  %v3494_v60 = vsub.f32 %v8726_v48, %v3366_v31  ;;  %v3718_v44 = vsel %vm3270_vm2, %v8001_v0, 0.0  ;;  %7873 = vmatprep.subr.bf16.mxu0 %v7872_v52  ;;  %v8003_v7 = vpop.eup %8002  ;;  %v7884_v48 = vpack.c.bf16 %v452_v19, %v451_v5 }
 0x1bb   : > { %v3492_v15 = vsub.f32 %v8724_v46, %v3360_v34  ;;  %8014 = vpow2.f32 %v3575_v58  ;;  %3719 = vadd.xlane.f32.xlu1 %v3718_v44  ;;  %v3724_v45 = vsel %vm3270_vm2, %v8003_v7, 0.0 }
 0x1bc   : > { %v8005_v17 = vpop.eup %8004  ;;  %3710 = vadd.xlane.f32.xlu0 %v3709_v25  ;;  %v3589_v43 = vmul.f32 1.442695, %v3494_v60  ;;  %v459_v60 = vld [vmem:[%s8656_s24 + $0x130] sm:$0xff] }
 0x1bd   : > { %v3585_v53 = vmul.f32 1.442695, %v3492_v15  ;;  %v8007_v47 = vpop.eup %8006  ;;  %v3363_v36 = vpop.xlane.xlu1 %3362  ;;  %7489 = vmatprep.mubr.msk.f32.mxu1 %vm3270_vm2, %v8005_v17  ;;  %v3721_v51 = vsel %vm3270_vm2, %v8005_v17, 0.0 }
 0x1be   : > { %v3357_v46 = vpop.xlane.xlu0 %3356  ;;  %v3493_v38 = vsub.f32 %v8732_v54, %v3363_v36  ;;  %7482 = vmatprep.mubr.msk.f32.mxu0 %vm3270_vm2, %v8007_v47  ;;  %7490 = vmatmul.mubr.msk.f32.vlgmr.msra.gmra.mrb[42].mxu1 %vm3270_vm2, %v8003_v7  ;;  %v3715_v9 = vsel %vm3270_vm2, %v8007_v47, 0.0  ;;  %v458_v7 = vld [vmem:[%s8656_s24 + $0x128] sm:$0xff] }
 0x1bf   : > { %v3491_v26 = vsub.f32 %v8728_v49, %v3357_v46  ;;  %8016 = vpow2.f32 %v3585_v53  ;;  %3725 = vadd.xlane.f32.xlu1 %v3724_v45  ;;  %7483 = vmatmul.mubr.msk.f32.vlgmr.msra.gmra.mrb[42].mxu0 %vm3270_vm2, %v8001_v0 }
 0x1c0   : > { %v3587_v35 = vmul.f32 1.442695, %v3493_v38  ;;  %3716 = vadd.xlane.f32.xlu0 %v3715_v9  ;;  %7879 = vmatpush3.bf16.msra.mxu1 %v7876_v33  ;;  %8018 = vpow2.f32 %v3589_v43 }
 0x1c1   : > { %v3583_v40 = vmul.f32 1.442695, %v3491_v26  ;;  %v8009_v54 = vpop.eup %8008  ;;  %v3378_v20 = vpop.xlane.xlu1 %3377  ;;  %7875 = vmatpush3.bf16.msra.mxu0 %v7872_v52  ;;  %7885 = vmatprep.subr.bf16.mxu1 %v7884_v48 }
 0x1c2   : > { %v3372_v49 = vpop.xlane.xlu0 %3371  ;;  %8020 = vpow2.f32 %v3587_v35  ;;  %v3498_v37 = vsub.f32 %v8742_v1, %v3378_v20  ;;  %v3730_v11 = vsel %vm3270_vm2, %v8009_v54, 0.0  ;;  %7881 = vmatprep.subr.bf16.mxu0 %v7880_v28  ;;  %v8011_v12 = vpop.eup %8010  ;;  %v7892_v1 = vpack.c.bf16 %v456_v14, %v455_v29 }
 0x1c3   : > { %v3496_v59 = vsub.f32 %v8740_v62, %v3372_v49  ;;  %8022 = vpow2.f32 %v3583_v40  ;;  %3731 = vadd.xlane.f32.xlu1 %v3730_v11  ;;  %v3736_v58 = vsel %vm3270_vm2, %v8011_v12, 0.0  ;;  %v462_v11 = vld [vmem:[%s8656_s24 + $0x148] sm:$0xff] }
 0x1c4   : > { %v8013_v32 = vpop.eup %8012  ;;  %3722 = vadd.xlane.f32.xlu0 %v3721_v51  ;;  %v3597_v39 = vmul.f32 1.442695, %v3498_v37  ;;  %v464_v37 = vld [vmem:[%s8656_s24 + $0x158] sm:$0xff] }
 0x1c5   : > { %v3593_v33 = vmul.f32 1.442695, %v3496_v59  ;;  %v8015_v52 = vpop.eup %8014  ;;  %v3375_v24 = vpop.xlane.xlu1 %3374  ;;  %7503 = vmatprep.mubr.msk.f32.mxu1 %vm3270_vm2, %v8013_v32  ;;  %v3733_v17 = vsel %vm3270_vm2, %v8013_v32, 0.0  ;;  %v461_v59 = vld [vmem:[%s8656_s24 + $0x140] sm:$0xff] }
 0x1c6   : > { %v3369_v62 = vpop.xlane.xlu0 %3368  ;;  %v3497_v56 = vsub.f32 %v8748_v4, %v3375_v24  ;;  %7496 = vmatprep.mubr.msk.f32.mxu0 %vm3270_vm2, %v8015_v52  ;;  %7504 = vmatmul.mubr.msk.f32.vlgmr.msra.gmra.mrb[44].mxu1 %vm3270_vm2, %v8011_v12  ;;  %v3727_v0 = vsel %vm3270_vm2, %v8015_v52, 0.0  ;;  %v7904_v52 = vpack.c.bf16 %v462_v11, %v461_v59 }
 0x1c7   : > { %v3495_v61 = vsub.f32 %v8744_v2, %v3369_v62  ;;  %8024 = vpow2.f32 %v3593_v33  ;;  %3737 = vadd.xlane.f32.xlu1 %v3736_v58  ;;  %7497 = vmatmul.mubr.msk.f32.vlgmr.msra.gmra.mrb[44].mxu0 %vm3270_vm2, %v8009_v54  ;;  %v463_v54 = vld [vmem:[%s8656_s24 + $0x150] sm:$0xff] }
 0x1c8   : > { %v3595_v31 = vmul.f32 1.442695, %v3497_v56  ;;  %3728 = vadd.xlane.f32.xlu0 %v3727_v0  ;;  %7887 = vmatpush3.bf16.msra.mxu1 %v7884_v48  ;;  %8026 = vpow2.f32 %v3597_v39  ;;  %v7896_v48 = vpack.c.bf16 %v458_v7, %v457_v55  ;;  %v467_v58 = vld [vmem:[%s8656_s24 + $0x170] sm:$0xff] }
 0x1c9   : > { %v3591_v34 = vmul.f32 1.442695, %v3495_v61  ;;  %v8017_v4 = vpop.eup %8016  ;;  %v3390_v5 = vpop.xlane.xlu1 %3389  ;;  %7883 = vmatpush3.bf16.msra.mxu0 %v7880_v28  ;;  %7893 = vmatprep.subr.bf16.mxu1 %v7892_v1 }
 0x1ca   : > { %v3384_v2 = vpop.xlane.xlu0 %3383  ;;  %8028 = vpow2.f32 %v3595_v31  ;;  %v3502_v15 = vsub.f32 %v8758_v10, %v3390_v5  ;;  %v3742_v19 = vsel %vm3270_vm2, %v8017_v4, 0.0  ;;  %7889 = vmatprep.subr.bf16.mxu0 %v7888_v63  ;;  %v8019_v25 = vpop.eup %8018  ;;  %v7900_v10 = vpack.c.bf16 %v460_v23, %v459_v60  ;;  %v465_v5 = vld [vmem:[%s8656_s24 + $0x160] sm:$0xff] }
 0x1cb   : > { %v3500_v44 = vsub.f32 %v8756_v8, %v3384_v2  ;;  %8030 = vpow2.f32 %v3591_v34  ;;  %3743 = vadd.xlane.f32.xlu1 %v3742_v19  ;;  %v3748_v26 = vsel %vm3270_vm2, %v8019_v25, 0.0  ;;  %v466_v2 = vld [vmem:[%s8656_s24 + $0x168] sm:$0xff] }
 0x1cc   : > { %v8021_v53 = vpop.eup %8020  ;;  %3734 = vadd.xlane.f32.xlu0 %v3733_v17  ;;  %v3605_v36 = vmul.f32 1.442695, %v3502_v15 }
 0x1cd   : > { %v3601_v47 = vmul.f32 1.442695, %v3500_v44  ;;  %v8023_v43 = vpop.eup %8022  ;;  %v3387_v46 = vpop.xlane.xlu1 %3386  ;;  %7517 = vmatprep.mubr.msk.f32.mxu1 %vm3270_vm2, %v8021_v53  ;;  %v3745_v18 = vsel %vm3270_vm2, %v8021_v53, 0.0 }
 0x1ce   : > { %v3381_v8 = vpop.xlane.xlu0 %3380  ;;  %v3501_v28 = vsub.f32 %v8764_v16, %v3387_v46  ;;  %7510 = vmatprep.mubr.msk.f32.mxu0 %vm3270_vm2, %v8023_v43  ;;  %7518 = vmatmul.mubr.msk.f32.vlgmr.msra.gmra.mrb[46].mxu1 %vm3270_vm2, %v8019_v25  ;;  %v3739_v45 = vsel %vm3270_vm2, %v8023_v43, 0.0  ;;  %v7912_v25 = vpack.c.bf16 %v466_v2, %v465_v5 }
 0x1cf   : > { %v3499_v38 = vsub.f32 %v8760_v13, %v3381_v8  ;;  %8032 = vpow2.f32 %v3601_v47  ;;  %3749 = vadd.xlane.f32.xlu1 %v3748_v26  ;;  %7511 = vmatmul.mubr.msk.f32.vlgmr.msra.gmra.mrb[46].mxu0 %vm3270_vm2, %v8017_v4  ;;  %v468_v4 = vld [vmem:[%s8656_s24 + $0x178] sm:$0xff] }
 0x1d0   : > { %v3603_v9 = vmul.f32 1.442695, %v3501_v28  ;;  %3740 = vadd.xlane.f32.xlu0 %v3739_v45  ;;  %7895 = vmatpush3.bf16.msra.mxu1 %v7892_v1  ;;  %8034 = vpow2.f32 %v3605_v36 }
 0x1d1   : > { %v3599_v35 = vmul.f32 1.442695, %v3499_v38  ;;  %v8025_v16 = vpop.eup %8024  ;;  %v3402_v40 = vpop.xlane.xlu1 %3401  ;;  %7891 = vmatpush3.bf16.msra.mxu0 %v7888_v63  ;;  %7901 = vmatprep.subr.bf16.mxu1 %v7900_v10  ;;  %v9398_v38 = vld [vmem:[#allocation2_spill] sm:$0xff] }
 0x1d2   : > { %v3396_v13 = vpop.xlane.xlu0 %3395  ;;  %8036 = vpow2.f32 %v3603_v9  ;;  %v3506_v20 = vsub.f32 %v8774_v22, %v3402_v40  ;;  %v3754_v29 = vsel %vm3270_vm2, %v8025_v16, 0.0  ;;  %7897 = vmatprep.subr.bf16.mxu0 %v7896_v48  ;;  %v8027_v14 = vpop.eup %8026  ;;  %v7908_v22 = vpack.c.bf16 %v464_v37, %v463_v54  ;;  %v472_v9 = vld [vmem:[%s8656_s24 + $0x198] sm:$0xff] }
 0x1d3   : > { %v3504_v49 = vsub.f32 %v8772_v21, %v3396_v13  ;;  %8038 = vpow2.f32 %v3599_v35  ;;  %3755 = vadd.xlane.f32.xlu1 %v3754_v29  ;;  %v3760_v62 = vsel %vm3270_vm2, %v8027_v14, 0.0  ;;  %v469_v35 = vld [vmem:[%s8656_s24 + $0x180] sm:$0xff] }
 0x1d4   : > { %v8029_v6 = vpop.eup %8028  ;;  %3746 = vadd.xlane.f32.xlu0 %v3745_v18  ;;  %v3613_v32 = vmul.f32 1.442695, %v3506_v20  ;;  %v9399_v18 = vld [vmem:[#allocation5_spill] sm:$0xff] }
 0x1d5   : > { %v3609_v12 = vmul.f32 1.442695, %v3504_v49  ;;  %v8031_v51 = vpop.eup %8030  ;;  %v3399_v33 = vpop.xlane.xlu1 %3398  ;;  %7531 = vmatprep.mubr.msk.f32.mxu1 %vm3270_vm2, %v8029_v6  ;;  %v3757_v15 = vsel %vm3270_vm2, %v8029_v6, 0.0 }
 0x1d6   : > { %v3393_v21 = vpop.xlane.xlu0 %3392  ;;  %v3505_v39 = vsub.f32 %v8780_v30, %v3399_v33  ;;  %7524 = vmatprep.mubr.msk.f32.mxu0 %vm3270_vm2, %v8031_v51  ;;  %7532 = vmatmul.mubr.msk.f32.vlgmr.msra.gmra.mrb[48].mxu1 %vm3270_vm2, %v8027_v14  ;;  %v3751_v1 = vsel %vm3270_vm2, %v8031_v51, 0.0 }
 0x1d7   : > { %v3503_v24 = vsub.f32 %v8776_v27, %v3393_v21  ;;  %8040 = vpow2.f32 %v3609_v12  ;;  %3761 = vadd.xlane.f32.xlu1 %v3760_v62  ;;  %7525 = vmatmul.mubr.msk.f32.vlgmr.msra.gmra.mrb[48].mxu0 %vm3270_vm2, %v8025_v16  ;;  %v470_v16 = vld [vmem:[%s8656_s24 + $0x188] sm:$0xff]  ;;  %v9400_v12 = vld [vmem:[#allocation4_spill] sm:$0xff] }
 0x1d8   : > { %v3611_v63 = vmul.f32 1.442695, %v3505_v39  ;;  %3752 = vadd.xlane.f32.xlu0 %v3751_v1  ;;  %7903 = vmatpush3.bf16.msra.mxu1 %v7900_v10  ;;  %8042 = vpow2.f32 %v3613_v32  ;;  %v471_v10 = vld [vmem:[%s8656_s24 + $0x190] sm:$0xff]  ;;  %v7920_v14 = vpack.c.bf16 %v470_v16, %v469_v35  ;;  %v9401_v1 = vld [vmem:[#allocation7_spill] sm:$0xff] }
 0x1d9   : > { %v3607_v56 = vmul.f32 1.442695, %v3503_v24  ;;  %v8033_v30 = vpop.eup %8032  ;;  %v3414_v61 = vpop.xlane.xlu1 %3413  ;;  %7899 = vmatpush3.bf16.msra.mxu0 %v7896_v48  ;;  %7909 = vmatprep.subr.bf16.mxu1 %v7908_v22  ;;  %v9397_v48 = vld [vmem:[#allocation3_spill] sm:$0xff]  ;;  %v7924_v11 = vpack.c.bf16 %v472_v9, %v471_v10  ;;  %v475_v62 = vld [vmem:[%s8656_s24 + $0x1b0] sm:$0xff]  ;;  %v9406_v10 = vld [vmem:[#allocation10_spill] sm:$0xff] }
 0x1da   : > { %v3408_v27 = vpop.xlane.xlu0 %3407  ;;  %8044 = vpow2.f32 %v3611_v63  ;;  %v3510_v0 = vsub.f32 %v8790_v42, %v3414_v61  ;;  %v3766_v34 = vsel %vm3270_vm2, %v8033_v30, 0.0  ;;  %7905 = vmatprep.subr.bf16.mxu0 %v7904_v52  ;;  %v8035_v60 = vpop.eup %8034  ;;  %v7916_v42 = vpack.c.bf16 %v468_v4, %v467_v58  ;;  %v473_v58 = vld [vmem:[%s8656_s24 + $0x1a0] sm:$0xff] }
 0x1db   : > { %v3508_v31 = vsub.f32 %v8788_v41, %v3408_v27  ;;  %8046 = vpow2.f32 %v3607_v56  ;;  %3767 = vadd.xlane.f32.xlu1 %v3766_v34  ;;  %v3772_v47 = vsel %vm3270_vm2, %v8035_v60, 0.0  ;;  %v9402_v56 = vld [vmem:[#allocation6_spill] sm:$0xff]  ;;  %v476_v27 = vld [vmem:[%s8656_s24 + $0x1b8] sm:$0xff] }
 0x1dc   : > { %v8037_v44 = vpop.eup %8036  ;;  %3758 = vadd.xlane.f32.xlu0 %v3757_v15  ;;  %v3621_v55 = vmul.f32 1.442695, %v3510_v0  ;;  %v474_v0 = vld [vmem:[%s8656_s24 + $0x1a8] sm:$0xff] }
 0x1dd   : > { %v3617_v19 = vmul.f32 1.442695, %v3508_v31  ;;  %v8039_v23 = vpop.eup %8038  ;;  %v3411_v7 = vpop.xlane.xlu1 %3410  ;;  %7545 = vmatprep.mubr.msk.f32.mxu1 %vm3270_vm2, %v8037_v44  ;;  %v3769_v13 = vsel %vm3270_vm2, %v8037_v44, 0.0 }
 0x1de   : > { %v3405_v41 = vpop.xlane.xlu0 %3404  ;;  %v3509_v17 = vsub.f32 %v8796_v57, %v3411_v7  ;;  %7538 = vmatprep.mubr.msk.f32.mxu0 %vm3270_vm2, %v8039_v23  ;;  %7546 = vmatmul.mubr.msk.f32.vlgmr.msra.gmra.mrb[50].mxu1 %vm3270_vm2, %v8035_v60  ;;  %v3763_v43 = vsel %vm3270_vm2, %v8039_v23, 0.0  ;;  %v7928_v23 = vpack.c.bf16 %v474_v0, %v473_v58 }
 0x1df   : > { %v3507_v53 = vsub.f32 %v8792_v50, %v3405_v41  ;;  %8048 = vpow2.f32 %v3617_v19  ;;  %3773 = vadd.xlane.f32.xlu1 %v3772_v47  ;;  %7539 = vmatmul.mubr.msk.f32.vlgmr.msra.gmra.mrb[50].mxu0 %vm3270_vm2, %v8033_v30  ;;  %v7932_v19 = vpack.c.bf16 %v476_v27, %v475_v62  ;;  %v9404_v41 = vld [vmem:[#allocation8_spill] sm:$0xff] }
 0x1e0   : > { %v3619_v36 = vmul.f32 1.442695, %v3509_v17  ;;  %3764 = vadd.xlane.f32.xlu0 %v3763_v43  ;;  %7911 = vmatpush3.bf16.msra.mxu1 %v7908_v22  ;;  %8050 = vpow2.f32 %v3621_v55  ;;  %v9403_v55 = vld [vmem:[#allocation9_spill] sm:$0xff] }
 0x1e1   : > { %v3615_v46 = vmul.f32 1.442695, %v3507_v53  ;;  %v8041_v57 = vpop.eup %8040  ;;  %v3426_v8 = vpop.xlane.xlu1 %3425  ;;  %7907 = vmatpush3.bf16.msra.mxu0 %v7904_v52  ;;  %7917 = vmatprep.subr.bf16.mxu1 %v7916_v42 }
 0x1e2   : > { %v3420_v50 = vpop.xlane.xlu0 %3419  ;;  %8052 = vpow2.f32 %v3619_v36  ;;  %v3514_v28 = vsub.f32 %v9397_v48, %v3426_v8  ;;  %v3778_v45 = vsel %vm3270_vm2, %v8041_v57, 0.0  ;;  %7913 = vmatprep.subr.bf16.mxu0 %v7912_v25  ;;  %v8043_v40 = vpop.eup %8042  ;;  %v9405_v8 = vld [vmem:[#allocation11_spill] sm:$0xff] }
 0x1e3   : > { %v3512_v26 = vsub.f32 %v9398_v38, %v3420_v50  ;;  %8054 = vpow2.f32 %v3615_v46  ;;  %3779 = vadd.xlane.f32.xlu1 %v3778_v45  ;;  %v3784_v32 = vsel %vm3270_vm2, %v8043_v40, 0.0  ;;  %v480_v38 = vld [vmem:[%s8656_s24 + $0x1d8] sm:$0xff]  ;;  %v478_v45 = vld [vmem:[%s8656_s24 + $0x1c8] sm:$0xff] }
 0x1e4   : > { %v8045_v54 = vpop.eup %8044  ;;  %3770 = vadd.xlane.f32.xlu0 %v3769_v13  ;;  %v3629_v29 = vmul.f32 1.442695, %v3514_v28 }
 0x1e5   : > { %v3625_v20 = vmul.f32 1.442695, %v3512_v26  ;;  %v8047_v49 = vpop.eup %8046  ;;  %v3423_v37 = vpop.xlane.xlu1 %3422  ;;  %7559 = vmatprep.mubr.msk.f32.mxu1 %vm3270_vm2, %v8045_v54  ;;  %v3781_v34 = vsel %vm3270_vm2, %v8045_v54, 0.0  ;;  %v477_v26 = vld [vmem:[%s8656_s24 + $0x1c0] sm:$0xff] }
 0x1e6   : > { %v3417_v59 = vpop.xlane.xlu0 %3416  ;;  %v3513_v6 = vsub.f32 %v9399_v18, %v3423_v37  ;;  %7552 = vmatprep.mubr.msk.f32.mxu0 %vm3270_vm2, %v8047_v49  ;;  %7560 = vmatmul.mubr.msk.f32.vlgmr.msra.gmra.mrb[52].mxu1 %vm3270_vm2, %v8043_v40  ;;  %v3775_v33 = vsel %vm3270_vm2, %v8047_v49, 0.0  ;;  %v7936_v37 = vpack.c.bf16 %v478_v45, %v477_v26 }
 0x1e7   : > { %v3511_v51 = vsub.f32 %v9400_v12, %v3417_v59  ;;  %8056 = vpow2.f32 %v3625_v20  ;;  %3785 = vadd.xlane.f32.xlu1 %v3784_v32  ;;  %7553 = vmatmul.mubr.msk.f32.vlgmr.msra.gmra.mrb[52].mxu0 %vm3270_vm2, %v8041_v57  ;;  %v479_v57 = vld [vmem:[%s8656_s24 + $0x1d0] sm:$0xff]  ;;  %v9407_v59 = vld [vmem:[#allocation13_spill] sm:$0xff] }
 0x1e8   : > { %v3627_v21 = vmul.f32 1.442695, %v3513_v6  ;;  %3776 = vadd.xlane.f32.xlu0 %v3775_v33  ;;  %7919 = vmatpush3.bf16.msra.mxu1 %v7916_v42  ;;  %8058 = vpow2.f32 %v3629_v29  ;;  %v7940_v29 = vpack.c.bf16 %v480_v38, %v479_v57 }
 0x1e9   : > { %v3623_v22 = vmul.f32 1.442695, %v3511_v51  ;;  %v8049_v52 = vpop.eup %8048  ;;  %v3438_v39 = vpop.xlane.xlu1 %3437  ;;  %7915 = vmatpush3.bf16.msra.mxu0 %v7912_v25  ;;  %7925 = vmatprep.subr.bf16.mxu1 %v7924_v11 }
 0x1ea   : > { %v3432_v24 = vpop.xlane.xlu0 %3431  ;;  %8060 = vpow2.f32 %v3627_v21  ;;  %v3518_v63 = vsub.f32 %v9401_v1, %v3438_v39  ;;  %v3790_v61 = vsel %vm3270_vm2, %v8049_v52, 0.0  ;;  %7921 = vmatprep.subr.bf16.mxu0 %v7920_v14  ;;  %v8051_v31 = vpop.eup %8050  ;;  %v9409_v39 = vld [vmem:[#allocation16_spill] sm:$0xff]  ;;  %v482_v1 = vld [vmem:[%s8656_s24 + $0x1e8] sm:$0xff] }
 0x1eb   : > { %v3516_v30 = vsub.f32 %v9402_v56, %v3432_v24  ;;  %8062 = vpow2.f32 %v3623_v22  ;;  %3791 = vadd.xlane.f32.xlu1 %v3790_v61  ;;  %v3796_v25 = vsel %vm3270_vm2, %v8051_v31, 0.0  ;;  %v481_v22 = vld [vmem:[%s8656_s24 + $0x1e0] sm:$0xff]  ;;  %v484_v56 = vld [vmem:[%s8656_s24 + $0x1f8] sm:$0xff] }
 0x1ec   : > { %v8053_v4 = vpop.eup %8052  ;;  %3782 = vadd.xlane.f32.xlu0 %v3781_v34  ;;  %v3637_v60 = vmul.f32 1.442695, %v3518_v63  ;;  %v483_v63 = vld [vmem:[%s8656_s24 + $0x1f0] sm:$0xff] }
 0x1ed   : > { %v3633_v5 = vmul.f32 1.442695, %v3516_v30  ;;  %v8055_v2 = vpop.eup %8054  ;;  %v3435_v15 = vpop.xlane.xlu1 %3434  ;;  %7573 = vmatprep.mubr.msk.f32.mxu1 %vm3270_vm2, %v8053_v4  ;;  %v3793_v35 = vsel %vm3270_vm2, %v8053_v4, 0.0 }
 0x1ee   : > { %v3429_v44 = vpop.xlane.xlu0 %3428  ;;  %v3517_v7 = vsub.f32 %v9403_v55, %v3435_v15  ;;  %7566 = vmatprep.mubr.msk.f32.mxu0 %vm3270_vm2, %v8055_v2  ;;  %7574 = vmatmul.mubr.msk.f32.vlgmr.msra.gmra.mrb[54].mxu1 %vm3270_vm2, %v8051_v31  ;;  %v3787_v17 = vsel %vm3270_vm2, %v8055_v2, 0.0  ;;  %v7948_v2 = vpack.c.bf16 %v484_v56, %v483_v63 }
 0x1ef   : > { %v3515_v42 = vsub.f32 %v9404_v41, %v3429_v44  ;;  %8064 = vpow2.f32 %v3633_v5  ;;  %3797 = vadd.xlane.f32.xlu1 %v3796_v25  ;;  %7567 = vmatmul.mubr.msk.f32.vlgmr.msra.gmra.mrb[54].mxu0 %vm3270_vm2, %v8049_v52  ;;  %v7944_v5 = vpack.c.bf16 %v482_v1, %v481_v22 }
 0x1f0   : > { %v3635_v53 = vmul.f32 1.442695, %v3517_v7  ;;  %3788 = vadd.xlane.f32.xlu0 %v3787_v17  ;;  %7927 = vmatpush3.bf16.msra.mxu1 %v7924_v11  ;;  %8066 = vpow2.f32 %v3637_v60 }
 0x1f1   : > { %v3631_v47 = vmul.f32 1.442695, %v3515_v42  ;;  %v8057_v43 = vpop.eup %8056  ;;  %v3450_v36 = vpop.xlane.xlu1 %3449  ;;  %7923 = vmatpush3.bf16.msra.mxu0 %v7920_v14  ;;  %7933 = vmatprep.subr.bf16.mxu1 %v7932_v19  ;;  %v9408_v14 = vld [vmem:[#allocation12_spill] sm:$0xff] }
 0x1f2   : > { %v3444_v46 = vpop.xlane.xlu0 %3443  ;;  %8068 = vpow2.f32 %v3635_v53  ;;  %v3522_v50 = vsub.f32 %v9405_v8, %v3450_v36  ;;  %v3802_v28 = vsel %vm3270_vm2, %v8057_v43, 0.0  ;;  %7929 = vmatprep.subr.bf16.mxu0 %v7928_v23  ;;  %v8059_v9 = vpop.eup %8058 }
 0x1f3   : > { %v3520_v48 = vsub.f32 %v9406_v10, %v3444_v46  ;;  %8070 = vpow2.f32 %v3631_v47  ;;  %3803 = vadd.xlane.f32.xlu1 %v3802_v28  ;;  %v3808_v6 = vsel %vm3270_vm2, %v8059_v9, 0.0 }
 0x1f4   : > { %v8061_v16 = vpop.eup %8060  ;;  %3794 = vadd.xlane.f32.xlu0 %v3793_v35  ;;  %v3645_v54 = vmul.f32 1.442695, %v3522_v50 }
 0x1f5   : > { %v3641_v40 = vmul.f32 1.442695, %v3520_v48  ;;  %v8063_v13 = vpop.eup %8062  ;;  %v3447_v20 = vpop.xlane.xlu1 %3446  ;;  %7587 = vmatprep.mubr.msk.f32.mxu1 %vm3270_vm2, %v8061_v16  ;;  %v3805_v27 = vsel %vm3270_vm2, %v8061_v16, 0.0 }
 0x1f6   : > { %v3441_v49 = vpop.xlane.xlu0 %3440  ;;  %v3521_v11 = vsub.f32 %v9407_v59, %v3447_v20  ;;  %7580 = vmatprep.mubr.msk.f32.mxu0 %vm3270_vm2, %v8063_v13  ;;  %7588 = vmatmul.mubr.msk.f32.vlgmr.msra.gmra.mrb[56].mxu1 %vm3270_vm2, %v8059_v9  ;;  %v3799_v12 = vsel %vm3270_vm2, %v8063_v13, 0.0 }
 0x1f7   : > { %v3519_v18 = vsub.f32 %v9408_v14, %v3441_v49  ;;  %8072 = vpow2.f32 %v3641_v40  ;;  %3809 = vadd.xlane.f32.xlu1 %v3808_v6  ;;  %7581 = vmatmul.mubr.msk.f32.vlgmr.msra.gmra.mrb[56].mxu0 %vm3270_vm2, %v8057_v43 }
 0x1f8   : > { %v3643_v51 = vmul.f32 1.442695, %v3521_v11  ;;  %3800 = vadd.xlane.f32.xlu0 %v3799_v12  ;;  %7935 = vmatpush3.bf16.msra.mxu1 %v7932_v19  ;;  %8074 = vpow2.f32 %v3645_v54 }
 0x1f9   : > { %v3639_v32 = vmul.f32 1.442695, %v3519_v18  ;;  %v8065_v33 = vpop.eup %8064  ;;  %7931 = vmatpush3.bf16.msra.mxu0 %v7928_v23  ;;  %7941 = vmatprep.subr.bf16.mxu1 %v7940_v29  ;;  %v9411_v23 = vld [vmem:[#allocation15_spill] sm:$0xff] }
 0x1fa   : > { %v3453_v21 = vpop.xlane.xlu0 %3452  ;;  %8076 = vpow2.f32 %v3643_v51  ;;  %v3459_v52 = vpop.xlane.xlu1 %3458  ;;  %v3814_v62 = vsel %vm3270_vm2, %v8065_v33, 0.0  ;;  %7937 = vmatprep.subr.bf16.mxu0 %v7936_v37 }
 0x1fb   : > { %v3523_v24 = vsub.f32 %v9409_v39, %v3453_v21  ;;  %v8067_v30 = vpop.eup %8066  ;;  %8078 = vpow2.f32 %v3639_v32  ;;  %v3525_v61 = vsub.f32 %v8858_v3, %v3459_v52  ;;  %3815 = vadd.xlane.f32.xlu1 %v3814_v62  ;;  %v9410_v3 = vld [vmem:[#allocation14_spill] sm:$0xff] }
 0x1fc   : > { %v8069_v58 = vpop.eup %8068  ;;  %3806 = vadd.xlane.f32.xlu0 %v3805_v27  ;;  %v3820_v44 = vsel %vm3270_vm2, %v8067_v30, 0.0 }
 0x1fd   : > { %v3647_v0 = vmul.f32 1.442695, %v3523_v24  ;;  %v8071_v31 = vpop.eup %8070  ;;  %v3651_v34 = vmul.f32 1.442695, %v3525_v61  ;;  %7601 = vmatprep.mubr.msk.f32.mxu1 %vm3270_vm2, %v8069_v58  ;;  %v3817_v53 = vsel %vm3270_vm2, %v8069_v58, 0.0 }
 0x1fe   : > { %v3456_v4 = vpop.xlane.xlu0 %3455  ;;  %v3462_v60 = vpop.xlane.xlu1 %3461  ;;  %7594 = vmatprep.mubr.msk.f32.mxu0 %vm3270_vm2, %v8071_v31  ;;  %7602 = vmatmul.mubr.msk.f32.vlgmr.msra.gmra.mrb[58].mxu1 %vm3270_vm2, %v8067_v30  ;;  %v3811_v19 = vsel %vm3270_vm2, %v8071_v31, 0.0 }
 0x1ff   : > { %8080 = vpow2.f32 %v3647_v0  ;;  %v3524_v15 = vsub.f32 %v9410_v3, %v3456_v4  ;;  %v3526_v55 = vsub.f32 %v9411_v23, %v3462_v60  ;;  %3821 = vadd.xlane.f32.xlu1 %v3820_v44  ;;  %7595 = vmatmul.mubr.msk.f32.vlgmr.msra.gmra.mrb[58].mxu0 %vm3270_vm2, %v8065_v33 }
 0x200   : > { %8082 = vpow2.f32 %v3651_v34  ;;  %3812 = vadd.xlane.f32.xlu0 %v3811_v19  ;;  %7943 = vmatpush3.bf16.msra.mxu1 %v7940_v29 }
 0x201   : > { %v3649_v7 = vmul.f32 1.442695, %v3524_v15  ;;  %v8073_v41 = vpop.eup %8072  ;;  %v3653_v42 = vmul.f32 1.442695, %v3526_v55  ;;  %7939 = vmatpush3.bf16.msra.mxu0 %v7936_v37  ;;  %7949 = vmatprep.subr.bf16.mxu1 %v7948_v2 }
 0x202   : > { %v3826_v25 = vsel %vm3270_vm2, %v8073_v41, 0.0  ;;  %7945 = vmatprep.subr.bf16.mxu0 %v7944_v5  ;;  %v8075_v17 = vpop.eup %8074 }
 0x203   : > { %8084 = vpow2.f32 %v3649_v7  ;;  %3827 = vadd.xlane.f32.xlu1 %v3826_v25  ;;  %v3832_v36 = vsel %vm3270_vm2, %v8075_v17, 0.0 }
 0x204   : > { %8086 = vpow2.f32 %v3653_v42  ;;  %v8077_v47 = vpop.eup %8076  ;;  %3818 = vadd.xlane.f32.xlu0 %v3817_v53 }
 0x205   : > { %v8079_v43 = vpop.eup %8078  ;;  %7615 = vmatprep.mubr.msk.f32.mxu1 %vm3270_vm2, %v8077_v47  ;;  %v3829_v50 = vsel %vm3270_vm2, %v8077_v47, 0.0 }
 0x206   : > { %7608 = vmatprep.mubr.msk.f32.mxu0 %vm3270_vm2, %v8079_v43  ;;  %7616 = vmatmul.mubr.msk.f32.vlgmr.msra.gmra.mrb[60].mxu1 %vm3270_vm2, %v8075_v17  ;;  %v3823_v46 = vsel %vm3270_vm2, %v8079_v43, 0.0 }
 0x207   : > { %3833 = vadd.xlane.f32.xlu1 %v3832_v36  ;;  %7609 = vmatmul.mubr.msk.f32.vlgmr.msra.gmra.mrb[60].mxu0 %vm3270_vm2, %v8073_v41 }
 0x208   : > { %3824 = vadd.xlane.f32.xlu0 %v3823_v46  ;;  %7947 = vmatpush3.bf16.msra.mxu0 %v7944_v5 }
 0x209   : > { %v8081_v57 = vpop.eup %8080  ;;  %7951 = vmatpush3.bf16.msra.mxu1 %v7948_v2 }
 0x20a   : > { %v8083_v8 = vpop.eup %8082  ;;  %7622 = vmatprep.mubr.msk.f32.mxu0 %vm3270_vm2, %v8081_v57  ;;  %v3835_v38 = vsel %vm3270_vm2, %v8081_v57, 0.0 }
 0x20b   : > { %7629 = vmatprep.mubr.msk.f32.mxu1 %vm3270_vm2, %v8083_v8  ;;  %v3841_v45 = vsel %vm3270_vm2, %v8083_v8, 0.0 }
 0x20c   : > { %3830 = vadd.xlane.f32.xlu0 %v3829_v50 }
 0x20d   : > { %v8085_v10 = vpop.eup %8084 }
 0x20e   : > { %v8087_v48 = vpop.eup %8086  ;;  %7623 = vmatmul.mubr.msk.f32.vlgmr.msra.gmra.mrb[62].mxu0 %vm3270_vm2, %v8085_v10  ;;  %v3838_v28 = vsel %vm3270_vm2, %v8085_v10, 0.0 }
 0x20f   : > { %7630 = vmatmul.mubr.msk.f32.vlgmr.msra.gmra.mrb[62].mxu1 %vm3270_vm2, %v8087_v48  ;;  %3839 = vadd.xlane.f32.xlu1 %v3838_v28  ;;  %v3844_v26 = vsel %vm3270_vm2, %v8087_v48, 0.0 }
 0x210   : > { %3836 = vadd.xlane.f32.xlu0 %v3835_v38 }
 0x213   : > { %3845 = vadd.xlane.f32.xlu1 %v3844_v26 }
 0x214   : > { %3842 = vadd.xlane.f32.xlu0 %v3841_v45 }
 0x21e   : > { %v3660_v9 = vpop.xlane.xlu1 %3659 }
 0x21f   : > { %v3657_v16 = vpop.xlane.xlu0 %3656  ;;  %8088 = vrcp.f32 %v3660_v9 }
 0x220   : > { %8090 = vrcp.f32 %v3657_v16 }
 0x222   : > { %v3666_v35 = vpop.xlane.xlu1 %3665 }
 0x223   : > { %v3663_v13 = vpop.xlane.xlu0 %3662  ;;  %8092 = vrcp.f32 %v3666_v35 }
 0x224   : > { %8094 = vrcp.f32 %v3663_v13 }
 0x227   : > { %v3672_v40 = vpop.xlane.xlu1 %3671 }
 0x228   : > { %8096 = vrcp.f32 %v3672_v40 }
 0x229   : > { %v8089_v63 = vpop.eup %8088 }
 0x22a   : > { %v8091_v30 = vpop.eup %8090 }
 0x22c   : > { %v3678_v54 = vpop.xlane.xlu1 %3677 }
 0x22d   : > { %v3669_v20 = vpop.xlane.xlu0 %3668  ;;  %8098 = vrcp.f32 %v3678_v54  ;;  %v8093_v31 = vpop.eup %8092 }
 0x22e   : > { %v8095_v5 = vpop.eup %8094 }
 0x230   : > { %v3684_v49 = vpop.xlane.xlu1 %3683 }
 0x231   : > { %v3675_v29 = vpop.xlane.xlu0 %3674 }
 0x232   : > { %8100 = vrcp.f32 %v3675_v29  ;;  %v8097_v19 = vpop.eup %8096 }
 0x233   : > { %8102 = vrcp.f32 %v3669_v20 }
 0x234   : > { %v3690_v59 = vpop.xlane.xlu1 %3689  ;;  %8104 = vrcp.f32 %v3684_v49 }
 0x235   : > { %v3681_v37 = vpop.xlane.xlu0 %3680  ;;  %8106 = vrcp.f32 %v3690_v59 }
 0x237   : > { %v8099_v23 = vpop.eup %8098 }
 0x238   : > { %v9122_v14 = vpop.xlane.xlu1 %3695 }
 0x239   : > { %v3687_v11 = vpop.xlane.xlu0 %3686 }
 0x23a   : > { %8108 = vrcp.f32 %v3687_v11 }
 0x23b   : > { %8110 = vrcp.f32 %v3681_v37 }
 0x23c   : > { %v9126_v6 = vpop.xlane.xlu1 %3701  ;;  %v8101_v7 = vpop.eup %8100  ;;  %8112 = vrcp.f32 %v9122_v14 }
 0x23d   : > { %v9124_v18 = vpop.xlane.xlu0 %3692  ;;  %v8103_v17 = vpop.eup %8102  ;;  %8114 = vrcp.f32 %v9126_v6 }
 0x23e   : > { %v8105_v8 = vpop.eup %8104 }
 0x23f   : > { %v8107_v50 = vpop.eup %8106 }
 0x240   : > { %v9130_v51 = vpop.xlane.xlu1 %3707 }
 0x241   : > { %v9128_v12 = vpop.xlane.xlu0 %3698 }
 0x242   : > { %8116 = vrcp.f32 %v9128_v12 }
 0x243   : > { %8118 = vrcp.f32 %v9124_v18 }
 0x244   : > { %v9134_v33 = vpop.xlane.xlu1 %3713  ;;  %v8109_v28 = vpop.eup %8108  ;;  %8120 = vrcp.f32 %v9130_v51 }
 0x245   : > { %v9132_v32 = vpop.xlane.xlu0 %3704  ;;  %v8111_v9 = vpop.eup %8110  ;;  %8122 = vrcp.f32 %v9134_v33 }
 0x246   : > { %v8113_v49 = vpop.eup %8112 }
 0x247   : > { %v8115_v29 = vpop.eup %8114 }
 0x248   : > { %v9138_v22 = vpop.xlane.xlu1 %3719 }
 0x249   : > { %v9136_v21 = vpop.xlane.xlu0 %3710 }
 0x24a   : > { %8124 = vrcp.f32 %v9136_v21 }
 0x24b   : > { %8126 = vrcp.f32 %v9132_v32 }
 0x24c   : > { %v9142_v39 = vpop.xlane.xlu1 %3725  ;;  %v8117_v11 = vpop.eup %8116  ;;  %8128 = vrcp.f32 %v9138_v22 }
 0x24d   : > { %v9140_v52 = vpop.xlane.xlu0 %3716  ;;  %v8119_v12 = vpop.eup %8118  ;;  %8130 = vrcp.f32 %v9142_v39 }
 0x250   : > { %v9146_v62 = vpop.xlane.xlu1 %3731 }
 0x251   : > { %v9144_v24 = vpop.xlane.xlu0 %3722 }
 0x252   : > { %8132 = vrcp.f32 %v9144_v24 }
 0x253   : > { %8134 = vrcp.f32 %v9140_v52 }
 0x254   : > { %v9156_v58 = vpop.xlane.xlu1 %3737  ;;  %8136 = vrcp.f32 %v9146_v62 }
 0x255   : > { %v9148_v1 = vpop.xlane.xlu0 %3728  ;;  %8138 = vrcp.f32 %v9156_v58 }
 0x258   : > { %v9166_v15 = vpop.xlane.xlu1 %3743 }
 0x259   : > { %v9160_v34 = vpop.xlane.xlu0 %3734 }
 0x25a   : > { %8140 = vrcp.f32 %v9160_v34 }
 0x25b   : > { %8142 = vrcp.f32 %v9148_v1 }
 0x25c   : > { %v9172_v53 = vpop.xlane.xlu1 %3749  ;;  %8144 = vrcp.f32 %v9166_v15 }
 0x25d   : > { %v9170_v44 = vpop.xlane.xlu0 %3740  ;;  %8146 = vrcp.f32 %v9172_v53 }
 0x260   : > { %v9188_v10 = vpop.xlane.xlu1 %3755 }
 0x261   : > { %v9176_v57 = vpop.xlane.xlu0 %3746 }
 0x262   : > { %8148 = vrcp.f32 %v9176_v57 }
 0x263   : > { %8150 = vrcp.f32 %v9170_v44 }
 0x264   : > { %v9202_v20 = vpop.xlane.xlu1 %3761 }
 0x265   : > { %v7414_v56 = vpop.f32.mrb[32].mxu0  ;;  %v9190_v35 = vpop.xlane.xlu0 %3752 }
 0x266   : > { %v6504_v61 = vmul.f32 %v8089_v63, %v7414_v56  ;;  %v3919_v27 = vpop.f32.mrb[33].mxu0 }
 0x267   : > { %v6503_v0 = vmul.f32 %v8091_v30, %v3919_v27  ;;  %v8121_v30 = vpop.eup %8120  ;;  %8152 = vrcp.f32 %v9188_v10 }
 0x268   : > { %6568 = vst.msk [vmem:[%s9154_s27 + $0x8] sm:$0xff] %vm485_vm0, %v6504_v61  ;;  %v9210_v56 = vpop.xlane.xlu1 %3767  ;;  %v8123_v61 = vpop.eup %8122  ;;  %8154 = vrcp.f32 %v9202_v20 }
 0x269   : > { %6567 = vst.msk [vmem:[%s9154_s27] sm:$0xff] %vm485_vm0, %v6503_v0  ;;  %v7421_v4 = vpop.f32.mrb[32].mxu1  ;;  %v9206_v37 = vpop.xlane.xlu0 %3758 }
 0x26a   : > { %v6506_v2 = vmul.f32 %v8093_v31, %v7421_v4  ;;  %v4000_v60 = vpop.f32.mrb[33].mxu1  ;;  %v8125_v0 = vpop.eup %8124  ;;  %8156 = vrcp.f32 %v9206_v37 }
 0x26b   : > { %v6505_v3 = vmul.f32 %v8095_v5, %v4000_v60  ;;  %v8127_v5 = vpop.eup %8126  ;;  %8158 = vrcp.f32 %v9190_v35 }
 0x26c   : > { %6570 = vst.msk [vmem:[%s9154_s27 + $0x18] sm:$0xff] %vm485_vm0, %v6506_v2  ;;  %v9224_v2 = vpop.xlane.xlu1 %3773  ;;  %v8129_v52 = vpop.eup %8128  ;;  %8160 = vrcp.f32 %v9210_v56 }
 0x26d   : > { %6569 = vst.msk [vmem:[%s9154_s27 + $0x10] sm:$0xff] %vm485_vm0, %v6505_v3  ;;  %v9220_v32 = vpop.xlane.xlu0 %3764 }
 0x271   : > { %v7435_v55 = vpop.f32.mrb[34].mxu1 }
 0x272   : > { %v6510_v41 = vmul.f32 %v8099_v23, %v7435_v55  ;;  %v7428_v42 = vpop.f32.mrb[34].mxu0  ;;  %v4162_v25 = vpop.f32.mrb[35].mxu1 }
 0x273   : > { %v6508_v47 = vmul.f32 %v8097_v19, %v7428_v42  ;;  %v6509_v43 = vmul.f32 %v8101_v7, %v4162_v25  ;;  %v4081_v36 = vpop.f32.mrb[35].mxu0  ;;  %v9228_v19 = vpop.xlane.xlu0 %3770 }
 0x274   : > { %6574 = vst.msk [vmem:[%s9154_s27 + $0x38] sm:$0xff] %vm485_vm0, %v6510_v41  ;;  %v6507_v46 = vmul.f32 %v8103_v17, %v4081_v36  ;;  %v8131_v23 = vpop.eup %8130  ;;  %v9240_v55 = vpop.xlane.xlu1 %3779  ;;  %8162 = vrcp.f32 %v9224_v2 }
 0x275   : > { %6572 = vst.msk [vmem:[%s9154_s27 + $0x28] sm:$0xff] %vm485_vm0, %v6508_v47  ;;  %6573 = vst.msk [vmem:[%s9154_s27 + $0x30] sm:$0xff] %vm485_vm0, %v6509_v43  ;;  %v8133_v41 = vpop.eup %8132  ;;  %8164 = vrcp.f32 %v9228_v19 }
 0x276   : > { %6571 = vst.msk [vmem:[%s9154_s27 + $0x20] sm:$0xff] %vm485_vm0, %v6507_v46  ;;  %v8135_v17 = vpop.eup %8134  ;;  %8166 = vrcp.f32 %v9220_v32 }
 0x277   : > { %v9242_v47 = vpop.xlane.xlu0 %3776  ;;  %v8137_v46 = vpop.eup %8136  ;;  %8168 = vrcp.f32 %v9240_v55 }
 0x278   : > { %v9254_v1 = vpop.xlane.xlu1 %3785 }
 0x279   : > { %v7449_v48 = vpop.f32.mrb[36].mxu1 }
 0x27a   : > { %v6514_v38 = vmul.f32 %v8107_v50, %v7449_v48  ;;  %v7442_v26 = vpop.f32.mrb[36].mxu0  ;;  %v4324_v45 = vpop.f32.mrb[37].mxu1 }
 0x27b   : > { %v6512_v16 = vmul.f32 %v8105_v8, %v7442_v26  ;;  %v6513_v40 = vmul.f32 %v8109_v28, %v4324_v45  ;;  %v4243_v13 = vpop.f32.mrb[37].mxu0  ;;  %v8139_v8 = vpop.eup %8138  ;;  %8170 = vrcp.f32 %v9254_v1 }
 0x27c   : > { %6578 = vst.msk [vmem:[%s9154_s27 + $0x58] sm:$0xff] %vm485_vm0, %v6514_v38  ;;  %v6511_v54 = vmul.f32 %v8111_v9, %v4243_v13  ;;  %v9258_v50 = vpop.xlane.xlu0 %3782  ;;  %v8141_v15 = vpop.eup %8140 }
 0x27d   : > { %6576 = vst.msk [vmem:[%s9154_s27 + $0x48] sm:$0xff] %vm485_vm0, %v6512_v16  ;;  %6577 = vst.msk [vmem:[%s9154_s27 + $0x50] sm:$0xff] %vm485_vm0, %v6513_v40  ;;  %v8143_v53 = vpop.eup %8142  ;;  %v9262_v40 = vpop.xlane.xlu1 %3791  ;;  %8172 = vrcp.f32 %v9258_v50 }
 0x27e   : > { %6575 = vst.msk [vmem:[%s9154_s27 + $0x40] sm:$0xff] %vm485_vm0, %v6511_v54  ;;  %v8145_v13 = vpop.eup %8144  ;;  %8174 = vrcp.f32 %v9242_v47 }
 0x27f   : > { %v8147_v54 = vpop.eup %8146  ;;  %8176 = vrcp.f32 %v9262_v40 }
 0x280   : > { %v9272_v44 = vpop.xlane.xlu0 %3788 }
 0x281   : > { %v7463_v59 = vpop.f32.mrb[38].mxu1 }
 0x282   : > { %v6518_v14 = vmul.f32 %v8115_v29, %v7463_v59  ;;  %v7456_v18 = vpop.f32.mrb[38].mxu0  ;;  %v4486_v6 = vpop.f32.mrb[39].mxu1 }
 0x283   : > { %v6516_v51 = vmul.f32 %v8113_v49, %v7456_v18  ;;  %v6517_v33 = vmul.f32 %v8117_v11, %v4486_v6  ;;  %v4405_v63 = vpop.f32.mrb[39].mxu0  ;;  %v8149_v29 = vpop.eup %8148 }
 0x284   : > { %6582 = vst.msk [vmem:[%s9154_s27 + $0x78] sm:$0xff] %vm485_vm0, %v6518_v14  ;;  %v6515_v21 = vmul.f32 %v8119_v12, %v4405_v63  ;;  %v8151_v14 = vpop.eup %8150  ;;  %v3798_v18 = vpop.xlane.xlu1 %3797 }
 0x285   : > { %6580 = vst.msk [vmem:[%s9154_s27 + $0x68] sm:$0xff] %vm485_vm0, %v6516_v51  ;;  %6581 = vst.msk [vmem:[%s9154_s27 + $0x70] sm:$0xff] %vm485_vm0, %v6517_v33  ;;  %v3795_v37 = vpop.xlane.xlu0 %3794  ;;  %v8153_v35 = vpop.eup %8152  ;;  %8178 = vrcp.f32 %v3798_v18 }
 0x286   : > { %6579 = vst.msk [vmem:[%s9154_s27 + $0x60] sm:$0xff] %vm485_vm0, %v6515_v21  ;;  %v8155_v33 = vpop.eup %8154  ;;  %8180 = vrcp.f32 %v3795_v37 }
 0x287   : > { %8182 = vrcp.f32 %v9272_v44 }
 0x288   : > { %v3804_v63 = vpop.xlane.xlu1 %3803 }
 0x289   : > { %v7477_v27 = vpop.f32.mrb[40].mxu1  ;;  %8184 = vrcp.f32 %v3804_v63 }
 0x28a   : > { %v6522_v31 = vmul.f32 %v8123_v61, %v7477_v27  ;;  %v7470_v22 = vpop.f32.mrb[40].mxu0  ;;  %v4648_v4 = vpop.f32.mrb[41].mxu1 }
 0x28b   : > { %v6520_v39 = vmul.f32 %v8121_v30, %v7470_v22  ;;  %v6521_v60 = vmul.f32 %v8125_v0, %v4648_v4  ;;  %v4567_v3 = vpop.f32.mrb[41].mxu0  ;;  %v8157_v30 = vpop.eup %8156 }
 0x28c   : > { %6586 = vst.msk [vmem:[%s9154_s27 + $0x98] sm:$0xff] %vm485_vm0, %v6522_v31  ;;  %v6519_v24 = vmul.f32 %v8127_v5, %v4567_v3  ;;  %v8159_v0 = vpop.eup %8158  ;;  %v3801_v31 = vpop.xlane.xlu0 %3800 }
 0x28d   : > { %6584 = vst.msk [vmem:[%s9154_s27 + $0x88] sm:$0xff] %vm485_vm0, %v6520_v39  ;;  %6585 = vst.msk [vmem:[%s9154_s27 + $0x90] sm:$0xff] %vm485_vm0, %v6521_v60  ;;  %v3810_v32 = vpop.xlane.xlu1 %3809  ;;  %v8161_v39 = vpop.eup %8160 }
 0x28e   : > { %6583 = vst.msk [vmem:[%s9154_s27 + $0x80] sm:$0xff] %vm485_vm0, %v6519_v24  ;;  %v8163_v60 = vpop.eup %8162  ;;  %8186 = vrcp.f32 %v3810_v32 }
 0x28f   : > { %v8165_v19 = vpop.eup %8164 }
 0x290   : > { %v3807_v3 = vpop.xlane.xlu0 %3806 }
 0x291   : > { %v7491_v7 = vpop.f32.mrb[42].mxu1  ;;  %8188 = vrcp.f32 %v3807_v3 }
 0x292   : > { %v6526_v42 = vmul.f32 %v8131_v23, %v7491_v7  ;;  %v7484_v62 = vpop.f32.mrb[42].mxu0  ;;  %v4810_v25 = vpop.f32.mrb[43].mxu1  ;;  %8190 = vrcp.f32 %v3801_v31 }
 0x293   : > { %v6524_v58 = vmul.f32 %v8129_v52, %v7484_v62  ;;  %v6525_v43 = vmul.f32 %v8133_v41, %v4810_v25  ;;  %v4729_v36 = vpop.f32.mrb[43].mxu0  ;;  %v8167_v7 = vpop.eup %8166 }
 0x294   : > { %6590 = vst.msk [vmem:[%s9154_s27 + $0xb8] sm:$0xff] %vm485_vm0, %v6526_v42  ;;  %v6523_v34 = vmul.f32 %v8135_v17, %v4729_v36  ;;  %v3816_v17 = vpop.xlane.xlu1 %3815  ;;  %v3813_v47 = vpop.xlane.xlu0 %3812 }
 0x295   : > { %6588 = vst.msk [vmem:[%s9154_s27 + $0xa8] sm:$0xff] %vm485_vm0, %v6524_v58  ;;  %6589 = vst.msk [vmem:[%s9154_s27 + $0xb0] sm:$0xff] %vm485_vm0, %v6525_v43  ;;  %v8169_v58 = vpop.eup %8168  ;;  %8192 = vrcp.f32 %v3816_v17 }
 0x296   : > { %6587 = vst.msk [vmem:[%s9154_s27 + $0xa0] sm:$0xff] %vm485_vm0, %v6523_v34  ;;  %v8171_v43 = vpop.eup %8170 }
 0x297   : > { %v8173_v34 = vpop.eup %8172 }
 0x298   : > { %v8175_v50 = vpop.eup %8174 }
 0x299   : > { %v7505_v48 = vpop.f32.mrb[44].mxu1 }
 0x29a   : > { %v6530_v28 = vmul.f32 %v8139_v8, %v7505_v48  ;;  %v7498_v38 = vpop.f32.mrb[44].mxu0  ;;  %v4972_v26 = vpop.f32.mrb[45].mxu1 }
 0x29b   : > { %v6528_v45 = vmul.f32 %v8137_v46, %v7498_v38  ;;  %v6529_v9 = vmul.f32 %v8141_v15, %v4972_v26  ;;  %v4891_v16 = vpop.f32.mrb[45].mxu0  ;;  %v3822_v48 = vpop.xlane.xlu1 %3821 }
 0x29c   : > { %6594 = vst.msk [vmem:[%s9154_s27 + $0xd8] sm:$0xff] %vm485_vm0, %v6530_v28  ;;  %v6527_v57 = vmul.f32 %v8143_v53, %v4891_v16  ;;  %v3819_v53 = vpop.xlane.xlu0 %3818  ;;  %8194 = vrcp.f32 %v3822_v48 }
 0x29d   : > { %6592 = vst.msk [vmem:[%s9154_s27 + $0xc8] sm:$0xff] %vm485_vm0, %v6528_v45  ;;  %6593 = vst.msk [vmem:[%s9154_s27 + $0xd0] sm:$0xff] %vm485_vm0, %v6529_v9  ;;  %v8177_v45 = vpop.eup %8176  ;;  %8196 = vrcp.f32 %v3819_v53 }
 0x29e   : > { %6591 = vst.msk [vmem:[%s9154_s27 + $0xc0] sm:$0xff] %vm485_vm0, %v6527_v57  ;;  %v8179_v9 = vpop.eup %8178  ;;  %8198 = vrcp.f32 %v3813_v47 }
 0x29f   : > { %v3828_v16 = vpop.xlane.xlu1 %3827  ;;  %v8181_v40 = vpop.eup %8180 }
 0x2a0   : > { %8200 = vrcp.f32 %v3828_v16 }
 0x2a1   : > { %v7519_v49 = vpop.f32.mrb[46].mxu1 }
 0x2a2   : > { %v6534_v59 = vmul.f32 %v8147_v54, %v7519_v49  ;;  %v7512_v10 = vpop.f32.mrb[46].mxu0  ;;  %v5134_v11 = vpop.f32.mrb[47].mxu1 }
 0x2a3   : > { %v6532_v20 = vmul.f32 %v8145_v13, %v7512_v10  ;;  %v6533_v6 = vmul.f32 %v8149_v29, %v5134_v11  ;;  %v5053_v12 = vpop.f32.mrb[47].mxu0  ;;  %v8183_v49 = vpop.eup %8182 }
 0x2a4   : > { %6598 = vst.msk [vmem:[%s9154_s27 + $0xf8] sm:$0xff] %vm485_vm0, %v6534_v59  ;;  %v6531_v51 = vmul.f32 %v8151_v14, %v5053_v12  ;;  %v3825_v29 = vpop.xlane.xlu0 %3824  ;;  %v8185_v18 = vpop.eup %8184 }
 0x2a5   : > { %6596 = vst.msk [vmem:[%s9154_s27 + $0xe8] sm:$0xff] %vm485_vm0, %v6532_v20  ;;  %6597 = vst.msk [vmem:[%s9154_s27 + $0xf0] sm:$0xff] %vm485_vm0, %v6533_v6  ;;  %v3834_v20 = vpop.xlane.xlu1 %3833  ;;  %v8187_v6 = vpop.eup %8186 }
 0x2a6   : > { %6595 = vst.msk [vmem:[%s9154_s27 + $0xe0] sm:$0xff] %vm485_vm0, %v6531_v51  ;;  %v8189_v37 = vpop.eup %8188  ;;  %8202 = vrcp.f32 %v3834_v20 }
 0x2a8   : > { %v3831_v12 = vpop.xlane.xlu0 %3830 }
 0x2a9   : > { %v7533_v21 = vpop.f32.mrb[48].mxu1  ;;  %8204 = vrcp.f32 %v3831_v12 }
 0x2aa   : > { %v6538_v61 = vmul.f32 %v8155_v33, %v7533_v21  ;;  %v7526_v27 = vpop.f32.mrb[48].mxu0  ;;  %v5296_v56 = vpop.f32.mrb[49].mxu1  ;;  %8206 = vrcp.f32 %v3825_v29 }
 0x2ab   : > { %v6536_v22 = vmul.f32 %v8153_v35, %v7526_v27  ;;  %v6537_v4 = vmul.f32 %v8157_v30, %v5296_v56  ;;  %v5215_v5 = vpop.f32.mrb[49].mxu0  ;;  %v8191_v21 = vpop.eup %8190 }
 0x2ac   : > { %6602 = vst.msk [vmem:[%s9154_s27 + $0x118] sm:$0xff] %vm485_vm0, %v6538_v61  ;;  %v6535_v2 = vmul.f32 %v8159_v0, %v5215_v5  ;;  %v3840_v0 = vpop.xlane.xlu1 %3839  ;;  %v3837_v31 = vpop.xlane.xlu0 %3836 }
 0x2ad   : > { %6600 = vst.msk [vmem:[%s9154_s27 + $0x108] sm:$0xff] %vm485_vm0, %v6536_v22  ;;  %6601 = vst.msk [vmem:[%s9154_s27 + $0x110] sm:$0xff] %vm485_vm0, %v6537_v4  ;;  %v8193_v22 = vpop.eup %8192  ;;  %8208 = vrcp.f32 %v3840_v0 }
 0x2ae   : > { %6599 = vst.msk [vmem:[%s9154_s27 + $0x100] sm:$0xff] %vm485_vm0, %v6535_v2  ;;  %v8195_v4 = vpop.eup %8194  ;;  %8210 = vrcp.f32 %v3837_v31 }
 0x2af   : > { %v8197_v2 = vpop.eup %8196 }
 0x2b0   : > { %v8199_v3 = vpop.eup %8198 }
 0x2b1   : > { %v7547_v24 = vpop.f32.mrb[50].mxu1 }
 0x2b2   : > { %v6542_v52 = vmul.f32 %v8163_v60, %v7547_v24  ;;  %v7540_v23 = vpop.f32.mrb[50].mxu0  ;;  %v5458_v55 = vpop.f32.mrb[51].mxu1 }
 0x2b3   : > { %v6540_v41 = vmul.f32 %v8161_v39, %v7540_v23  ;;  %v6541_v42 = vmul.f32 %v8165_v19, %v5458_v55  ;;  %v5377_v62 = vpop.f32.mrb[51].mxu0  ;;  %v3846_v23 = vpop.xlane.xlu1 %3845 }
 0x2b4   : > { %6606 = vst.msk [vmem:[%s9154_s27 + $0x138] sm:$0xff] %vm485_vm0, %v6542_v52  ;;  %v6539_v25 = vmul.f32 %v8167_v7, %v5377_v62  ;;  %v3843_v7 = vpop.xlane.xlu0 %3842  ;;  %8212 = vrcp.f32 %v3846_v23 }
 0x2b5   : > { %6604 = vst.msk [vmem:[%s9154_s27 + $0x128] sm:$0xff] %vm485_vm0, %v6540_v41  ;;  %6605 = vst.msk [vmem:[%s9154_s27 + $0x130] sm:$0xff] %vm485_vm0, %v6541_v42  ;;  %v8201_v41 = vpop.eup %8200  ;;  %8214 = vrcp.f32 %v3843_v7 }
 0x2b6   : > { %6603 = vst.msk [vmem:[%s9154_s27 + $0x120] sm:$0xff] %vm485_vm0, %v6539_v25  ;;  %v8203_v42 = vpop.eup %8202 }
 0x2b7   : > { %v8205_v25 = vpop.eup %8204 }
 0x2b9   : > { %v7561_v36 = vpop.f32.mrb[52].mxu1 }
 0x2ba   : > { %v6546_v1 = vmul.f32 %v8171_v43, %v7561_v36  ;;  %v7554_v46 = vpop.f32.mrb[52].mxu0  ;;  %v5620_v8 = vpop.f32.mrb[53].mxu1 }
 0x2bb   : > { %v6544_v15 = vmul.f32 %v8169_v58, %v7554_v46  ;;  %v6545_v28 = vmul.f32 %v8173_v34, %v5620_v8  ;;  %v5539_v38 = vpop.f32.mrb[53].mxu0  ;;  %v8207_v43 = vpop.eup %8206 }
 0x2bc   : > { %6610 = vst.msk [vmem:[%s9154_s27 + $0x158] sm:$0xff] %vm485_vm0, %v6546_v1  ;;  %v6543_v26 = vmul.f32 %v8175_v50, %v5539_v38  ;;  %v8209_v8 = vpop.eup %8208 }
 0x2bd   : > { %6608 = vst.msk [vmem:[%s9154_s27 + $0x148] sm:$0xff] %vm485_vm0, %v6544_v15  ;;  %6609 = vst.msk [vmem:[%s9154_s27 + $0x150] sm:$0xff] %vm485_vm0, %v6545_v28  ;;  %v8211_v50 = vpop.eup %8210 }
 0x2be   : > { %6607 = vst.msk [vmem:[%s9154_s27 + $0x140] sm:$0xff] %vm485_vm0, %v6543_v26  ;;  %v8213_v15 = vpop.eup %8212 }
 0x2bf   : > { %v8215_v53 = vpop.eup %8214 }
 0x2c1   : > { %v7575_v57 = vpop.f32.mrb[54].mxu1 }
 0x2c2   : > { %v6550_v44 = vmul.f32 %v8179_v9, %v7575_v57  ;;  %v7568_v13 = vpop.f32.mrb[54].mxu0  ;;  %v5782_v54 = vpop.f32.mrb[55].mxu1 }
 0x2c3   : > { %v6548_v59 = vmul.f32 %v8177_v45, %v7568_v13  ;;  %v6549_v10 = vmul.f32 %v8181_v40, %v5782_v54  ;;  %v5701_v11 = vpop.f32.mrb[55].mxu0 }
 0x2c4   : > { %6614 = vst.msk [vmem:[%s9154_s27 + $0x178] sm:$0xff] %vm485_vm0, %v6550_v44  ;;  %v6547_v14 = vmul.f32 %v8183_v49, %v5701_v11 }
 0x2c5   : > { %6612 = vst.msk [vmem:[%s9154_s27 + $0x168] sm:$0xff] %vm485_vm0, %v6548_v59  ;;  %6613 = vst.msk [vmem:[%s9154_s27 + $0x170] sm:$0xff] %vm485_vm0, %v6549_v10 }
 0x2c6   : > { %6611 = vst.msk [vmem:[%s9154_s27 + $0x160] sm:$0xff] %vm485_vm0, %v6547_v14 }
 0x2c9   : > { %v7589_v51 = vpop.f32.mrb[56].mxu1 }
 0x2ca   : > { %v6554_v35 = vmul.f32 %v8187_v6, %v7589_v51  ;;  %v7582_v33 = vpop.f32.mrb[56].mxu0  ;;  %v5944_v63 = vpop.f32.mrb[57].mxu1 }
 0x2cb   : > { %v6552_v30 = vmul.f32 %v8185_v18, %v7582_v33  ;;  %v6553_v61 = vmul.f32 %v8189_v37, %v5944_v63  ;;  %v5863_v27 = vpop.f32.mrb[57].mxu0 }
 0x2cc   : > { %6618 = vst.msk [vmem:[%s9154_s27 + $0x198] sm:$0xff] %vm485_vm0, %v6554_v35  ;;  %v6551_v56 = vmul.f32 %v8191_v21, %v5863_v27 }
 0x2cd   : > { %6616 = vst.msk [vmem:[%s9154_s27 + $0x188] sm:$0xff] %vm485_vm0, %v6552_v30  ;;  %6617 = vst.msk [vmem:[%s9154_s27 + $0x190] sm:$0xff] %vm485_vm0, %v6553_v61 }
 0x2ce   : > { %6615 = vst.msk [vmem:[%s9154_s27 + $0x180] sm:$0xff] %vm485_vm0, %v6551_v56 }
 0x2d1   : > { %v7603_v5 = vpop.f32.mrb[58].mxu1 }
 0x2d2   : > { %v6558_v32 = vmul.f32 %v8195_v4, %v7603_v5  ;;  %v7596_v39 = vpop.f32.mrb[58].mxu0  ;;  %v6106_v60 = vpop.f32.mrb[59].mxu1 }
 0x2d3   : > { %v6556_v24 = vmul.f32 %v8193_v22, %v7596_v39  ;;  %v6557_v19 = vmul.f32 %v8197_v2, %v6106_v60  ;;  %v6025_v52 = vpop.f32.mrb[59].mxu0 }
 0x2d4   : > { %6622 = vst.msk [vmem:[%s9154_s27 + $0x1b8] sm:$0xff] %vm485_vm0, %v6558_v32  ;;  %v6555_v55 = vmul.f32 %v8199_v3, %v6025_v52 }
 0x2d5   : > { %6620 = vst.msk [vmem:[%s9154_s27 + $0x1a8] sm:$0xff] %vm485_vm0, %v6556_v24  ;;  %6621 = vst.msk [vmem:[%s9154_s27 + $0x1b0] sm:$0xff] %vm485_vm0, %v6557_v19 }
 0x2d6   : > { %6619 = vst.msk [vmem:[%s9154_s27 + $0x1a0] sm:$0xff] %vm485_vm0, %v6555_v55 }
 0x2d9   : > { %v7617_v62 = vpop.f32.mrb[60].mxu1 }
 0x2da   : > { %v6562_v17 = vmul.f32 %v8203_v42, %v7617_v62  ;;  %v7610_v47 = vpop.f32.mrb[60].mxu0  ;;  %v6268_v58 = vpop.f32.mrb[61].mxu1 }
 0x2db   : > { %v6560_v36 = vmul.f32 %v8201_v41, %v7610_v47  ;;  %v6561_v34 = vmul.f32 %v8205_v25, %v6268_v58  ;;  %v6187_v1 = vpop.f32.mrb[61].mxu0 }
 0x2dc   : > { %6626 = vst.msk [vmem:[%s9154_s27 + $0x1d8] sm:$0xff] %vm485_vm0, %v6562_v17  ;;  %v6559_v46 = vmul.f32 %v8207_v43, %v6187_v1 }
 0x2dd   : > { %6624 = vst.msk [vmem:[%s9154_s27 + $0x1c8] sm:$0xff] %vm485_vm0, %v6560_v36  ;;  %6625 = vst.msk [vmem:[%s9154_s27 + $0x1d0] sm:$0xff] %vm485_vm0, %v6561_v34 }
 0x2de   : > { %6623 = vst.msk [vmem:[%s9154_s27 + $0x1c0] sm:$0xff] %vm485_vm0, %v6559_v46 }
 0x2e1   : > { %v7624_v48 = vpop.f32.mrb[62].mxu0 }
 0x2e2   : > { %v6564_v28 = vmul.f32 %v8209_v8, %v7624_v48  ;;  %v7631_v38 = vpop.f32.mrb[62].mxu1  ;;  %v6349_v26 = vpop.f32.mrb[63].mxu0 }
 0x2e3   : > { %v6566_v45 = vmul.f32 %v8213_v15, %v7631_v38  ;;  %v6563_v9 = vmul.f32 %v8211_v50, %v6349_v26  ;;  %v6430_v16 = vpop.f32.mrb[63].mxu1 }
 0x2e4   : > { %6628 = vst.msk [vmem:[%s9154_s27 + $0x1e8] sm:$0xff] %vm485_vm0, %v6564_v28  ;;  %v6565_v57 = vmul.f32 %v8215_v53, %v6430_v16 }
 0x2e5   : > { %6630 = vst.msk [vmem:[%s9154_s27 + $0x1f8] sm:$0xff] %vm485_vm0, %v6566_v45  ;;  %6627 = vst.msk [vmem:[%s9154_s27 + $0x1e0] sm:$0xff] %vm485_vm0, %v6563_v9 }
 0x2e6   : > { %6629 = vst.msk [vmem:[%s9154_s27 + $0x1f0] sm:$0xff] %vm485_vm0, %v6565_v57 }
 0x2e7 PF: > { %s13_s12 = sadd.s32 1, %s8222_s12  }
 0x2e8   : > { %p10_p4 = scmp.ge.s32.totalorder %s13_s12, 6  }
 0x2ea   :  { %12 = sbr.rel (!%p10_p4) target bundleno = 1 (0x1), region = 68 }

// kernel: axial_attention_module_forward.7
= control target key start
LH: loop header
LB: loop body
LE: loop exit
PB: predicated region body
PF: predicated region fallthrough
CT: control target
= control target key end

     0   :  { %s631_s18 = smov 0   ;;  %s666_s0 = inlined_call_operand.vmem [shape: f32[4,4096], index: 0, kind: input, shape index: {}]   ;;  %s667_s1 = inlined_call_operand.vmem [shape: f32[4,4096], index: 1, kind: input, shape index: {}]   ;;  %s668_s2 = inlined_call_operand.vmem [shape: f32[4,4096], index: 2, kind: input, shape index: {}]   ;;  %s669_s3 = inlined_call_operand.vmem [shape: f32[4,4], index: 3, kind: input, shape index: {}]   ;;  %s670_s4 = inlined_call_operand.vmem [shape: f32[4,1], index: 4, kind: input, shape index: {}]   ;;  %s671_s5 = inlined_call_operand.vmem [shape: f32[4,4096], index: 5, kind: output, shape index: {}]  }
   0x1 LB: > { %s557_s19 = sadd.s32 4294967295, %s596_s18   ;;  %p561_p0 = scmp.ge.s32.totalorder %s596_s18, 1  ;;  %s596_s18 = sphi %s631_s18, %s15_s18  }
   0x2   : > { %p210_p1 = scmp.lt.s32.totalorder %s596_s18, 9 }
   0x4   : > { %p211_p2 = pnand %p561_p0, %p210_p1 }
   0x5   : > { %s562_s20 = sshll.u32 (!%p211_p2), %s557_s19, 2  ;;  %v598_v0 = vmov (!%p211_p2), 0.0   ;;  %v281_v1 = vld [vmem:[%s670_s4] sm:$0xf] (!%p211_p2)  ;;  %v599_v2 = vmov (!%p211_p2), 0   ;;  %vm312_vm0 = vcmask (!%p211_p2), 1043456   ;;  %v289_v14 = vlaneseq (!%p211_p2) }
   0x6   : > { %214 = sbr.rel (%p211_p2) target bundleno = 244 (0xf4), region = 40  ;;  %p249_p3 = scmp.lt.s32.totalorder (!%p211_p2), %s562_s20, 31  ;;  %385 = vmatprep.mubr.f32.mxu0 (!%p211_p2), %v598_v0  ;;  %456 = vmatprep.mubr.f32.mxu1 (!%p211_p2), %v598_v0  ;;  %v278_v11 = vld [vmem:[%s669_s3] sm:$0xf] (!%p211_p2)  ;;  %vm308_vm1 = vcmask (!%p211_p2), 31744  }
   0x7   : > { %589 = vset.pattern.permute.xlu0 (!%p211_p2), %v599_v2  ;;  %v600_v12 = vmov (!%p211_p2), 839922192   ;;  %v290_v16 = vshrl.u32 (!%p211_p2), %v289_v14, 7 }
   0x8   : > { %284 = vperm.xlu0 (!%p211_p2), %589, %v281_v1   ;;  %v287_v13 = vunpack.c.l.s4 (!%p211_p2), %v600_v12 }
   0xa   : > { %v288_v15 = vunpack.c.0.s8 (!%p211_p2), %v287_v13 }
   0xc   : > { %v291_v17 = vsub.s32 (!%p211_p2), %v288_v15, %v290_v16 }
   0xd   : > { %s673_s20 = smov (!%p249_p3, %s562_s20), 31 }
   0xe   : > { %s642_s23 = sshll.u32 %s673_s20, 2 }
   0xf   : > { %s252_s26 = scalar_lea.vmem %s666_s0, %s642_s23  ;;  %s258_s29 = scalar_lea.vmem %s667_s1, %s642_s23 }
  0x10   : > { %v272_v3 = vld [vmem:[%s252_s26] sm:$0xff]  ;;  %v273_v5 = vld [vmem:[%s252_s26 + $0x8] sm:$0xff]  ;;  %s264_s9 = scalar_lea.vmem %s668_s2, %s642_s23  ;;  %s270_s12 = scalar_lea.vmem %s671_s5, %s642_s23 }
  0x11   : > { %v274_v4 = vld [vmem:[%s258_s29] sm:$0xff]  ;;  %v275_v7 = vld [vmem:[%s258_s29 + $0x8] sm:$0xff] }
  0x12   : > { %v276_v6 = vadd.f32 %v274_v4, %v272_v3  ;;  %v277_v8 = vadd.f32 %v275_v7, %v273_v5  ;;  %v279_v20 = vld [vmem:[%s264_s9] sm:$0xff]  ;;  %v280_v21 = vld [vmem:[%s264_s9 + $0x8] sm:$0xff] }
  0x14   : > { %v300_v9 = vcombine.high %v276_v6, %v276_v6  ;;  %v301_v10 = vcombine.high %v277_v8, %v277_v8 }
  0x16   : > { %570 = vmatprep.subr.msk.mxu0 %vm312_vm0, %v300_v9  ;;  %573 = vmatprep.subr.msk.mxu1 %vm312_vm0, %v301_v10 }
  0x17   : > { %571 = vmatpush1.msk.msra.mxu0 %vm312_vm0, %v276_v6  ;;  %574 = vmatpush1.msk.msra.mxu1 %vm312_vm0, %v277_v8 }
  0x18   : > { %572 = vmatmul.mubr.msk.f32.vlgmr.msra.gmra.mrb[0].mxu0 %vm308_vm1, %v278_v11  ;;  %575 = vmatmul.mubr.msk.f32.vlgmr.msra.gmra.mrb[0].mxu1 %vm308_vm1, %v278_v11 }
  0x87   : > { %v285_v18 = vpop.permute.xlu0 %284 }
  0x88   : > { %v292_v19 = vrot.slane %v285_v18, %v291_v17 }
  0x8a   : > { %v294_v22 = vadd.f32 %v292_v19, %v279_v20  ;;  %v295_v23 = vadd.f32 %v292_v19, %v280_v21 }
  0x8c   : > { %v296_v24 = vmul.f32 2.0, %v294_v22  ;;  %v297_v25 = vmul.f32 2.0, %v295_v23 }
  0x8e   : > { %v304_v26 = vcombine.high %v296_v24, %v296_v24  ;;  %v305_v27 = vcombine.high %v297_v25, %v297_v25 }
  0xeb   : > { %v387_v28 = vpop.f32.mrb[0].mxu0  ;;  %v458_v30 = vpop.f32.mrb[0].mxu1 }
  0xec   : > { %v388_v29 = vadd.f32 %v387_v28, %v296_v24  ;;  %v389_v31 = vpop.f32.mrb[1].mxu0  ;;  %v459_v32 = vadd.f32 %v458_v30, %v297_v25  ;;  %v460_v34 = vpop.f32.mrb[1].mxu1 }
  0xed   : > { %v390_v33 = vadd.f32 %v389_v31, %v304_v26  ;;  %v461_v36 = vadd.f32 %v460_v34, %v305_v27 }
  0xee   : > { %v463_v35 = vmax.f32 %v388_v29, 0.0  ;;  %v465_v37 = vmax.f32 %v459_v32, 0.0 }
  0xef   : > { %v464_v38 = vmax.f32 %v390_v33, 0.0  ;;  %v466_v39 = vmax.f32 %v461_v36, 0.0 }
  0xf1   : > { %v471_v40 = vcombine.low %v463_v35, %v464_v38  ;;  %v472_v41 = vcombine.low %v465_v37, %v466_v39 }
  0xf3   : > { %475 = vst [vmem:[%s270_s12] sm:$0xff] %v471_v40  ;;  %476 = vst [vmem:[%s270_s12 + $0x8] sm:$0xff] %v472_v41 }
  0xf4 PF: > { %s15_s18 = sadd.s32 1, %s596_s18  }
  0xf5   : > { %p12_p4 = scmp.ge.s32.totalorder %s15_s18, 10  }
  0xf7   :  { %14 = sbr.rel (!%p12_p4) target bundleno = 1 (0x1), region = 76 }

</bundles_post_ra>
